<compile_context>
chip_gen: v5e
topology: v5e:2x2
jax: 0.10.0
libtpu: 0.0.40
codegen_flags: <defaults>
</compile_context>

<pallas_src>
import functools

import jax
import jax.numpy as jnp
from jax import lax
from jax.experimental import pallas as pl
from jax.experimental.pallas import tpu as pltpu


_BRANCH_NAMES = ("branch0", "branch1", "branch2", "branch3")

# (padding, dilation) per layer of each branch, matching the PyTorch module.
_BRANCH_GEOM = {
    "branch0": [((0, 0), (1, 1))],
    "branch1": [((0, 0), (1, 1)), ((0, 1), (1, 1)), ((1, 0), (1, 1)),
                ((3, 3), (3, 3))],
    "branch2": [((0, 0), (1, 1)), ((0, 2), (1, 1)), ((2, 0), (1, 1)),
                ((5, 5), (5, 5))],
    "branch3": [((0, 0), (1, 1)), ((0, 3), (1, 1)), ((3, 0), (1, 1)),
                ((7, 7), (7, 7))],
}
_CAT_GEOM = ((1, 1), (1, 1))


# ---------------------------------------------------------------------------
# Kernel: whole RFB forward for one batch element, channels-major (C, H*W).
# ---------------------------------------------------------------------------
def _rfb_kernel(x_ref, w_in_ref, s_in_ref, b_in_ref, *rest,
                H, W, out_ch, main_geoms):
    n_tail = len(rest) - 4
    w_tail_refs = rest[:n_tail]
    w_cat_ref, s_main_ref, b_main_ref, o_ref = rest[n_tail:]
    HW = H * W

    # Column coordinate of every lane (p = y*W + x  ->  x = p % W), built once.
    col = lax.broadcasted_iota(jnp.int32, (1, HW), 1) % W
    mask_cache = {}

    def col_mask(dx):
        # Valid output columns for a horizontal shift dx (memoised per dx).
        if dx not in mask_cache:
            mask_cache[dx] = (col < W - dx) if dx > 0 else (col >= -dx)
        return mask_cache[dx]

    def conv_bn(act, w_ref, scale, bias, geom):
        """BasicConv2d: stride-1 (dilated) conv + folded eval-mode BatchNorm.

        act: (Cin, HW) bf16; w_ref: (KH*KW, Cout, Cin) bf16;
        scale/bias: (Cout, 1) f32.  Returns (Cout, HW) f32.
        """
        KH, KW, dh, dw, ph, pw = geom
        cin = act.shape[0]
        margin = ph * W + pw                 # max |flattened shift| over taps
        if margin > 0:
            zpad = jnp.zeros((cin, margin), act.dtype)
            ext = jnp.concatenate([zpad, act, zpad], axis=1)
        w_all = w_ref[...]                   # (KH*KW, Cout, Cin) bf16
        acc = None
        for kh in range(KH):
            dy = kh * dh - ph
            for kw in range(KW):
                dx = kw * dw - pw
                shift = dy * W + dx
                if margin > 0:
                    tap = ext[:, margin + shift: margin + shift + HW]
                else:
                    tap = act
                if dx != 0:
                    # Zero the columns whose source pixel wrapped to another
                    # row (vertical out-of-range is covered by the zero margin).
                    tap = jnp.where(col_mask(dx), tap, jnp.zeros_like(tap))
                y = jnp.dot(w_all[kh * KW + kw], tap,
                            preferred_element_type=jnp.float32)
                acc = y if acc is None else acc + y
        return acc * scale + bias

    # --- fused input 1x1 convs: branch0..3 layer-0 + conv_res (one matmul) ---
    x2d = x_ref[...].reshape(x_ref.shape[1], HW)            # (in_ch, HW) bf16
    t_in = jnp.dot(w_in_ref[...], x2d, preferred_element_type=jnp.float32)
    t_in = t_in * s_in_ref[...] + b_in_ref[...]             # (5*out_ch, HW) f32

    heads = [t_in[i * out_ch:(i + 1) * out_ch, :] for i in range(5)]
    branch_in = [h.astype(jnp.bfloat16) for h in heads[:4]]  # one cast per head
    res = heads[4]                                           # conv_res out, f32

    s_main = s_main_ref[...]                                 # (10, out_ch, 1)
    b_main = b_main_ref[...]

    # --- branch tails (branch1..3, three conv+BN layers each) ---------------
    branch_out = [branch_in[0]]                              # branch0 = its 1x1
    li = 0
    for b in range(1, 4):
        h = branch_in[b]
        for _ in range(3):
            h = conv_bn(h, w_tail_refs[li], s_main[li], b_main[li],
                        main_geoms[li]).astype(jnp.bfloat16)
            li += 1
        branch_out.append(h)

    # --- conv_cat over the 4 branch outputs (sublane concat, VMEM only) -----
    # Channel order (x0, x1, x2, x3) matches torch.cat(..., dim=1); validated
    # end-to-end against the lax.conv reference in __main__.
    cat = jnp.concatenate(branch_out, axis=0)                # (4*out_ch, HW)
    y_cat = conv_bn(cat, w_cat_ref, s_main[li], b_main[li], main_geoms[li])

    # --- residual add + ReLU (lane-dense f32 store) --------------------------
    o_ref[...] = jnp.maximum(y_cat + res, 0.0).reshape(1, out_ch, HW)


# ---------------------------------------------------------------------------
# Wrapper: one fused pallas_call over a batch grid.
# ---------------------------------------------------------------------------
@jax.jit
def rfb_forward(params, x_nchw):
    """RFB forward: NCHW float32 in -> NCHW float32 out (PyTorch convention)."""
    N, in_ch, H, W = x_nchw.shape
    out_ch = params["conv_res"]["w"].shape[-1]
    HW = H * W
    x = x_nchw.reshape(N, in_ch, HW).astype(jnp.bfloat16)   # lane-dense, no transpose

    # --- fuse the five raw-input 1x1 convs into one (5*out_ch, in_ch) matmul --
    first = [params[n][0] for n in _BRANCH_NAMES] + [params["conv_res"]]
    w_in = jnp.concatenate(
        [l["w"].reshape(in_ch, out_ch).T for l in first], axis=0
    ).astype(jnp.bfloat16)                                   # (5*out_ch, in_ch)
    s_in = jnp.concatenate([l["scale"] for l in first]).reshape(-1, 1).astype(jnp.float32)
    b_in = jnp.concatenate([l["bias"] for l in first]).reshape(-1, 1).astype(jnp.float32)

    # --- remaining 10 layers: 3 per branch tail + conv_cat -------------------
    layers, pads_dils = [], []
    for name in ("branch1", "branch2", "branch3"):
        for layer, pd in list(zip(params[name], _BRANCH_GEOM[name]))[1:]:
            layers.append(layer)
            pads_dils.append(pd)
    layers.append(params["conv_cat"])
    pads_dils.append(_CAT_GEOM)

    w_main, geoms, scales, biases = [], [], [], []
    for layer, (pad, dil) in zip(layers, pads_dils):
        w = layer["w"]                                       # (KH, KW, Cin, Cout)
        KH, KW, cin, cout = w.shape
        # Per-tap (Cout, Cin) weights; taps on the untiled leading axis (no
        # in-kernel reshape / 4-D lane-padded indexing).
        w_main.append(jnp.transpose(w, (0, 1, 3, 2))
                      .reshape(KH * KW, cout, cin).astype(jnp.bfloat16))
        geoms.append((KH, KW, dil[0], dil[1], pad[0], pad[1]))
        scales.append(layer["scale"])
        biases.append(layer["bias"])
    s_main = jnp.stack(scales)[:, :, None].astype(jnp.float32)   # (10, out_ch, 1)
    b_main = jnp.stack(biases)[:, :, None].astype(jnp.float32)
    w_tail, w_cat = w_main[:-1], w_main[-1]

    inputs = [x, w_in, s_in, b_in, *w_tail, w_cat, s_main, b_main]
    in_specs = [pl.BlockSpec((1, in_ch, HW), lambda n: (n, 0, 0))]
    for arr in inputs[1:]:
        # TODO(synk): mark these constant-index parameter blocks single-buffered
        # (pipeline_mode=pl.Buffered(1)) once that is supported on all backends.
        in_specs.append(pl.BlockSpec(arr.shape, lambda n, nd=arr.ndim: (0,) * nd))

    # Scheduler hint + VMEM budget (capped well below v7x's 64 MiB physical).
    param_bytes = sum(a.size * a.dtype.itemsize for a in inputs[1:])
    k_cout = (w_in.shape[0] * w_in.shape[1]
              + sum(wm.shape[0] * wm.shape[1] * wm.shape[2] for wm in w_main))
    cost = pl.CostEstimate(
        flops=int(2 * N * HW * k_cout), transcendentals=0,
        bytes_accessed=int(x.size * 2 + N * HW * out_ch * 4 + param_bytes))
    tile_bytes = 2 * (in_ch * HW * 2 + out_ch * HW * 4)      # double-buffered I/O
    inter_bytes = 32 * out_ch * HW * 4                       # live intermediates
    vmem_limit = int(min(max(tile_bytes + 4 * param_bytes + inter_bytes, 4 << 20),
                         32 << 20))

    kernel = functools.partial(_rfb_kernel, H=H, W=W, out_ch=out_ch,
                               main_geoms=tuple(geoms))

    # TODO(synk): for production feature maps (large H*W) add a second
    # "parallel" grid axis over row blocks (with a 7-row halo for the
    # dilation-7 layer) so the working set stays in VMEM and both v7x
    # TensorCores get work at batch 1.
    out = pl.pallas_call(
        kernel,
        grid=(N,),
        out_shape=jax.ShapeDtypeStruct((N, out_ch, HW), jnp.float32),
        in_specs=in_specs,
        out_specs=pl.BlockSpec((1, out_ch, HW), lambda n: (n, 0, 0)),
        compiler_params=pltpu.CompilerParams(
            dimension_semantics=("parallel",),
            vmem_limit_bytes=vmem_limit),
        cost_estimate=cost,
    )(*inputs)
    return out.reshape(N, out_ch, H, W)


# ---------------------------------------------------------------------------
# Deterministic parameter construction (conv weight + eval-mode BN, folded).
# ---------------------------------------------------------------------------
def make_basic_conv(key, cin, cout, kh, kw):
    k1, k2, k3, k4, k5 = jax.random.split(key, 5)
    w = jax.random.normal(k1, (kh, kw, cin, cout), jnp.float32) * 0.1
    gamma = jax.random.uniform(k2, (cout,), jnp.float32, 0.5, 1.5)
    beta = jax.random.normal(k3, (cout,), jnp.float32) * 0.1
    mean = jax.random.normal(k4, (cout,), jnp.float32) * 0.1
    var = jax.random.uniform(k5, (cout,), jnp.float32, 0.5, 1.5)
    eps = 1e-5
    scale = gamma / jnp.sqrt(var + eps)
    bias = beta - mean * scale
    return {"w": w, "scale": scale, "bias": bias}


def make_rfb_params(key, in_ch, out_ch):
    keys = iter(jax.random.split(key, 32))
    p = {}
    p["branch0"] = [make_basic_conv(next(keys), in_ch, out_ch, 1, 1)]
    p["branch1"] = [
        make_basic_conv(next(keys), in_ch, out_ch, 1, 1),
        make_basic_conv(next(keys), out_ch, out_ch, 1, 3),
        make_basic_conv(next(keys), out_ch, out_ch, 3, 1),
        make_basic_conv(next(keys), out_ch, out_ch, 3, 3),
    ]
    p["branch2"] = [
        make_basic_conv(next(keys), in_ch, out_ch, 1, 1),
        make_basic_conv(next(keys), out_ch, out_ch, 1, 5),
        make_basic_conv(next(keys), out_ch, out_ch, 5, 1),
        make_basic_conv(next(keys), out_ch, out_ch, 3, 3),
    ]
    p["branch3"] = [
        make_basic_conv(next(keys), in_ch, out_ch, 1, 1),
        make_basic_conv(next(keys), out_ch, out_ch, 1, 7),
        make_basic_conv(next(keys), out_ch, out_ch, 7, 1),
        make_basic_conv(next(keys), out_ch, out_ch, 3, 3),
    ]
    p["conv_cat"] = make_basic_conv(next(keys), 4 * out_ch, out_ch, 3, 3)
    p["conv_res"] = make_basic_conv(next(keys), in_ch, out_ch, 1, 1)
    return p


# ---------------------------------------------------------------------------
# Pure-JAX reference (lax.conv, same bf16-operand / f32-accumulate recipe).
# ---------------------------------------------------------------------------
def _ref_conv_bn(x, w, scale, bias, padding, dilation):
    y = lax.conv_general_dilated(
        x.astype(jnp.bfloat16), w.astype(jnp.bfloat16),
        window_strides=(1, 1),
        padding=[(padding[0], padding[0]), (padding[1], padding[1])],
        rhs_dilation=dilation,
        dimension_numbers=("NHWC", "HWIO", "NHWC"),
        preferred_element_type=jnp.float32)
    return y * scale + bias


def rfb_reference(params, x_nchw):
    x = jnp.transpose(x_nchw, (0, 2, 3, 1)).astype(jnp.float32)
    outs = []
    for name in _BRANCH_NAMES:
        h = x
        for layer, (pad, dil) in zip(params[name], _BRANCH_GEOM[name]):
            h = _ref_conv_bn(h, layer["w"], layer["scale"], layer["bias"],
                             pad, dil)
        outs.append(h)
    cat = jnp.concatenate(outs, axis=-1)
    cc = params["conv_cat"]
    y_cat = _ref_conv_bn(cat, cc["w"], cc["scale"], cc["bias"], (1, 1), (1, 1))
    cr = params["conv_res"]
    res = _ref_conv_bn(x, cr["w"], cr["scale"], cr["bias"], (0, 0), (1, 1))
    y = jnp.maximum(y_cat + res, 0.0)
    return jnp.transpose(y, (0, 3, 1, 2))


if __name__ == "__main__":
    key = jax.random.PRNGKey(0)
    k_param, k_x = jax.random.split(key)

    in_channel, out_channel = 8, 8
    N, H, W = 2, 16, 16
    x = jax.random.normal(k_x, (N, in_channel, H, W), jnp.float32)

    params = make_rfb_params(k_param, in_channel, out_channel)

    out = jax.block_until_ready(rfb_forward(params, x))     # fused Pallas kernel
    ref = jax.block_until_ready(rfb_reference(params, x))

    assert out.shape == (N, out_channel, H, W), out.shape
    rel_err = float(jnp.max(jnp.abs(out - ref) / (1.0 + jnp.abs(ref))))
    assert rel_err < 1e-2, f"max relative error {rel_err}"

    print("KERNEL_OK")
</pallas_src>

<mosaic_0001>
module attributes {stable_mosaic.version = 11 : i64} {
  func.func @_rfb_kernel(%arg0: i32, %arg1: memref<1x8x256xbf16, #tpu.memory_space<vmem>>, %arg2: memref<40x8xbf16, #tpu.memory_space<vmem>>, %arg3: memref<40x1xf32, #tpu.memory_space<vmem>>, %arg4: memref<40x1xf32, #tpu.memory_space<vmem>>, %arg5: memref<3x8x8xbf16, #tpu.memory_space<vmem>>, %arg6: memref<3x8x8xbf16, #tpu.memory_space<vmem>>, %arg7: memref<9x8x8xbf16, #tpu.memory_space<vmem>>, %arg8: memref<5x8x8xbf16, #tpu.memory_space<vmem>>, %arg9: memref<5x8x8xbf16, #tpu.memory_space<vmem>>, %arg10: memref<9x8x8xbf16, #tpu.memory_space<vmem>>, %arg11: memref<7x8x8xbf16, #tpu.memory_space<vmem>>, %arg12: memref<7x8x8xbf16, #tpu.memory_space<vmem>>, %arg13: memref<9x8x8xbf16, #tpu.memory_space<vmem>>, %arg14: memref<9x8x32xbf16, #tpu.memory_space<vmem>>, %arg15: memref<10x8x1xf32, #tpu.memory_space<vmem>>, %arg16: memref<10x8x1xf32, #tpu.memory_space<vmem>>, %arg17: memref<1x8x256xf32, #tpu.memory_space<vmem>>) attributes {dimension_semantics = [#tpu.dimension_semantics<parallel>], iteration_bounds = array<i64: 2>, scalar_prefetch = 0 : i64, scratch_operands = 0 : i64, tpu.core_type = #tpu.core_type<tc>, window_params = [{transform_indices = @transform_0, window_bounds = array<i64: 1, 8, 256>}, {pipeline_mode = #tpu.pipeline_mode<synchronous>, transform_indices = @transform_1, window_bounds = array<i64: 40, 8>}, {pipeline_mode = #tpu.pipeline_mode<synchronous>, transform_indices = @transform_2, window_bounds = array<i64: 40, 1>}, {pipeline_mode = #tpu.pipeline_mode<synchronous>, transform_indices = @transform_3, window_bounds = array<i64: 40, 1>}, {pipeline_mode = #tpu.pipeline_mode<synchronous>, transform_indices = @transform_4, window_bounds = array<i64: 3, 8, 8>}, {pipeline_mode = #tpu.pipeline_mode<synchronous>, transform_indices = @transform_5, window_bounds = array<i64: 3, 8, 8>}, {pipeline_mode = #tpu.pipeline_mode<synchronous>, transform_indices = @transform_6, window_bounds = array<i64: 9, 8, 8>}, {pipeline_mode = #tpu.pipeline_mode<synchronous>, transform_indices = @transform_7, window_bounds = array<i64: 5, 8, 8>}, {pipeline_mode = #tpu.pipeline_mode<synchronous>, transform_indices = @transform_8, window_bounds = array<i64: 5, 8, 8>}, {pipeline_mode = #tpu.pipeline_mode<synchronous>, transform_indices = @transform_9, window_bounds = array<i64: 9, 8, 8>}, {pipeline_mode = #tpu.pipeline_mode<synchronous>, transform_indices = @transform_10, window_bounds = array<i64: 7, 8, 8>}, {pipeline_mode = #tpu.pipeline_mode<synchronous>, transform_indices = @transform_11, window_bounds = array<i64: 7, 8, 8>}, {pipeline_mode = #tpu.pipeline_mode<synchronous>, transform_indices = @transform_12, window_bounds = array<i64: 9, 8, 8>}, {pipeline_mode = #tpu.pipeline_mode<synchronous>, transform_indices = @transform_13, window_bounds = array<i64: 9, 8, 32>}, {pipeline_mode = #tpu.pipeline_mode<synchronous>, transform_indices = @transform_14, window_bounds = array<i64: 10, 8, 1>}, {pipeline_mode = #tpu.pipeline_mode<synchronous>, transform_indices = @transform_15, window_bounds = array<i64: 10, 8, 1>}, {transform_indices = @transform_16, window_bounds = array<i64: 1, 8, 256>}]} {
    %0 = tpu.iota {dimensions = array<i32: 1>} : vector<1x256xi32>
    %c16_i32 = arith.constant 16 : i32
    %c0_i32 = arith.constant 0 : i32
    %1 = arith.cmpi eq, %c16_i32, %c0_i32 : i32
    %c1_i32 = arith.constant 1 : i32
    %2 = arith.select %1, %c1_i32, %c16_i32 : i32
    %3 = vector.broadcast %2 : i32 to vector<1x256xi32>
    %4 = arith.remsi %0, %3 : vector<1x256xi32>
    %c0_i32_0 = arith.constant 0 : i32
    %5 = vector.broadcast %c0_i32_0 : i32 to vector<1x256xi32>
    %6 = arith.cmpi ne, %4, %5 : vector<1x256xi32>
    %c0_i32_1 = arith.constant 0 : i32
    %7 = vector.broadcast %c0_i32_1 : i32 to vector<1x256xi32>
    %8 = arith.cmpi slt, %4, %7 : vector<1x256xi32>
    %c0_i32_2 = arith.constant 0 : i32
    %9 = arith.cmpi slt, %2, %c0_i32_2 : i32
    %10 = vector.broadcast %9 : i1 to vector<1x256xi1>
    %11 = vector.broadcast %10 : vector<1x256xi1> to vector<1x256xi1>
    %12 = arith.xori %8, %11 : vector<1x256xi1>
    %13 = arith.andi %12, %6 : vector<1x256xi1>
    %14 = vector.broadcast %2 : i32 to vector<1x256xi32>
    %15 = arith.addi %4, %14 : vector<1x256xi32>
    %16 = arith.select %13, %15, %4 : vector<1x256xi1>, vector<1x256xi32>
    %c0 = arith.constant 0 : index
    %c0_3 = arith.constant 0 : index
    %c0_4 = arith.constant 0 : index
    %17 = vector.load %arg1[%c0, %c0_3, %c0_4] : memref<1x8x256xbf16, #tpu.memory_space<vmem>>, vector<1x8x256xbf16>
    %18 = vector.shape_cast %17 : vector<1x8x256xbf16> to vector<8x256xbf16>
    %c0_5 = arith.constant 0 : index
    %c0_6 = arith.constant 0 : index
    %19 = vector.load %arg2[%c0_5, %c0_6] : memref<40x8xbf16, #tpu.memory_space<vmem>>, vector<40x8xbf16>
    %cst = arith.constant dense<0.000000e+00> : vector<40x256xf32>
    %20 = tpu.matmul %19, %18, %cst {dimension_numbers = #tpu.dot_dimension_numbers<[1], [0], [0], [1], [0, 0, 1, 1], [], []>} : vector<40x8xbf16>, vector<8x256xbf16>, vector<40x256xf32> -> vector<40x256xf32>
    %c0_7 = arith.constant 0 : index
    %c0_8 = arith.constant 0 : index
    %21 = vector.load %arg3[%c0_7, %c0_8] : memref<40x1xf32, #tpu.memory_space<vmem>>, vector<40x1xf32>
    %22 = vector.broadcast %21 : vector<40x1xf32> to vector<40x256xf32>
    %23 = arith.mulf %20, %22 : vector<40x256xf32>
    %c0_9 = arith.constant 0 : index
    %c0_10 = arith.constant 0 : index
    %24 = vector.load %arg4[%c0_9, %c0_10] : memref<40x1xf32, #tpu.memory_space<vmem>>, vector<40x1xf32>
    %25 = vector.broadcast %24 : vector<40x1xf32> to vector<40x256xf32>
    %26 = arith.addf %23, %25 : vector<40x256xf32>
    %27 = vector.extract_strided_slice %26 {offsets = [0, 0], sizes = [8, 256], strides = [1, 1]} : vector<40x256xf32> to vector<8x256xf32>
    %28 = vector.extract_strided_slice %26 {offsets = [8, 0], sizes = [8, 256], strides = [1, 1]} : vector<40x256xf32> to vector<8x256xf32>
    %29 = vector.extract_strided_slice %26 {offsets = [16, 0], sizes = [8, 256], strides = [1, 1]} : vector<40x256xf32> to vector<8x256xf32>
    %30 = vector.extract_strided_slice %26 {offsets = [24, 0], sizes = [8, 256], strides = [1, 1]} : vector<40x256xf32> to vector<8x256xf32>
    %31 = vector.extract_strided_slice %26 {offsets = [32, 0], sizes = [8, 256], strides = [1, 1]} : vector<40x256xf32> to vector<8x256xf32>
    %32 = arith.truncf %27 : vector<8x256xf32> to vector<8x256xbf16>
    %33 = arith.truncf %28 : vector<8x256xf32> to vector<8x256xbf16>
    %34 = arith.truncf %29 : vector<8x256xf32> to vector<8x256xbf16>
    %35 = arith.truncf %30 : vector<8x256xf32> to vector<8x256xbf16>
    %c0_11 = arith.constant 0 : index
    %c0_12 = arith.constant 0 : index
    %c0_13 = arith.constant 0 : index
    %36 = vector.load %arg15[%c0_11, %c0_12, %c0_13] : memref<10x8x1xf32, #tpu.memory_space<vmem>>, vector<10x8x1xf32>
    %c0_14 = arith.constant 0 : index
    %c0_15 = arith.constant 0 : index
    %c0_16 = arith.constant 0 : index
    %37 = vector.load %arg16[%c0_14, %c0_15, %c0_16] : memref<10x8x1xf32, #tpu.memory_space<vmem>>, vector<10x8x1xf32>
    %38 = vector.extract_strided_slice %36 {offsets = [0, 0, 0], sizes = [1, 8, 1], strides = [1, 1, 1]} : vector<10x8x1xf32> to vector<1x8x1xf32>
    %39 = vector.shape_cast %38 : vector<1x8x1xf32> to vector<8x1xf32>
    %40 = vector.extract_strided_slice %37 {offsets = [0, 0, 0], sizes = [1, 8, 1], strides = [1, 1, 1]} : vector<10x8x1xf32> to vector<1x8x1xf32>
    %41 = vector.shape_cast %40 : vector<1x8x1xf32> to vector<8x1xf32>
    %cst_17 = arith.constant 0.000000e+00 : bf16
    %42 = vector.broadcast %cst_17 : bf16 to vector<8x1xbf16>
    %43 = tpu.concatenate %42, %33, %42 in 1 : vector<8x1xbf16>, vector<8x256xbf16>, vector<8x1xbf16> -> vector<8x258xbf16>
    %c0_18 = arith.constant 0 : index
    %c0_19 = arith.constant 0 : index
    %c0_20 = arith.constant 0 : index
    %44 = vector.load %arg5[%c0_18, %c0_19, %c0_20] : memref<3x8x8xbf16, #tpu.memory_space<vmem>>, vector<3x8x8xbf16>
    %45 = vector.extract_strided_slice %43 {offsets = [0, 0], sizes = [8, 256], strides = [1, 1]} : vector<8x258xbf16> to vector<8x256xbf16>
    %c1_i32_21 = arith.constant 1 : i32
    %46 = vector.broadcast %c1_i32_21 : i32 to vector<1x256xi32>
    %47 = arith.cmpi sge, %16, %46 : vector<1x256xi32>
    %cst_22 = arith.constant 0.000000e+00 : bf16
    %48 = vector.broadcast %cst_22 : bf16 to vector<8x256xbf16>
    %49 = vector.shape_cast %47 : vector<1x256xi1> to vector<1x256xi1>
    %50 = vector.broadcast %49 : vector<1x256xi1> to vector<8x256xi1>
    %51 = arith.select %50, %45, %48 : vector<8x256xi1>, vector<8x256xbf16>
    %52 = vector.extract_strided_slice %44 {offsets = [0, 0, 0], sizes = [1, 8, 8], strides = [1, 1, 1]} : vector<3x8x8xbf16> to vector<1x8x8xbf16>
    %53 = vector.shape_cast %52 : vector<1x8x8xbf16> to vector<8x8xbf16>
    %cst_23 = arith.constant dense<0.000000e+00> : vector<8x256xf32>
    %54 = tpu.matmul %53, %51, %cst_23 {dimension_numbers = #tpu.dot_dimension_numbers<[1], [0], [0], [1], [0, 0, 1, 1], [], []>} : vector<8x8xbf16>, vector<8x256xbf16>, vector<8x256xf32> -> vector<8x256xf32>
    %55 = vector.extract_strided_slice %43 {offsets = [0, 1], sizes = [8, 256], strides = [1, 1]} : vector<8x258xbf16> to vector<8x256xbf16>
    %56 = vector.extract_strided_slice %44 {offsets = [1, 0, 0], sizes = [1, 8, 8], strides = [1, 1, 1]} : vector<3x8x8xbf16> to vector<1x8x8xbf16>
    %57 = vector.shape_cast %56 : vector<1x8x8xbf16> to vector<8x8xbf16>
    %cst_24 = arith.constant dense<0.000000e+00> : vector<8x256xf32>
    %58 = tpu.matmul %57, %55, %cst_24 {dimension_numbers = #tpu.dot_dimension_numbers<[1], [0], [0], [1], [0, 0, 1, 1], [], []>} : vector<8x8xbf16>, vector<8x256xbf16>, vector<8x256xf32> -> vector<8x256xf32>
    %59 = arith.addf %54, %58 : vector<8x256xf32>
    %60 = vector.extract_strided_slice %43 {offsets = [0, 2], sizes = [8, 256], strides = [1, 1]} : vector<8x258xbf16> to vector<8x256xbf16>
    %c15_i32 = arith.constant 15 : i32
    %61 = vector.broadcast %c15_i32 : i32 to vector<1x256xi32>
    %62 = arith.cmpi slt, %16, %61 : vector<1x256xi32>
    %cst_25 = arith.constant 0.000000e+00 : bf16
    %63 = vector.broadcast %cst_25 : bf16 to vector<8x256xbf16>
    %64 = vector.shape_cast %62 : vector<1x256xi1> to vector<1x256xi1>
    %65 = vector.broadcast %64 : vector<1x256xi1> to vector<8x256xi1>
    %66 = arith.select %65, %60, %63 : vector<8x256xi1>, vector<8x256xbf16>
    %67 = vector.extract_strided_slice %44 {offsets = [2, 0, 0], sizes = [1, 8, 8], strides = [1, 1, 1]} : vector<3x8x8xbf16> to vector<1x8x8xbf16>
    %68 = vector.shape_cast %67 : vector<1x8x8xbf16> to vector<8x8xbf16>
    %cst_26 = arith.constant dense<0.000000e+00> : vector<8x256xf32>
    %69 = tpu.matmul %68, %66, %cst_26 {dimension_numbers = #tpu.dot_dimension_numbers<[1], [0], [0], [1], [0, 0, 1, 1], [], []>} : vector<8x8xbf16>, vector<8x256xbf16>, vector<8x256xf32> -> vector<8x256xf32>
    %70 = arith.addf %59, %69 : vector<8x256xf32>
    %71 = vector.broadcast %39 : vector<8x1xf32> to vector<8x256xf32>
    %72 = arith.mulf %70, %71 : vector<8x256xf32>
    %73 = vector.broadcast %41 : vector<8x1xf32> to vector<8x256xf32>
    %74 = arith.addf %72, %73 : vector<8x256xf32>
    %75 = arith.truncf %74 : vector<8x256xf32> to vector<8x256xbf16>
    %76 = vector.extract_strided_slice %36 {offsets = [1, 0, 0], sizes = [1, 8, 1], strides = [1, 1, 1]} : vector<10x8x1xf32> to vector<1x8x1xf32>
    %77 = vector.shape_cast %76 : vector<1x8x1xf32> to vector<8x1xf32>
    %78 = vector.extract_strided_slice %37 {offsets = [1, 0, 0], sizes = [1, 8, 1], strides = [1, 1, 1]} : vector<10x8x1xf32> to vector<1x8x1xf32>
    %79 = vector.shape_cast %78 : vector<1x8x1xf32> to vector<8x1xf32>
    %cst_27 = arith.constant 0.000000e+00 : bf16
    %80 = vector.broadcast %cst_27 : bf16 to vector<8x16xbf16>
    %81 = tpu.concatenate %80, %75, %80 in 1 : vector<8x16xbf16>, vector<8x256xbf16>, vector<8x16xbf16> -> vector<8x288xbf16>
    %c0_28 = arith.constant 0 : index
    %c0_29 = arith.constant 0 : index
    %c0_30 = arith.constant 0 : index
    %82 = vector.load %arg6[%c0_28, %c0_29, %c0_30] : memref<3x8x8xbf16, #tpu.memory_space<vmem>>, vector<3x8x8xbf16>
    %83 = vector.extract_strided_slice %81 {offsets = [0, 0], sizes = [8, 256], strides = [1, 1]} : vector<8x288xbf16> to vector<8x256xbf16>
    %84 = vector.extract_strided_slice %82 {offsets = [0, 0, 0], sizes = [1, 8, 8], strides = [1, 1, 1]} : vector<3x8x8xbf16> to vector<1x8x8xbf16>
    %85 = vector.shape_cast %84 : vector<1x8x8xbf16> to vector<8x8xbf16>
    %cst_31 = arith.constant dense<0.000000e+00> : vector<8x256xf32>
    %86 = tpu.matmul %85, %83, %cst_31 {dimension_numbers = #tpu.dot_dimension_numbers<[1], [0], [0], [1], [0, 0, 1, 1], [], []>} : vector<8x8xbf16>, vector<8x256xbf16>, vector<8x256xf32> -> vector<8x256xf32>
    %87 = vector.extract_strided_slice %81 {offsets = [0, 16], sizes = [8, 256], strides = [1, 1]} : vector<8x288xbf16> to vector<8x256xbf16>
    %88 = vector.extract_strided_slice %82 {offsets = [1, 0, 0], sizes = [1, 8, 8], strides = [1, 1, 1]} : vector<3x8x8xbf16> to vector<1x8x8xbf16>
    %89 = vector.shape_cast %88 : vector<1x8x8xbf16> to vector<8x8xbf16>
    %cst_32 = arith.constant dense<0.000000e+00> : vector<8x256xf32>
    %90 = tpu.matmul %89, %87, %cst_32 {dimension_numbers = #tpu.dot_dimension_numbers<[1], [0], [0], [1], [0, 0, 1, 1], [], []>} : vector<8x8xbf16>, vector<8x256xbf16>, vector<8x256xf32> -> vector<8x256xf32>
    %91 = arith.addf %86, %90 : vector<8x256xf32>
    %92 = vector.extract_strided_slice %81 {offsets = [0, 32], sizes = [8, 256], strides = [1, 1]} : vector<8x288xbf16> to vector<8x256xbf16>
    %93 = vector.extract_strided_slice %82 {offsets = [2, 0, 0], sizes = [1, 8, 8], strides = [1, 1, 1]} : vector<3x8x8xbf16> to vector<1x8x8xbf16>
    %94 = vector.shape_cast %93 : vector<1x8x8xbf16> to vector<8x8xbf16>
    %cst_33 = arith.constant dense<0.000000e+00> : vector<8x256xf32>
    %95 = tpu.matmul %94, %92, %cst_33 {dimension_numbers = #tpu.dot_dimension_numbers<[1], [0], [0], [1], [0, 0, 1, 1], [], []>} : vector<8x8xbf16>, vector<8x256xbf16>, vector<8x256xf32> -> vector<8x256xf32>
    %96 = arith.addf %91, %95 : vector<8x256xf32>
    %97 = vector.broadcast %77 : vector<8x1xf32> to vector<8x256xf32>
    %98 = arith.mulf %96, %97 : vector<8x256xf32>
    %99 = vector.broadcast %79 : vector<8x1xf32> to vector<8x256xf32>
    %100 = arith.addf %98, %99 : vector<8x256xf32>
    %101 = arith.truncf %100 : vector<8x256xf32> to vector<8x256xbf16>
    %102 = vector.extract_strided_slice %36 {offsets = [2, 0, 0], sizes = [1, 8, 1], strides = [1, 1, 1]} : vector<10x8x1xf32> to vector<1x8x1xf32>
    %103 = vector.shape_cast %102 : vector<1x8x1xf32> to vector<8x1xf32>
    %104 = vector.extract_strided_slice %37 {offsets = [2, 0, 0], sizes = [1, 8, 1], strides = [1, 1, 1]} : vector<10x8x1xf32> to vector<1x8x1xf32>
    %105 = vector.shape_cast %104 : vector<1x8x1xf32> to vector<8x1xf32>
    %cst_34 = arith.constant 0.000000e+00 : bf16
    %106 = vector.broadcast %cst_34 : bf16 to vector<8x51xbf16>
    %107 = tpu.concatenate %106, %101, %106 in 1 : vector<8x51xbf16>, vector<8x256xbf16>, vector<8x51xbf16> -> vector<8x358xbf16>
    %c0_35 = arith.constant 0 : index
    %c0_36 = arith.constant 0 : index
    %c0_37 = arith.constant 0 : index
    %108 = vector.load %arg7[%c0_35, %c0_36, %c0_37] : memref<9x8x8xbf16, #tpu.memory_space<vmem>>, vector<9x8x8xbf16>
    %109 = vector.extract_strided_slice %107 {offsets = [0, 0], sizes = [8, 256], strides = [1, 1]} : vector<8x358xbf16> to vector<8x256xbf16>
    %c3_i32 = arith.constant 3 : i32
    %110 = vector.broadcast %c3_i32 : i32 to vector<1x256xi32>
    %111 = arith.cmpi sge, %16, %110 : vector<1x256xi32>
    %cst_38 = arith.constant 0.000000e+00 : bf16
    %112 = vector.broadcast %cst_38 : bf16 to vector<8x256xbf16>
    %113 = vector.shape_cast %111 : vector<1x256xi1> to vector<1x256xi1>
    %114 = vector.broadcast %113 : vector<1x256xi1> to vector<8x256xi1>
    %115 = arith.select %114, %109, %112 : vector<8x256xi1>, vector<8x256xbf16>
    %116 = vector.extract_strided_slice %108 {offsets = [0, 0, 0], sizes = [1, 8, 8], strides = [1, 1, 1]} : vector<9x8x8xbf16> to vector<1x8x8xbf16>
    %117 = vector.shape_cast %116 : vector<1x8x8xbf16> to vector<8x8xbf16>
    %cst_39 = arith.constant dense<0.000000e+00> : vector<8x256xf32>
    %118 = tpu.matmul %117, %115, %cst_39 {dimension_numbers = #tpu.dot_dimension_numbers<[1], [0], [0], [1], [0, 0, 1, 1], [], []>} : vector<8x8xbf16>, vector<8x256xbf16>, vector<8x256xf32> -> vector<8x256xf32>
    %119 = vector.extract_strided_slice %107 {offsets = [0, 3], sizes = [8, 256], strides = [1, 1]} : vector<8x358xbf16> to vector<8x256xbf16>
    %120 = vector.extract_strided_slice %108 {offsets = [1, 0, 0], sizes = [1, 8, 8], strides = [1, 1, 1]} : vector<9x8x8xbf16> to vector<1x8x8xbf16>
    %121 = vector.shape_cast %120 : vector<1x8x8xbf16> to vector<8x8xbf16>
    %cst_40 = arith.constant dense<0.000000e+00> : vector<8x256xf32>
    %122 = tpu.matmul %121, %119, %cst_40 {dimension_numbers = #tpu.dot_dimension_numbers<[1], [0], [0], [1], [0, 0, 1, 1], [], []>} : vector<8x8xbf16>, vector<8x256xbf16>, vector<8x256xf32> -> vector<8x256xf32>
    %123 = arith.addf %118, %122 : vector<8x256xf32>
    %124 = vector.extract_strided_slice %107 {offsets = [0, 6], sizes = [8, 256], strides = [1, 1]} : vector<8x358xbf16> to vector<8x256xbf16>
    %c13_i32 = arith.constant 13 : i32
    %125 = vector.broadcast %c13_i32 : i32 to vector<1x256xi32>
    %126 = arith.cmpi slt, %16, %125 : vector<1x256xi32>
    %cst_41 = arith.constant 0.000000e+00 : bf16
    %127 = vector.broadcast %cst_41 : bf16 to vector<8x256xbf16>
    %128 = vector.shape_cast %126 : vector<1x256xi1> to vector<1x256xi1>
    %129 = vector.broadcast %128 : vector<1x256xi1> to vector<8x256xi1>
    %130 = arith.select %129, %124, %127 : vector<8x256xi1>, vector<8x256xbf16>
    %131 = vector.extract_strided_slice %108 {offsets = [2, 0, 0], sizes = [1, 8, 8], strides = [1, 1, 1]} : vector<9x8x8xbf16> to vector<1x8x8xbf16>
    %132 = vector.shape_cast %131 : vector<1x8x8xbf16> to vector<8x8xbf16>
    %cst_42 = arith.constant dense<0.000000e+00> : vector<8x256xf32>
    %133 = tpu.matmul %132, %130, %cst_42 {dimension_numbers = #tpu.dot_dimension_numbers<[1], [0], [0], [1], [0, 0, 1, 1], [], []>} : vector<8x8xbf16>, vector<8x256xbf16>, vector<8x256xf32> -> vector<8x256xf32>
    %134 = arith.addf %123, %133 : vector<8x256xf32>
    %135 = vector.extract_strided_slice %107 {offsets = [0, 48], sizes = [8, 256], strides = [1, 1]} : vector<8x358xbf16> to vector<8x256xbf16>
    %cst_43 = arith.constant 0.000000e+00 : bf16
    %136 = vector.broadcast %cst_43 : bf16 to vector<8x256xbf16>
    %137 = vector.shape_cast %111 : vector<1x256xi1> to vector<1x256xi1>
    %138 = vector.broadcast %137 : vector<1x256xi1> to vector<8x256xi1>
    %139 = arith.select %138, %135, %136 : vector<8x256xi1>, vector<8x256xbf16>
    %140 = vector.extract_strided_slice %108 {offsets = [3, 0, 0], sizes = [1, 8, 8], strides = [1, 1, 1]} : vector<9x8x8xbf16> to vector<1x8x8xbf16>
    %141 = vector.shape_cast %140 : vector<1x8x8xbf16> to vector<8x8xbf16>
    %cst_44 = arith.constant dense<0.000000e+00> : vector<8x256xf32>
    %142 = tpu.matmul %141, %139, %cst_44 {dimension_numbers = #tpu.dot_dimension_numbers<[1], [0], [0], [1], [0, 0, 1, 1], [], []>} : vector<8x8xbf16>, vector<8x256xbf16>, vector<8x256xf32> -> vector<8x256xf32>
    %143 = arith.addf %134, %142 : vector<8x256xf32>
    %144 = vector.extract_strided_slice %107 {offsets = [0, 51], sizes = [8, 256], strides = [1, 1]} : vector<8x358xbf16> to vector<8x256xbf16>
    %145 = vector.extract_strided_slice %108 {offsets = [4, 0, 0], sizes = [1, 8, 8], strides = [1, 1, 1]} : vector<9x8x8xbf16> to vector<1x8x8xbf16>
    %146 = vector.shape_cast %145 : vector<1x8x8xbf16> to vector<8x8xbf16>
    %cst_45 = arith.constant dense<0.000000e+00> : vector<8x256xf32>
    %147 = tpu.matmul %146, %144, %cst_45 {dimension_numbers = #tpu.dot_dimension_numbers<[1], [0], [0], [1], [0, 0, 1, 1], [], []>} : vector<8x8xbf16>, vector<8x256xbf16>, vector<8x256xf32> -> vector<8x256xf32>
    %148 = arith.addf %143, %147 : vector<8x256xf32>
    %149 = vector.extract_strided_slice %107 {offsets = [0, 54], sizes = [8, 256], strides = [1, 1]} : vector<8x358xbf16> to vector<8x256xbf16>
    %cst_46 = arith.constant 0.000000e+00 : bf16
    %150 = vector.broadcast %cst_46 : bf16 to vector<8x256xbf16>
    %151 = vector.shape_cast %126 : vector<1x256xi1> to vector<1x256xi1>
    %152 = vector.broadcast %151 : vector<1x256xi1> to vector<8x256xi1>
    %153 = arith.select %152, %149, %150 : vector<8x256xi1>, vector<8x256xbf16>
    %154 = vector.extract_strided_slice %108 {offsets = [5, 0, 0], sizes = [1, 8, 8], strides = [1, 1, 1]} : vector<9x8x8xbf16> to vector<1x8x8xbf16>
    %155 = vector.shape_cast %154 : vector<1x8x8xbf16> to vector<8x8xbf16>
    %cst_47 = arith.constant dense<0.000000e+00> : vector<8x256xf32>
    %156 = tpu.matmul %155, %153, %cst_47 {dimension_numbers = #tpu.dot_dimension_numbers<[1], [0], [0], [1], [0, 0, 1, 1], [], []>} : vector<8x8xbf16>, vector<8x256xbf16>, vector<8x256xf32> -> vector<8x256xf32>
    %157 = arith.addf %148, %156 : vector<8x256xf32>
    %158 = vector.extract_strided_slice %107 {offsets = [0, 96], sizes = [8, 256], strides = [1, 1]} : vector<8x358xbf16> to vector<8x256xbf16>
    %cst_48 = arith.constant 0.000000e+00 : bf16
    %159 = vector.broadcast %cst_48 : bf16 to vector<8x256xbf16>
    %160 = vector.shape_cast %111 : vector<1x256xi1> to vector<1x256xi1>
    %161 = vector.broadcast %160 : vector<1x256xi1> to vector<8x256xi1>
    %162 = arith.select %161, %158, %159 : vector<8x256xi1>, vector<8x256xbf16>
    %163 = vector.extract_strided_slice %108 {offsets = [6, 0, 0], sizes = [1, 8, 8], strides = [1, 1, 1]} : vector<9x8x8xbf16> to vector<1x8x8xbf16>
    %164 = vector.shape_cast %163 : vector<1x8x8xbf16> to vector<8x8xbf16>
    %cst_49 = arith.constant dense<0.000000e+00> : vector<8x256xf32>
    %165 = tpu.matmul %164, %162, %cst_49 {dimension_numbers = #tpu.dot_dimension_numbers<[1], [0], [0], [1], [0, 0, 1, 1], [], []>} : vector<8x8xbf16>, vector<8x256xbf16>, vector<8x256xf32> -> vector<8x256xf32>
    %166 = arith.addf %157, %165 : vector<8x256xf32>
    %167 = vector.extract_strided_slice %107 {offsets = [0, 99], sizes = [8, 256], strides = [1, 1]} : vector<8x358xbf16> to vector<8x256xbf16>
    %168 = vector.extract_strided_slice %108 {offsets = [7, 0, 0], sizes = [1, 8, 8], strides = [1, 1, 1]} : vector<9x8x8xbf16> to vector<1x8x8xbf16>
    %169 = vector.shape_cast %168 : vector<1x8x8xbf16> to vector<8x8xbf16>
    %cst_50 = arith.constant dense<0.000000e+00> : vector<8x256xf32>
    %170 = tpu.matmul %169, %167, %cst_50 {dimension_numbers = #tpu.dot_dimension_numbers<[1], [0], [0], [1], [0, 0, 1, 1], [], []>} : vector<8x8xbf16>, vector<8x256xbf16>, vector<8x256xf32> -> vector<8x256xf32>
    %171 = arith.addf %166, %170 : vector<8x256xf32>
    %172 = vector.extract_strided_slice %107 {offsets = [0, 102], sizes = [8, 256], strides = [1, 1]} : vector<8x358xbf16> to vector<8x256xbf16>
    %cst_51 = arith.constant 0.000000e+00 : bf16
    %173 = vector.broadcast %cst_51 : bf16 to vector<8x256xbf16>
    %174 = vector.shape_cast %126 : vector<1x256xi1> to vector<1x256xi1>
    %175 = vector.broadcast %174 : vector<1x256xi1> to vector<8x256xi1>
    %176 = arith.select %175, %172, %173 : vector<8x256xi1>, vector<8x256xbf16>
    %177 = vector.extract_strided_slice %108 {offsets = [8, 0, 0], sizes = [1, 8, 8], strides = [1, 1, 1]} : vector<9x8x8xbf16> to vector<1x8x8xbf16>
    %178 = vector.shape_cast %177 : vector<1x8x8xbf16> to vector<8x8xbf16>
    %cst_52 = arith.constant dense<0.000000e+00> : vector<8x256xf32>
    %179 = tpu.matmul %178, %176, %cst_52 {dimension_numbers = #tpu.dot_dimension_numbers<[1], [0], [0], [1], [0, 0, 1, 1], [], []>} : vector<8x8xbf16>, vector<8x256xbf16>, vector<8x256xf32> -> vector<8x256xf32>
    %180 = arith.addf %171, %179 : vector<8x256xf32>
    %181 = vector.broadcast %103 : vector<8x1xf32> to vector<8x256xf32>
    %182 = arith.mulf %180, %181 : vector<8x256xf32>
    %183 = vector.broadcast %105 : vector<8x1xf32> to vector<8x256xf32>
    %184 = arith.addf %182, %183 : vector<8x256xf32>
    %185 = arith.truncf %184 : vector<8x256xf32> to vector<8x256xbf16>
    %186 = vector.extract_strided_slice %36 {offsets = [3, 0, 0], sizes = [1, 8, 1], strides = [1, 1, 1]} : vector<10x8x1xf32> to vector<1x8x1xf32>
    %187 = vector.shape_cast %186 : vector<1x8x1xf32> to vector<8x1xf32>
    %188 = vector.extract_strided_slice %37 {offsets = [3, 0, 0], sizes = [1, 8, 1], strides = [1, 1, 1]} : vector<10x8x1xf32> to vector<1x8x1xf32>
    %189 = vector.shape_cast %188 : vector<1x8x1xf32> to vector<8x1xf32>
    %cst_53 = arith.constant 0.000000e+00 : bf16
    %190 = vector.broadcast %cst_53 : bf16 to vector<8x2xbf16>
    %191 = tpu.concatenate %190, %34, %190 in 1 : vector<8x2xbf16>, vector<8x256xbf16>, vector<8x2xbf16> -> vector<8x260xbf16>
    %c0_54 = arith.constant 0 : index
    %c0_55 = arith.constant 0 : index
    %c0_56 = arith.constant 0 : index
    %192 = vector.load %arg8[%c0_54, %c0_55, %c0_56] : memref<5x8x8xbf16, #tpu.memory_space<vmem>>, vector<5x8x8xbf16>
    %193 = vector.extract_strided_slice %191 {offsets = [0, 0], sizes = [8, 256], strides = [1, 1]} : vector<8x260xbf16> to vector<8x256xbf16>
    %c2_i32 = arith.constant 2 : i32
    %194 = vector.broadcast %c2_i32 : i32 to vector<1x256xi32>
    %195 = arith.cmpi sge, %16, %194 : vector<1x256xi32>
    %cst_57 = arith.constant 0.000000e+00 : bf16
    %196 = vector.broadcast %cst_57 : bf16 to vector<8x256xbf16>
    %197 = vector.shape_cast %195 : vector<1x256xi1> to vector<1x256xi1>
    %198 = vector.broadcast %197 : vector<1x256xi1> to vector<8x256xi1>
    %199 = arith.select %198, %193, %196 : vector<8x256xi1>, vector<8x256xbf16>
    %200 = vector.extract_strided_slice %192 {offsets = [0, 0, 0], sizes = [1, 8, 8], strides = [1, 1, 1]} : vector<5x8x8xbf16> to vector<1x8x8xbf16>
    %201 = vector.shape_cast %200 : vector<1x8x8xbf16> to vector<8x8xbf16>
    %cst_58 = arith.constant dense<0.000000e+00> : vector<8x256xf32>
    %202 = tpu.matmul %201, %199, %cst_58 {dimension_numbers = #tpu.dot_dimension_numbers<[1], [0], [0], [1], [0, 0, 1, 1], [], []>} : vector<8x8xbf16>, vector<8x256xbf16>, vector<8x256xf32> -> vector<8x256xf32>
    %203 = vector.extract_strided_slice %191 {offsets = [0, 1], sizes = [8, 256], strides = [1, 1]} : vector<8x260xbf16> to vector<8x256xbf16>
    %cst_59 = arith.constant 0.000000e+00 : bf16
    %204 = vector.broadcast %cst_59 : bf16 to vector<8x256xbf16>
    %205 = vector.shape_cast %47 : vector<1x256xi1> to vector<1x256xi1>
    %206 = vector.broadcast %205 : vector<1x256xi1> to vector<8x256xi1>
    %207 = arith.select %206, %203, %204 : vector<8x256xi1>, vector<8x256xbf16>
    %208 = vector.extract_strided_slice %192 {offsets = [1, 0, 0], sizes = [1, 8, 8], strides = [1, 1, 1]} : vector<5x8x8xbf16> to vector<1x8x8xbf16>
    %209 = vector.shape_cast %208 : vector<1x8x8xbf16> to vector<8x8xbf16>
    %cst_60 = arith.constant dense<0.000000e+00> : vector<8x256xf32>
    %210 = tpu.matmul %209, %207, %cst_60 {dimension_numbers = #tpu.dot_dimension_numbers<[1], [0], [0], [1], [0, 0, 1, 1], [], []>} : vector<8x8xbf16>, vector<8x256xbf16>, vector<8x256xf32> -> vector<8x256xf32>
    %211 = arith.addf %202, %210 : vector<8x256xf32>
    %212 = vector.extract_strided_slice %191 {offsets = [0, 2], sizes = [8, 256], strides = [1, 1]} : vector<8x260xbf16> to vector<8x256xbf16>
    %213 = vector.extract_strided_slice %192 {offsets = [2, 0, 0], sizes = [1, 8, 8], strides = [1, 1, 1]} : vector<5x8x8xbf16> to vector<1x8x8xbf16>
    %214 = vector.shape_cast %213 : vector<1x8x8xbf16> to vector<8x8xbf16>
    %cst_61 = arith.constant dense<0.000000e+00> : vector<8x256xf32>
    %215 = tpu.matmul %214, %212, %cst_61 {dimension_numbers = #tpu.dot_dimension_numbers<[1], [0], [0], [1], [0, 0, 1, 1], [], []>} : vector<8x8xbf16>, vector<8x256xbf16>, vector<8x256xf32> -> vector<8x256xf32>
    %216 = arith.addf %211, %215 : vector<8x256xf32>
    %217 = vector.extract_strided_slice %191 {offsets = [0, 3], sizes = [8, 256], strides = [1, 1]} : vector<8x260xbf16> to vector<8x256xbf16>
    %cst_62 = arith.constant 0.000000e+00 : bf16
    %218 = vector.broadcast %cst_62 : bf16 to vector<8x256xbf16>
    %219 = vector.shape_cast %62 : vector<1x256xi1> to vector<1x256xi1>
    %220 = vector.broadcast %219 : vector<1x256xi1> to vector<8x256xi1>
    %221 = arith.select %220, %217, %218 : vector<8x256xi1>, vector<8x256xbf16>
    %222 = vector.extract_strided_slice %192 {offsets = [3, 0, 0], sizes = [1, 8, 8], strides = [1, 1, 1]} : vector<5x8x8xbf16> to vector<1x8x8xbf16>
    %223 = vector.shape_cast %222 : vector<1x8x8xbf16> to vector<8x8xbf16>
    %cst_63 = arith.constant dense<0.000000e+00> : vector<8x256xf32>
    %224 = tpu.matmul %223, %221, %cst_63 {dimension_numbers = #tpu.dot_dimension_numbers<[1], [0], [0], [1], [0, 0, 1, 1], [], []>} : vector<8x8xbf16>, vector<8x256xbf16>, vector<8x256xf32> -> vector<8x256xf32>
    %225 = arith.addf %216, %224 : vector<8x256xf32>
    %226 = vector.extract_strided_slice %191 {offsets = [0, 4], sizes = [8, 256], strides = [1, 1]} : vector<8x260xbf16> to vector<8x256xbf16>
    %c14_i32 = arith.constant 14 : i32
    %227 = vector.broadcast %c14_i32 : i32 to vector<1x256xi32>
    %228 = arith.cmpi slt, %16, %227 : vector<1x256xi32>
    %cst_64 = arith.constant 0.000000e+00 : bf16
    %229 = vector.broadcast %cst_64 : bf16 to vector<8x256xbf16>
    %230 = vector.shape_cast %228 : vector<1x256xi1> to vector<1x256xi1>
    %231 = vector.broadcast %230 : vector<1x256xi1> to vector<8x256xi1>
    %232 = arith.select %231, %226, %229 : vector<8x256xi1>, vector<8x256xbf16>
    %233 = vector.extract_strided_slice %192 {offsets = [4, 0, 0], sizes = [1, 8, 8], strides = [1, 1, 1]} : vector<5x8x8xbf16> to vector<1x8x8xbf16>
    %234 = vector.shape_cast %233 : vector<1x8x8xbf16> to vector<8x8xbf16>
    %cst_65 = arith.constant dense<0.000000e+00> : vector<8x256xf32>
    %235 = tpu.matmul %234, %232, %cst_65 {dimension_numbers = #tpu.dot_dimension_numbers<[1], [0], [0], [1], [0, 0, 1, 1], [], []>} : vector<8x8xbf16>, vector<8x256xbf16>, vector<8x256xf32> -> vector<8x256xf32>
    %236 = arith.addf %225, %235 : vector<8x256xf32>
    %237 = vector.broadcast %187 : vector<8x1xf32> to vector<8x256xf32>
    %238 = arith.mulf %236, %237 : vector<8x256xf32>
    %239 = vector.broadcast %189 : vector<8x1xf32> to vector<8x256xf32>
    %240 = arith.addf %238, %239 : vector<8x256xf32>
    %241 = arith.truncf %240 : vector<8x256xf32> to vector<8x256xbf16>
    %242 = vector.extract_strided_slice %36 {offsets = [4, 0, 0], sizes = [1, 8, 1], strides = [1, 1, 1]} : vector<10x8x1xf32> to vector<1x8x1xf32>
    %243 = vector.shape_cast %242 : vector<1x8x1xf32> to vector<8x1xf32>
    %244 = vector.extract_strided_slice %37 {offsets = [4, 0, 0], sizes = [1, 8, 1], strides = [1, 1, 1]} : vector<10x8x1xf32> to vector<1x8x1xf32>
    %245 = vector.shape_cast %244 : vector<1x8x1xf32> to vector<8x1xf32>
    %cst_66 = arith.constant 0.000000e+00 : bf16
    %246 = vector.broadcast %cst_66 : bf16 to vector<8x32xbf16>
    %247 = tpu.concatenate %246, %241, %246 in 1 : vector<8x32xbf16>, vector<8x256xbf16>, vector<8x32xbf16> -> vector<8x320xbf16>
    %c0_67 = arith.constant 0 : index
    %c0_68 = arith.constant 0 : index
    %c0_69 = arith.constant 0 : index
    %248 = vector.load %arg9[%c0_67, %c0_68, %c0_69] : memref<5x8x8xbf16, #tpu.memory_space<vmem>>, vector<5x8x8xbf16>
    %249 = vector.extract_strided_slice %247 {offsets = [0, 0], sizes = [8, 256], strides = [1, 1]} : vector<8x320xbf16> to vector<8x256xbf16>
    %250 = vector.extract_strided_slice %248 {offsets = [0, 0, 0], sizes = [1, 8, 8], strides = [1, 1, 1]} : vector<5x8x8xbf16> to vector<1x8x8xbf16>
    %251 = vector.shape_cast %250 : vector<1x8x8xbf16> to vector<8x8xbf16>
    %cst_70 = arith.constant dense<0.000000e+00> : vector<8x256xf32>
    %252 = tpu.matmul %251, %249, %cst_70 {dimension_numbers = #tpu.dot_dimension_numbers<[1], [0], [0], [1], [0, 0, 1, 1], [], []>} : vector<8x8xbf16>, vector<8x256xbf16>, vector<8x256xf32> -> vector<8x256xf32>
    %253 = vector.extract_strided_slice %247 {offsets = [0, 16], sizes = [8, 256], strides = [1, 1]} : vector<8x320xbf16> to vector<8x256xbf16>
    %254 = vector.extract_strided_slice %248 {offsets = [1, 0, 0], sizes = [1, 8, 8], strides = [1, 1, 1]} : vector<5x8x8xbf16> to vector<1x8x8xbf16>
    %255 = vector.shape_cast %254 : vector<1x8x8xbf16> to vector<8x8xbf16>
    %cst_71 = arith.constant dense<0.000000e+00> : vector<8x256xf32>
    %256 = tpu.matmul %255, %253, %cst_71 {dimension_numbers = #tpu.dot_dimension_numbers<[1], [0], [0], [1], [0, 0, 1, 1], [], []>} : vector<8x8xbf16>, vector<8x256xbf16>, vector<8x256xf32> -> vector<8x256xf32>
    %257 = arith.addf %252, %256 : vector<8x256xf32>
    %258 = vector.extract_strided_slice %247 {offsets = [0, 32], sizes = [8, 256], strides = [1, 1]} : vector<8x320xbf16> to vector<8x256xbf16>
    %259 = vector.extract_strided_slice %248 {offsets = [2, 0, 0], sizes = [1, 8, 8], strides = [1, 1, 1]} : vector<5x8x8xbf16> to vector<1x8x8xbf16>
    %260 = vector.shape_cast %259 : vector<1x8x8xbf16> to vector<8x8xbf16>
    %cst_72 = arith.constant dense<0.000000e+00> : vector<8x256xf32>
    %261 = tpu.matmul %260, %258, %cst_72 {dimension_numbers = #tpu.dot_dimension_numbers<[1], [0], [0], [1], [0, 0, 1, 1], [], []>} : vector<8x8xbf16>, vector<8x256xbf16>, vector<8x256xf32> -> vector<8x256xf32>
    %262 = arith.addf %257, %261 : vector<8x256xf32>
    %263 = vector.extract_strided_slice %247 {offsets = [0, 48], sizes = [8, 256], strides = [1, 1]} : vector<8x320xbf16> to vector<8x256xbf16>
    %264 = vector.extract_strided_slice %248 {offsets = [3, 0, 0], sizes = [1, 8, 8], strides = [1, 1, 1]} : vector<5x8x8xbf16> to vector<1x8x8xbf16>
    %265 = vector.shape_cast %264 : vector<1x8x8xbf16> to vector<8x8xbf16>
    %cst_73 = arith.constant dense<0.000000e+00> : vector<8x256xf32>
    %266 = tpu.matmul %265, %263, %cst_73 {dimension_numbers = #tpu.dot_dimension_numbers<[1], [0], [0], [1], [0, 0, 1, 1], [], []>} : vector<8x8xbf16>, vector<8x256xbf16>, vector<8x256xf32> -> vector<8x256xf32>
    %267 = arith.addf %262, %266 : vector<8x256xf32>
    %268 = vector.extract_strided_slice %247 {offsets = [0, 64], sizes = [8, 256], strides = [1, 1]} : vector<8x320xbf16> to vector<8x256xbf16>
    %269 = vector.extract_strided_slice %248 {offsets = [4, 0, 0], sizes = [1, 8, 8], strides = [1, 1, 1]} : vector<5x8x8xbf16> to vector<1x8x8xbf16>
    %270 = vector.shape_cast %269 : vector<1x8x8xbf16> to vector<8x8xbf16>
    %cst_74 = arith.constant dense<0.000000e+00> : vector<8x256xf32>
    %271 = tpu.matmul %270, %268, %cst_74 {dimension_numbers = #tpu.dot_dimension_numbers<[1], [0], [0], [1], [0, 0, 1, 1], [], []>} : vector<8x8xbf16>, vector<8x256xbf16>, vector<8x256xf32> -> vector<8x256xf32>
    %272 = arith.addf %267, %271 : vector<8x256xf32>
    %273 = vector.broadcast %243 : vector<8x1xf32> to vector<8x256xf32>
    %274 = arith.mulf %272, %273 : vector<8x256xf32>
    %275 = vector.broadcast %245 : vector<8x1xf32> to vector<8x256xf32>
    %276 = arith.addf %274, %275 : vector<8x256xf32>
    %277 = arith.truncf %276 : vector<8x256xf32> to vector<8x256xbf16>
    %278 = vector.extract_strided_slice %36 {offsets = [5, 0, 0], sizes = [1, 8, 1], strides = [1, 1, 1]} : vector<10x8x1xf32> to vector<1x8x1xf32>
    %279 = vector.shape_cast %278 : vector<1x8x1xf32> to vector<8x1xf32>
    %280 = vector.extract_strided_slice %37 {offsets = [5, 0, 0], sizes = [1, 8, 1], strides = [1, 1, 1]} : vector<10x8x1xf32> to vector<1x8x1xf32>
    %281 = vector.shape_cast %280 : vector<1x8x1xf32> to vector<8x1xf32>
    %cst_75 = arith.constant 0.000000e+00 : bf16
    %282 = vector.broadcast %cst_75 : bf16 to vector<8x85xbf16>
    %283 = tpu.concatenate %282, %277, %282 in 1 : vector<8x85xbf16>, vector<8x256xbf16>, vector<8x85xbf16> -> vector<8x426xbf16>
    %c0_76 = arith.constant 0 : index
    %c0_77 = arith.constant 0 : index
    %c0_78 = arith.constant 0 : index
    %284 = vector.load %arg10[%c0_76, %c0_77, %c0_78] : memref<9x8x8xbf16, #tpu.memory_space<vmem>>, vector<9x8x8xbf16>
    %285 = vector.extract_strided_slice %283 {offsets = [0, 0], sizes = [8, 256], strides = [1, 1]} : vector<8x426xbf16> to vector<8x256xbf16>
    %c5_i32 = arith.constant 5 : i32
    %286 = vector.broadcast %c5_i32 : i32 to vector<1x256xi32>
    %287 = arith.cmpi sge, %16, %286 : vector<1x256xi32>
    %cst_79 = arith.constant 0.000000e+00 : bf16
    %288 = vector.broadcast %cst_79 : bf16 to vector<8x256xbf16>
    %289 = vector.shape_cast %287 : vector<1x256xi1> to vector<1x256xi1>
    %290 = vector.broadcast %289 : vector<1x256xi1> to vector<8x256xi1>
    %291 = arith.select %290, %285, %288 : vector<8x256xi1>, vector<8x256xbf16>
    %292 = vector.extract_strided_slice %284 {offsets = [0, 0, 0], sizes = [1, 8, 8], strides = [1, 1, 1]} : vector<9x8x8xbf16> to vector<1x8x8xbf16>
    %293 = vector.shape_cast %292 : vector<1x8x8xbf16> to vector<8x8xbf16>
    %cst_80 = arith.constant dense<0.000000e+00> : vector<8x256xf32>
    %294 = tpu.matmul %293, %291, %cst_80 {dimension_numbers = #tpu.dot_dimension_numbers<[1], [0], [0], [1], [0, 0, 1, 1], [], []>} : vector<8x8xbf16>, vector<8x256xbf16>, vector<8x256xf32> -> vector<8x256xf32>
    %295 = vector.extract_strided_slice %283 {offsets = [0, 5], sizes = [8, 256], strides = [1, 1]} : vector<8x426xbf16> to vector<8x256xbf16>
    %296 = vector.extract_strided_slice %284 {offsets = [1, 0, 0], sizes = [1, 8, 8], strides = [1, 1, 1]} : vector<9x8x8xbf16> to vector<1x8x8xbf16>
    %297 = vector.shape_cast %296 : vector<1x8x8xbf16> to vector<8x8xbf16>
    %cst_81 = arith.constant dense<0.000000e+00> : vector<8x256xf32>
    %298 = tpu.matmul %297, %295, %cst_81 {dimension_numbers = #tpu.dot_dimension_numbers<[1], [0], [0], [1], [0, 0, 1, 1], [], []>} : vector<8x8xbf16>, vector<8x256xbf16>, vector<8x256xf32> -> vector<8x256xf32>
    %299 = arith.addf %294, %298 : vector<8x256xf32>
    %300 = vector.extract_strided_slice %283 {offsets = [0, 10], sizes = [8, 256], strides = [1, 1]} : vector<8x426xbf16> to vector<8x256xbf16>
    %c11_i32 = arith.constant 11 : i32
    %301 = vector.broadcast %c11_i32 : i32 to vector<1x256xi32>
    %302 = arith.cmpi slt, %16, %301 : vector<1x256xi32>
    %cst_82 = arith.constant 0.000000e+00 : bf16
    %303 = vector.broadcast %cst_82 : bf16 to vector<8x256xbf16>
    %304 = vector.shape_cast %302 : vector<1x256xi1> to vector<1x256xi1>
    %305 = vector.broadcast %304 : vector<1x256xi1> to vector<8x256xi1>
    %306 = arith.select %305, %300, %303 : vector<8x256xi1>, vector<8x256xbf16>
    %307 = vector.extract_strided_slice %284 {offsets = [2, 0, 0], sizes = [1, 8, 8], strides = [1, 1, 1]} : vector<9x8x8xbf16> to vector<1x8x8xbf16>
    %308 = vector.shape_cast %307 : vector<1x8x8xbf16> to vector<8x8xbf16>
    %cst_83 = arith.constant dense<0.000000e+00> : vector<8x256xf32>
    %309 = tpu.matmul %308, %306, %cst_83 {dimension_numbers = #tpu.dot_dimension_numbers<[1], [0], [0], [1], [0, 0, 1, 1], [], []>} : vector<8x8xbf16>, vector<8x256xbf16>, vector<8x256xf32> -> vector<8x256xf32>
    %310 = arith.addf %299, %309 : vector<8x256xf32>
    %311 = vector.extract_strided_slice %283 {offsets = [0, 80], sizes = [8, 256], strides = [1, 1]} : vector<8x426xbf16> to vector<8x256xbf16>
    %cst_84 = arith.constant 0.000000e+00 : bf16
    %312 = vector.broadcast %cst_84 : bf16 to vector<8x256xbf16>
    %313 = vector.shape_cast %287 : vector<1x256xi1> to vector<1x256xi1>
    %314 = vector.broadcast %313 : vector<1x256xi1> to vector<8x256xi1>
    %315 = arith.select %314, %311, %312 : vector<8x256xi1>, vector<8x256xbf16>
    %316 = vector.extract_strided_slice %284 {offsets = [3, 0, 0], sizes = [1, 8, 8], strides = [1, 1, 1]} : vector<9x8x8xbf16> to vector<1x8x8xbf16>
    %317 = vector.shape_cast %316 : vector<1x8x8xbf16> to vector<8x8xbf16>
    %cst_85 = arith.constant dense<0.000000e+00> : vector<8x256xf32>
    %318 = tpu.matmul %317, %315, %cst_85 {dimension_numbers = #tpu.dot_dimension_numbers<[1], [0], [0], [1], [0, 0, 1, 1], [], []>} : vector<8x8xbf16>, vector<8x256xbf16>, vector<8x256xf32> -> vector<8x256xf32>
    %319 = arith.addf %310, %318 : vector<8x256xf32>
    %320 = vector.extract_strided_slice %283 {offsets = [0, 85], sizes = [8, 256], strides = [1, 1]} : vector<8x426xbf16> to vector<8x256xbf16>
    %321 = vector.extract_strided_slice %284 {offsets = [4, 0, 0], sizes = [1, 8, 8], strides = [1, 1, 1]} : vector<9x8x8xbf16> to vector<1x8x8xbf16>
    %322 = vector.shape_cast %321 : vector<1x8x8xbf16> to vector<8x8xbf16>
    %cst_86 = arith.constant dense<0.000000e+00> : vector<8x256xf32>
    %323 = tpu.matmul %322, %320, %cst_86 {dimension_numbers = #tpu.dot_dimension_numbers<[1], [0], [0], [1], [0, 0, 1, 1], [], []>} : vector<8x8xbf16>, vector<8x256xbf16>, vector<8x256xf32> -> vector<8x256xf32>
    %324 = arith.addf %319, %323 : vector<8x256xf32>
    %325 = vector.extract_strided_slice %283 {offsets = [0, 90], sizes = [8, 256], strides = [1, 1]} : vector<8x426xbf16> to vector<8x256xbf16>
    %cst_87 = arith.constant 0.000000e+00 : bf16
    %326 = vector.broadcast %cst_87 : bf16 to vector<8x256xbf16>
    %327 = vector.shape_cast %302 : vector<1x256xi1> to vector<1x256xi1>
    %328 = vector.broadcast %327 : vector<1x256xi1> to vector<8x256xi1>
    %329 = arith.select %328, %325, %326 : vector<8x256xi1>, vector<8x256xbf16>
    %330 = vector.extract_strided_slice %284 {offsets = [5, 0, 0], sizes = [1, 8, 8], strides = [1, 1, 1]} : vector<9x8x8xbf16> to vector<1x8x8xbf16>
    %331 = vector.shape_cast %330 : vector<1x8x8xbf16> to vector<8x8xbf16>
    %cst_88 = arith.constant dense<0.000000e+00> : vector<8x256xf32>
    %332 = tpu.matmul %331, %329, %cst_88 {dimension_numbers = #tpu.dot_dimension_numbers<[1], [0], [0], [1], [0, 0, 1, 1], [], []>} : vector<8x8xbf16>, vector<8x256xbf16>, vector<8x256xf32> -> vector<8x256xf32>
    %333 = arith.addf %324, %332 : vector<8x256xf32>
    %334 = vector.extract_strided_slice %283 {offsets = [0, 160], sizes = [8, 256], strides = [1, 1]} : vector<8x426xbf16> to vector<8x256xbf16>
    %cst_89 = arith.constant 0.000000e+00 : bf16
    %335 = vector.broadcast %cst_89 : bf16 to vector<8x256xbf16>
    %336 = vector.shape_cast %287 : vector<1x256xi1> to vector<1x256xi1>
    %337 = vector.broadcast %336 : vector<1x256xi1> to vector<8x256xi1>
    %338 = arith.select %337, %334, %335 : vector<8x256xi1>, vector<8x256xbf16>
    %339 = vector.extract_strided_slice %284 {offsets = [6, 0, 0], sizes = [1, 8, 8], strides = [1, 1, 1]} : vector<9x8x8xbf16> to vector<1x8x8xbf16>
    %340 = vector.shape_cast %339 : vector<1x8x8xbf16> to vector<8x8xbf16>
    %cst_90 = arith.constant dense<0.000000e+00> : vector<8x256xf32>
    %341 = tpu.matmul %340, %338, %cst_90 {dimension_numbers = #tpu.dot_dimension_numbers<[1], [0], [0], [1], [0, 0, 1, 1], [], []>} : vector<8x8xbf16>, vector<8x256xbf16>, vector<8x256xf32> -> vector<8x256xf32>
    %342 = arith.addf %333, %341 : vector<8x256xf32>
    %343 = vector.extract_strided_slice %283 {offsets = [0, 165], sizes = [8, 256], strides = [1, 1]} : vector<8x426xbf16> to vector<8x256xbf16>
    %344 = vector.extract_strided_slice %284 {offsets = [7, 0, 0], sizes = [1, 8, 8], strides = [1, 1, 1]} : vector<9x8x8xbf16> to vector<1x8x8xbf16>
    %345 = vector.shape_cast %344 : vector<1x8x8xbf16> to vector<8x8xbf16>
    %cst_91 = arith.constant dense<0.000000e+00> : vector<8x256xf32>
    %346 = tpu.matmul %345, %343, %cst_91 {dimension_numbers = #tpu.dot_dimension_numbers<[1], [0], [0], [1], [0, 0, 1, 1], [], []>} : vector<8x8xbf16>, vector<8x256xbf16>, vector<8x256xf32> -> vector<8x256xf32>
    %347 = arith.addf %342, %346 : vector<8x256xf32>
    %348 = vector.extract_strided_slice %283 {offsets = [0, 170], sizes = [8, 256], strides = [1, 1]} : vector<8x426xbf16> to vector<8x256xbf16>
    %cst_92 = arith.constant 0.000000e+00 : bf16
    %349 = vector.broadcast %cst_92 : bf16 to vector<8x256xbf16>
    %350 = vector.shape_cast %302 : vector<1x256xi1> to vector<1x256xi1>
    %351 = vector.broadcast %350 : vector<1x256xi1> to vector<8x256xi1>
    %352 = arith.select %351, %348, %349 : vector<8x256xi1>, vector<8x256xbf16>
    %353 = vector.extract_strided_slice %284 {offsets = [8, 0, 0], sizes = [1, 8, 8], strides = [1, 1, 1]} : vector<9x8x8xbf16> to vector<1x8x8xbf16>
    %354 = vector.shape_cast %353 : vector<1x8x8xbf16> to vector<8x8xbf16>
    %cst_93 = arith.constant dense<0.000000e+00> : vector<8x256xf32>
    %355 = tpu.matmul %354, %352, %cst_93 {dimension_numbers = #tpu.dot_dimension_numbers<[1], [0], [0], [1], [0, 0, 1, 1], [], []>} : vector<8x8xbf16>, vector<8x256xbf16>, vector<8x256xf32> -> vector<8x256xf32>
    %356 = arith.addf %347, %355 : vector<8x256xf32>
    %357 = vector.broadcast %279 : vector<8x1xf32> to vector<8x256xf32>
    %358 = arith.mulf %356, %357 : vector<8x256xf32>
    %359 = vector.broadcast %281 : vector<8x1xf32> to vector<8x256xf32>
    %360 = arith.addf %358, %359 : vector<8x256xf32>
    %361 = arith.truncf %360 : vector<8x256xf32> to vector<8x256xbf16>
    %362 = vector.extract_strided_slice %36 {offsets = [6, 0, 0], sizes = [1, 8, 1], strides = [1, 1, 1]} : vector<10x8x1xf32> to vector<1x8x1xf32>
    %363 = vector.shape_cast %362 : vector<1x8x1xf32> to vector<8x1xf32>
    %364 = vector.extract_strided_slice %37 {offsets = [6, 0, 0], sizes = [1, 8, 1], strides = [1, 1, 1]} : vector<10x8x1xf32> to vector<1x8x1xf32>
    %365 = vector.shape_cast %364 : vector<1x8x1xf32> to vector<8x1xf32>
    %cst_94 = arith.constant 0.000000e+00 : bf16
    %366 = vector.broadcast %cst_94 : bf16 to vector<8x3xbf16>
    %367 = tpu.concatenate %366, %35, %366 in 1 : vector<8x3xbf16>, vector<8x256xbf16>, vector<8x3xbf16> -> vector<8x262xbf16>
    %c0_95 = arith.constant 0 : index
    %c0_96 = arith.constant 0 : index
    %c0_97 = arith.constant 0 : index
    %368 = vector.load %arg11[%c0_95, %c0_96, %c0_97] : memref<7x8x8xbf16, #tpu.memory_space<vmem>>, vector<7x8x8xbf16>
    %369 = vector.extract_strided_slice %367 {offsets = [0, 0], sizes = [8, 256], strides = [1, 1]} : vector<8x262xbf16> to vector<8x256xbf16>
    %cst_98 = arith.constant 0.000000e+00 : bf16
    %370 = vector.broadcast %cst_98 : bf16 to vector<8x256xbf16>
    %371 = vector.shape_cast %111 : vector<1x256xi1> to vector<1x256xi1>
    %372 = vector.broadcast %371 : vector<1x256xi1> to vector<8x256xi1>
    %373 = arith.select %372, %369, %370 : vector<8x256xi1>, vector<8x256xbf16>
    %374 = vector.extract_strided_slice %368 {offsets = [0, 0, 0], sizes = [1, 8, 8], strides = [1, 1, 1]} : vector<7x8x8xbf16> to vector<1x8x8xbf16>
    %375 = vector.shape_cast %374 : vector<1x8x8xbf16> to vector<8x8xbf16>
    %cst_99 = arith.constant dense<0.000000e+00> : vector<8x256xf32>
    %376 = tpu.matmul %375, %373, %cst_99 {dimension_numbers = #tpu.dot_dimension_numbers<[1], [0], [0], [1], [0, 0, 1, 1], [], []>} : vector<8x8xbf16>, vector<8x256xbf16>, vector<8x256xf32> -> vector<8x256xf32>
    %377 = vector.extract_strided_slice %367 {offsets = [0, 1], sizes = [8, 256], strides = [1, 1]} : vector<8x262xbf16> to vector<8x256xbf16>
    %cst_100 = arith.constant 0.000000e+00 : bf16
    %378 = vector.broadcast %cst_100 : bf16 to vector<8x256xbf16>
    %379 = vector.shape_cast %195 : vector<1x256xi1> to vector<1x256xi1>
    %380 = vector.broadcast %379 : vector<1x256xi1> to vector<8x256xi1>
    %381 = arith.select %380, %377, %378 : vector<8x256xi1>, vector<8x256xbf16>
    %382 = vector.extract_strided_slice %368 {offsets = [1, 0, 0], sizes = [1, 8, 8], strides = [1, 1, 1]} : vector<7x8x8xbf16> to vector<1x8x8xbf16>
    %383 = vector.shape_cast %382 : vector<1x8x8xbf16> to vector<8x8xbf16>
    %cst_101 = arith.constant dense<0.000000e+00> : vector<8x256xf32>
    %384 = tpu.matmul %383, %381, %cst_101 {dimension_numbers = #tpu.dot_dimension_numbers<[1], [0], [0], [1], [0, 0, 1, 1], [], []>} : vector<8x8xbf16>, vector<8x256xbf16>, vector<8x256xf32> -> vector<8x256xf32>
    %385 = arith.addf %376, %384 : vector<8x256xf32>
    %386 = vector.extract_strided_slice %367 {offsets = [0, 2], sizes = [8, 256], strides = [1, 1]} : vector<8x262xbf16> to vector<8x256xbf16>
    %cst_102 = arith.constant 0.000000e+00 : bf16
    %387 = vector.broadcast %cst_102 : bf16 to vector<8x256xbf16>
    %388 = vector.shape_cast %47 : vector<1x256xi1> to vector<1x256xi1>
    %389 = vector.broadcast %388 : vector<1x256xi1> to vector<8x256xi1>
    %390 = arith.select %389, %386, %387 : vector<8x256xi1>, vector<8x256xbf16>
    %391 = vector.extract_strided_slice %368 {offsets = [2, 0, 0], sizes = [1, 8, 8], strides = [1, 1, 1]} : vector<7x8x8xbf16> to vector<1x8x8xbf16>
    %392 = vector.shape_cast %391 : vector<1x8x8xbf16> to vector<8x8xbf16>
    %cst_103 = arith.constant dense<0.000000e+00> : vector<8x256xf32>
    %393 = tpu.matmul %392, %390, %cst_103 {dimension_numbers = #tpu.dot_dimension_numbers<[1], [0], [0], [1], [0, 0, 1, 1], [], []>} : vector<8x8xbf16>, vector<8x256xbf16>, vector<8x256xf32> -> vector<8x256xf32>
    %394 = arith.addf %385, %393 : vector<8x256xf32>
    %395 = vector.extract_strided_slice %367 {offsets = [0, 3], sizes = [8, 256], strides = [1, 1]} : vector<8x262xbf16> to vector<8x256xbf16>
    %396 = vector.extract_strided_slice %368 {offsets = [3, 0, 0], sizes = [1, 8, 8], strides = [1, 1, 1]} : vector<7x8x8xbf16> to vector<1x8x8xbf16>
    %397 = vector.shape_cast %396 : vector<1x8x8xbf16> to vector<8x8xbf16>
    %cst_104 = arith.constant dense<0.000000e+00> : vector<8x256xf32>
    %398 = tpu.matmul %397, %395, %cst_104 {dimension_numbers = #tpu.dot_dimension_numbers<[1], [0], [0], [1], [0, 0, 1, 1], [], []>} : vector<8x8xbf16>, vector<8x256xbf16>, vector<8x256xf32> -> vector<8x256xf32>
    %399 = arith.addf %394, %398 : vector<8x256xf32>
    %400 = vector.extract_strided_slice %367 {offsets = [0, 4], sizes = [8, 256], strides = [1, 1]} : vector<8x262xbf16> to vector<8x256xbf16>
    %cst_105 = arith.constant 0.000000e+00 : bf16
    %401 = vector.broadcast %cst_105 : bf16 to vector<8x256xbf16>
    %402 = vector.shape_cast %62 : vector<1x256xi1> to vector<1x256xi1>
    %403 = vector.broadcast %402 : vector<1x256xi1> to vector<8x256xi1>
    %404 = arith.select %403, %400, %401 : vector<8x256xi1>, vector<8x256xbf16>
    %405 = vector.extract_strided_slice %368 {offsets = [4, 0, 0], sizes = [1, 8, 8], strides = [1, 1, 1]} : vector<7x8x8xbf16> to vector<1x8x8xbf16>
    %406 = vector.shape_cast %405 : vector<1x8x8xbf16> to vector<8x8xbf16>
    %cst_106 = arith.constant dense<0.000000e+00> : vector<8x256xf32>
    %407 = tpu.matmul %406, %404, %cst_106 {dimension_numbers = #tpu.dot_dimension_numbers<[1], [0], [0], [1], [0, 0, 1, 1], [], []>} : vector<8x8xbf16>, vector<8x256xbf16>, vector<8x256xf32> -> vector<8x256xf32>
    %408 = arith.addf %399, %407 : vector<8x256xf32>
    %409 = vector.extract_strided_slice %367 {offsets = [0, 5], sizes = [8, 256], strides = [1, 1]} : vector<8x262xbf16> to vector<8x256xbf16>
    %cst_107 = arith.constant 0.000000e+00 : bf16
    %410 = vector.broadcast %cst_107 : bf16 to vector<8x256xbf16>
    %411 = vector.shape_cast %228 : vector<1x256xi1> to vector<1x256xi1>
    %412 = vector.broadcast %411 : vector<1x256xi1> to vector<8x256xi1>
    %413 = arith.select %412, %409, %410 : vector<8x256xi1>, vector<8x256xbf16>
    %414 = vector.extract_strided_slice %368 {offsets = [5, 0, 0], sizes = [1, 8, 8], strides = [1, 1, 1]} : vector<7x8x8xbf16> to vector<1x8x8xbf16>
    %415 = vector.shape_cast %414 : vector<1x8x8xbf16> to vector<8x8xbf16>
    %cst_108 = arith.constant dense<0.000000e+00> : vector<8x256xf32>
    %416 = tpu.matmul %415, %413, %cst_108 {dimension_numbers = #tpu.dot_dimension_numbers<[1], [0], [0], [1], [0, 0, 1, 1], [], []>} : vector<8x8xbf16>, vector<8x256xbf16>, vector<8x256xf32> -> vector<8x256xf32>
    %417 = arith.addf %408, %416 : vector<8x256xf32>
    %418 = vector.extract_strided_slice %367 {offsets = [0, 6], sizes = [8, 256], strides = [1, 1]} : vector<8x262xbf16> to vector<8x256xbf16>
    %cst_109 = arith.constant 0.000000e+00 : bf16
    %419 = vector.broadcast %cst_109 : bf16 to vector<8x256xbf16>
    %420 = vector.shape_cast %126 : vector<1x256xi1> to vector<1x256xi1>
    %421 = vector.broadcast %420 : vector<1x256xi1> to vector<8x256xi1>
    %422 = arith.select %421, %418, %419 : vector<8x256xi1>, vector<8x256xbf16>
    %423 = vector.extract_strided_slice %368 {offsets = [6, 0, 0], sizes = [1, 8, 8], strides = [1, 1, 1]} : vector<7x8x8xbf16> to vector<1x8x8xbf16>
    %424 = vector.shape_cast %423 : vector<1x8x8xbf16> to vector<8x8xbf16>
    %cst_110 = arith.constant dense<0.000000e+00> : vector<8x256xf32>
    %425 = tpu.matmul %424, %422, %cst_110 {dimension_numbers = #tpu.dot_dimension_numbers<[1], [0], [0], [1], [0, 0, 1, 1], [], []>} : vector<8x8xbf16>, vector<8x256xbf16>, vector<8x256xf32> -> vector<8x256xf32>
    %426 = arith.addf %417, %425 : vector<8x256xf32>
    %427 = vector.broadcast %363 : vector<8x1xf32> to vector<8x256xf32>
    %428 = arith.mulf %426, %427 : vector<8x256xf32>
    %429 = vector.broadcast %365 : vector<8x1xf32> to vector<8x256xf32>
    %430 = arith.addf %428, %429 : vector<8x256xf32>
    %431 = arith.truncf %430 : vector<8x256xf32> to vector<8x256xbf16>
    %432 = vector.extract_strided_slice %36 {offsets = [7, 0, 0], sizes = [1, 8, 1], strides = [1, 1, 1]} : vector<10x8x1xf32> to vector<1x8x1xf32>
    %433 = vector.shape_cast %432 : vector<1x8x1xf32> to vector<8x1xf32>
    %434 = vector.extract_strided_slice %37 {offsets = [7, 0, 0], sizes = [1, 8, 1], strides = [1, 1, 1]} : vector<10x8x1xf32> to vector<1x8x1xf32>
    %435 = vector.shape_cast %434 : vector<1x8x1xf32> to vector<8x1xf32>
    %cst_111 = arith.constant 0.000000e+00 : bf16
    %436 = vector.broadcast %cst_111 : bf16 to vector<8x48xbf16>
    %437 = tpu.concatenate %436, %431, %436 in 1 : vector<8x48xbf16>, vector<8x256xbf16>, vector<8x48xbf16> -> vector<8x352xbf16>
    %c0_112 = arith.constant 0 : index
    %c0_113 = arith.constant 0 : index
    %c0_114 = arith.constant 0 : index
    %438 = vector.load %arg12[%c0_112, %c0_113, %c0_114] : memref<7x8x8xbf16, #tpu.memory_space<vmem>>, vector<7x8x8xbf16>
    %439 = vector.extract_strided_slice %437 {offsets = [0, 0], sizes = [8, 256], strides = [1, 1]} : vector<8x352xbf16> to vector<8x256xbf16>
    %440 = vector.extract_strided_slice %438 {offsets = [0, 0, 0], sizes = [1, 8, 8], strides = [1, 1, 1]} : vector<7x8x8xbf16> to vector<1x8x8xbf16>
    %441 = vector.shape_cast %440 : vector<1x8x8xbf16> to vector<8x8xbf16>
    %cst_115 = arith.constant dense<0.000000e+00> : vector<8x256xf32>
    %442 = tpu.matmul %441, %439, %cst_115 {dimension_numbers = #tpu.dot_dimension_numbers<[1], [0], [0], [1], [0, 0, 1, 1], [], []>} : vector<8x8xbf16>, vector<8x256xbf16>, vector<8x256xf32> -> vector<8x256xf32>
    %443 = vector.extract_strided_slice %437 {offsets = [0, 16], sizes = [8, 256], strides = [1, 1]} : vector<8x352xbf16> to vector<8x256xbf16>
    %444 = vector.extract_strided_slice %438 {offsets = [1, 0, 0], sizes = [1, 8, 8], strides = [1, 1, 1]} : vector<7x8x8xbf16> to vector<1x8x8xbf16>
    %445 = vector.shape_cast %444 : vector<1x8x8xbf16> to vector<8x8xbf16>
    %cst_116 = arith.constant dense<0.000000e+00> : vector<8x256xf32>
    %446 = tpu.matmul %445, %443, %cst_116 {dimension_numbers = #tpu.dot_dimension_numbers<[1], [0], [0], [1], [0, 0, 1, 1], [], []>} : vector<8x8xbf16>, vector<8x256xbf16>, vector<8x256xf32> -> vector<8x256xf32>
    %447 = arith.addf %442, %446 : vector<8x256xf32>
    %448 = vector.extract_strided_slice %437 {offsets = [0, 32], sizes = [8, 256], strides = [1, 1]} : vector<8x352xbf16> to vector<8x256xbf16>
    %449 = vector.extract_strided_slice %438 {offsets = [2, 0, 0], sizes = [1, 8, 8], strides = [1, 1, 1]} : vector<7x8x8xbf16> to vector<1x8x8xbf16>
    %450 = vector.shape_cast %449 : vector<1x8x8xbf16> to vector<8x8xbf16>
    %cst_117 = arith.constant dense<0.000000e+00> : vector<8x256xf32>
    %451 = tpu.matmul %450, %448, %cst_117 {dimension_numbers = #tpu.dot_dimension_numbers<[1], [0], [0], [1], [0, 0, 1, 1], [], []>} : vector<8x8xbf16>, vector<8x256xbf16>, vector<8x256xf32> -> vector<8x256xf32>
    %452 = arith.addf %447, %451 : vector<8x256xf32>
    %453 = vector.extract_strided_slice %437 {offsets = [0, 48], sizes = [8, 256], strides = [1, 1]} : vector<8x352xbf16> to vector<8x256xbf16>
    %454 = vector.extract_strided_slice %438 {offsets = [3, 0, 0], sizes = [1, 8, 8], strides = [1, 1, 1]} : vector<7x8x8xbf16> to vector<1x8x8xbf16>
    %455 = vector.shape_cast %454 : vector<1x8x8xbf16> to vector<8x8xbf16>
    %cst_118 = arith.constant dense<0.000000e+00> : vector<8x256xf32>
    %456 = tpu.matmul %455, %453, %cst_118 {dimension_numbers = #tpu.dot_dimension_numbers<[1], [0], [0], [1], [0, 0, 1, 1], [], []>} : vector<8x8xbf16>, vector<8x256xbf16>, vector<8x256xf32> -> vector<8x256xf32>
    %457 = arith.addf %452, %456 : vector<8x256xf32>
    %458 = vector.extract_strided_slice %437 {offsets = [0, 64], sizes = [8, 256], strides = [1, 1]} : vector<8x352xbf16> to vector<8x256xbf16>
    %459 = vector.extract_strided_slice %438 {offsets = [4, 0, 0], sizes = [1, 8, 8], strides = [1, 1, 1]} : vector<7x8x8xbf16> to vector<1x8x8xbf16>
    %460 = vector.shape_cast %459 : vector<1x8x8xbf16> to vector<8x8xbf16>
    %cst_119 = arith.constant dense<0.000000e+00> : vector<8x256xf32>
    %461 = tpu.matmul %460, %458, %cst_119 {dimension_numbers = #tpu.dot_dimension_numbers<[1], [0], [0], [1], [0, 0, 1, 1], [], []>} : vector<8x8xbf16>, vector<8x256xbf16>, vector<8x256xf32> -> vector<8x256xf32>
    %462 = arith.addf %457, %461 : vector<8x256xf32>
    %463 = vector.extract_strided_slice %437 {offsets = [0, 80], sizes = [8, 256], strides = [1, 1]} : vector<8x352xbf16> to vector<8x256xbf16>
    %464 = vector.extract_strided_slice %438 {offsets = [5, 0, 0], sizes = [1, 8, 8], strides = [1, 1, 1]} : vector<7x8x8xbf16> to vector<1x8x8xbf16>
    %465 = vector.shape_cast %464 : vector<1x8x8xbf16> to vector<8x8xbf16>
    %cst_120 = arith.constant dense<0.000000e+00> : vector<8x256xf32>
    %466 = tpu.matmul %465, %463, %cst_120 {dimension_numbers = #tpu.dot_dimension_numbers<[1], [0], [0], [1], [0, 0, 1, 1], [], []>} : vector<8x8xbf16>, vector<8x256xbf16>, vector<8x256xf32> -> vector<8x256xf32>
    %467 = arith.addf %462, %466 : vector<8x256xf32>
    %468 = vector.extract_strided_slice %437 {offsets = [0, 96], sizes = [8, 256], strides = [1, 1]} : vector<8x352xbf16> to vector<8x256xbf16>
    %469 = vector.extract_strided_slice %438 {offsets = [6, 0, 0], sizes = [1, 8, 8], strides = [1, 1, 1]} : vector<7x8x8xbf16> to vector<1x8x8xbf16>
    %470 = vector.shape_cast %469 : vector<1x8x8xbf16> to vector<8x8xbf16>
    %cst_121 = arith.constant dense<0.000000e+00> : vector<8x256xf32>
    %471 = tpu.matmul %470, %468, %cst_121 {dimension_numbers = #tpu.dot_dimension_numbers<[1], [0], [0], [1], [0, 0, 1, 1], [], []>} : vector<8x8xbf16>, vector<8x256xbf16>, vector<8x256xf32> -> vector<8x256xf32>
    %472 = arith.addf %467, %471 : vector<8x256xf32>
    %473 = vector.broadcast %433 : vector<8x1xf32> to vector<8x256xf32>
    %474 = arith.mulf %472, %473 : vector<8x256xf32>
    %475 = vector.broadcast %435 : vector<8x1xf32> to vector<8x256xf32>
    %476 = arith.addf %474, %475 : vector<8x256xf32>
    %477 = arith.truncf %476 : vector<8x256xf32> to vector<8x256xbf16>
    %478 = vector.extract_strided_slice %36 {offsets = [8, 0, 0], sizes = [1, 8, 1], strides = [1, 1, 1]} : vector<10x8x1xf32> to vector<1x8x1xf32>
    %479 = vector.shape_cast %478 : vector<1x8x1xf32> to vector<8x1xf32>
    %480 = vector.extract_strided_slice %37 {offsets = [8, 0, 0], sizes = [1, 8, 1], strides = [1, 1, 1]} : vector<10x8x1xf32> to vector<1x8x1xf32>
    %481 = vector.shape_cast %480 : vector<1x8x1xf32> to vector<8x1xf32>
    %cst_122 = arith.constant 0.000000e+00 : bf16
    %482 = vector.broadcast %cst_122 : bf16 to vector<8x119xbf16>
    %483 = tpu.concatenate %482, %477, %482 in 1 : vector<8x119xbf16>, vector<8x256xbf16>, vector<8x119xbf16> -> vector<8x494xbf16>
    %c0_123 = arith.constant 0 : index
    %c0_124 = arith.constant 0 : index
    %c0_125 = arith.constant 0 : index
    %484 = vector.load %arg13[%c0_123, %c0_124, %c0_125] : memref<9x8x8xbf16, #tpu.memory_space<vmem>>, vector<9x8x8xbf16>
    %485 = vector.extract_strided_slice %483 {offsets = [0, 0], sizes = [8, 256], strides = [1, 1]} : vector<8x494xbf16> to vector<8x256xbf16>
    %c7_i32 = arith.constant 7 : i32
    %486 = vector.broadcast %c7_i32 : i32 to vector<1x256xi32>
    %487 = arith.cmpi sge, %16, %486 : vector<1x256xi32>
    %cst_126 = arith.constant 0.000000e+00 : bf16
    %488 = vector.broadcast %cst_126 : bf16 to vector<8x256xbf16>
    %489 = vector.shape_cast %487 : vector<1x256xi1> to vector<1x256xi1>
    %490 = vector.broadcast %489 : vector<1x256xi1> to vector<8x256xi1>
    %491 = arith.select %490, %485, %488 : vector<8x256xi1>, vector<8x256xbf16>
    %492 = vector.extract_strided_slice %484 {offsets = [0, 0, 0], sizes = [1, 8, 8], strides = [1, 1, 1]} : vector<9x8x8xbf16> to vector<1x8x8xbf16>
    %493 = vector.shape_cast %492 : vector<1x8x8xbf16> to vector<8x8xbf16>
    %cst_127 = arith.constant dense<0.000000e+00> : vector<8x256xf32>
    %494 = tpu.matmul %493, %491, %cst_127 {dimension_numbers = #tpu.dot_dimension_numbers<[1], [0], [0], [1], [0, 0, 1, 1], [], []>} : vector<8x8xbf16>, vector<8x256xbf16>, vector<8x256xf32> -> vector<8x256xf32>
    %495 = vector.extract_strided_slice %483 {offsets = [0, 7], sizes = [8, 256], strides = [1, 1]} : vector<8x494xbf16> to vector<8x256xbf16>
    %496 = vector.extract_strided_slice %484 {offsets = [1, 0, 0], sizes = [1, 8, 8], strides = [1, 1, 1]} : vector<9x8x8xbf16> to vector<1x8x8xbf16>
    %497 = vector.shape_cast %496 : vector<1x8x8xbf16> to vector<8x8xbf16>
    %cst_128 = arith.constant dense<0.000000e+00> : vector<8x256xf32>
    %498 = tpu.matmul %497, %495, %cst_128 {dimension_numbers = #tpu.dot_dimension_numbers<[1], [0], [0], [1], [0, 0, 1, 1], [], []>} : vector<8x8xbf16>, vector<8x256xbf16>, vector<8x256xf32> -> vector<8x256xf32>
    %499 = arith.addf %494, %498 : vector<8x256xf32>
    %500 = vector.extract_strided_slice %483 {offsets = [0, 14], sizes = [8, 256], strides = [1, 1]} : vector<8x494xbf16> to vector<8x256xbf16>
    %c9_i32 = arith.constant 9 : i32
    %501 = vector.broadcast %c9_i32 : i32 to vector<1x256xi32>
    %502 = arith.cmpi slt, %16, %501 : vector<1x256xi32>
    %cst_129 = arith.constant 0.000000e+00 : bf16
    %503 = vector.broadcast %cst_129 : bf16 to vector<8x256xbf16>
    %504 = vector.shape_cast %502 : vector<1x256xi1> to vector<1x256xi1>
    %505 = vector.broadcast %504 : vector<1x256xi1> to vector<8x256xi1>
    %506 = arith.select %505, %500, %503 : vector<8x256xi1>, vector<8x256xbf16>
    %507 = vector.extract_strided_slice %484 {offsets = [2, 0, 0], sizes = [1, 8, 8], strides = [1, 1, 1]} : vector<9x8x8xbf16> to vector<1x8x8xbf16>
    %508 = vector.shape_cast %507 : vector<1x8x8xbf16> to vector<8x8xbf16>
    %cst_130 = arith.constant dense<0.000000e+00> : vector<8x256xf32>
    %509 = tpu.matmul %508, %506, %cst_130 {dimension_numbers = #tpu.dot_dimension_numbers<[1], [0], [0], [1], [0, 0, 1, 1], [], []>} : vector<8x8xbf16>, vector<8x256xbf16>, vector<8x256xf32> -> vector<8x256xf32>
    %510 = arith.addf %499, %509 : vector<8x256xf32>
    %511 = vector.extract_strided_slice %483 {offsets = [0, 112], sizes = [8, 256], strides = [1, 1]} : vector<8x494xbf16> to vector<8x256xbf16>
    %cst_131 = arith.constant 0.000000e+00 : bf16
    %512 = vector.broadcast %cst_131 : bf16 to vector<8x256xbf16>
    %513 = vector.shape_cast %487 : vector<1x256xi1> to vector<1x256xi1>
    %514 = vector.broadcast %513 : vector<1x256xi1> to vector<8x256xi1>
    %515 = arith.select %514, %511, %512 : vector<8x256xi1>, vector<8x256xbf16>
    %516 = vector.extract_strided_slice %484 {offsets = [3, 0, 0], sizes = [1, 8, 8], strides = [1, 1, 1]} : vector<9x8x8xbf16> to vector<1x8x8xbf16>
    %517 = vector.shape_cast %516 : vector<1x8x8xbf16> to vector<8x8xbf16>
    %cst_132 = arith.constant dense<0.000000e+00> : vector<8x256xf32>
    %518 = tpu.matmul %517, %515, %cst_132 {dimension_numbers = #tpu.dot_dimension_numbers<[1], [0], [0], [1], [0, 0, 1, 1], [], []>} : vector<8x8xbf16>, vector<8x256xbf16>, vector<8x256xf32> -> vector<8x256xf32>
    %519 = arith.addf %510, %518 : vector<8x256xf32>
    %520 = vector.extract_strided_slice %483 {offsets = [0, 119], sizes = [8, 256], strides = [1, 1]} : vector<8x494xbf16> to vector<8x256xbf16>
    %521 = vector.extract_strided_slice %484 {offsets = [4, 0, 0], sizes = [1, 8, 8], strides = [1, 1, 1]} : vector<9x8x8xbf16> to vector<1x8x8xbf16>
    %522 = vector.shape_cast %521 : vector<1x8x8xbf16> to vector<8x8xbf16>
    %cst_133 = arith.constant dense<0.000000e+00> : vector<8x256xf32>
    %523 = tpu.matmul %522, %520, %cst_133 {dimension_numbers = #tpu.dot_dimension_numbers<[1], [0], [0], [1], [0, 0, 1, 1], [], []>} : vector<8x8xbf16>, vector<8x256xbf16>, vector<8x256xf32> -> vector<8x256xf32>
    %524 = arith.addf %519, %523 : vector<8x256xf32>
    %525 = vector.extract_strided_slice %483 {offsets = [0, 126], sizes = [8, 256], strides = [1, 1]} : vector<8x494xbf16> to vector<8x256xbf16>
    %cst_134 = arith.constant 0.000000e+00 : bf16
    %526 = vector.broadcast %cst_134 : bf16 to vector<8x256xbf16>
    %527 = vector.shape_cast %502 : vector<1x256xi1> to vector<1x256xi1>
    %528 = vector.broadcast %527 : vector<1x256xi1> to vector<8x256xi1>
    %529 = arith.select %528, %525, %526 : vector<8x256xi1>, vector<8x256xbf16>
    %530 = vector.extract_strided_slice %484 {offsets = [5, 0, 0], sizes = [1, 8, 8], strides = [1, 1, 1]} : vector<9x8x8xbf16> to vector<1x8x8xbf16>
    %531 = vector.shape_cast %530 : vector<1x8x8xbf16> to vector<8x8xbf16>
    %cst_135 = arith.constant dense<0.000000e+00> : vector<8x256xf32>
    %532 = tpu.matmul %531, %529, %cst_135 {dimension_numbers = #tpu.dot_dimension_numbers<[1], [0], [0], [1], [0, 0, 1, 1], [], []>} : vector<8x8xbf16>, vector<8x256xbf16>, vector<8x256xf32> -> vector<8x256xf32>
    %533 = arith.addf %524, %532 : vector<8x256xf32>
    %534 = vector.extract_strided_slice %483 {offsets = [0, 224], sizes = [8, 256], strides = [1, 1]} : vector<8x494xbf16> to vector<8x256xbf16>
    %cst_136 = arith.constant 0.000000e+00 : bf16
    %535 = vector.broadcast %cst_136 : bf16 to vector<8x256xbf16>
    %536 = vector.shape_cast %487 : vector<1x256xi1> to vector<1x256xi1>
    %537 = vector.broadcast %536 : vector<1x256xi1> to vector<8x256xi1>
    %538 = arith.select %537, %534, %535 : vector<8x256xi1>, vector<8x256xbf16>
    %539 = vector.extract_strided_slice %484 {offsets = [6, 0, 0], sizes = [1, 8, 8], strides = [1, 1, 1]} : vector<9x8x8xbf16> to vector<1x8x8xbf16>
    %540 = vector.shape_cast %539 : vector<1x8x8xbf16> to vector<8x8xbf16>
    %cst_137 = arith.constant dense<0.000000e+00> : vector<8x256xf32>
    %541 = tpu.matmul %540, %538, %cst_137 {dimension_numbers = #tpu.dot_dimension_numbers<[1], [0], [0], [1], [0, 0, 1, 1], [], []>} : vector<8x8xbf16>, vector<8x256xbf16>, vector<8x256xf32> -> vector<8x256xf32>
    %542 = arith.addf %533, %541 : vector<8x256xf32>
    %543 = vector.extract_strided_slice %483 {offsets = [0, 231], sizes = [8, 256], strides = [1, 1]} : vector<8x494xbf16> to vector<8x256xbf16>
    %544 = vector.extract_strided_slice %484 {offsets = [7, 0, 0], sizes = [1, 8, 8], strides = [1, 1, 1]} : vector<9x8x8xbf16> to vector<1x8x8xbf16>
    %545 = vector.shape_cast %544 : vector<1x8x8xbf16> to vector<8x8xbf16>
    %cst_138 = arith.constant dense<0.000000e+00> : vector<8x256xf32>
    %546 = tpu.matmul %545, %543, %cst_138 {dimension_numbers = #tpu.dot_dimension_numbers<[1], [0], [0], [1], [0, 0, 1, 1], [], []>} : vector<8x8xbf16>, vector<8x256xbf16>, vector<8x256xf32> -> vector<8x256xf32>
    %547 = arith.addf %542, %546 : vector<8x256xf32>
    %548 = vector.extract_strided_slice %483 {offsets = [0, 238], sizes = [8, 256], strides = [1, 1]} : vector<8x494xbf16> to vector<8x256xbf16>
    %cst_139 = arith.constant 0.000000e+00 : bf16
    %549 = vector.broadcast %cst_139 : bf16 to vector<8x256xbf16>
    %550 = vector.shape_cast %502 : vector<1x256xi1> to vector<1x256xi1>
    %551 = vector.broadcast %550 : vector<1x256xi1> to vector<8x256xi1>
    %552 = arith.select %551, %548, %549 : vector<8x256xi1>, vector<8x256xbf16>
    %553 = vector.extract_strided_slice %484 {offsets = [8, 0, 0], sizes = [1, 8, 8], strides = [1, 1, 1]} : vector<9x8x8xbf16> to vector<1x8x8xbf16>
    %554 = vector.shape_cast %553 : vector<1x8x8xbf16> to vector<8x8xbf16>
    %cst_140 = arith.constant dense<0.000000e+00> : vector<8x256xf32>
    %555 = tpu.matmul %554, %552, %cst_140 {dimension_numbers = #tpu.dot_dimension_numbers<[1], [0], [0], [1], [0, 0, 1, 1], [], []>} : vector<8x8xbf16>, vector<8x256xbf16>, vector<8x256xf32> -> vector<8x256xf32>
    %556 = arith.addf %547, %555 : vector<8x256xf32>
    %557 = vector.broadcast %479 : vector<8x1xf32> to vector<8x256xf32>
    %558 = arith.mulf %556, %557 : vector<8x256xf32>
    %559 = vector.broadcast %481 : vector<8x1xf32> to vector<8x256xf32>
    %560 = arith.addf %558, %559 : vector<8x256xf32>
    %561 = arith.truncf %560 : vector<8x256xf32> to vector<8x256xbf16>
    %562 = tpu.concatenate %32, %185, %361, %561 in 0 : vector<8x256xbf16>, vector<8x256xbf16>, vector<8x256xbf16>, vector<8x256xbf16> -> vector<32x256xbf16>
    %563 = vector.extract_strided_slice %36 {offsets = [9, 0, 0], sizes = [1, 8, 1], strides = [1, 1, 1]} : vector<10x8x1xf32> to vector<1x8x1xf32>
    %564 = vector.shape_cast %563 : vector<1x8x1xf32> to vector<8x1xf32>
    %565 = vector.extract_strided_slice %37 {offsets = [9, 0, 0], sizes = [1, 8, 1], strides = [1, 1, 1]} : vector<10x8x1xf32> to vector<1x8x1xf32>
    %566 = vector.shape_cast %565 : vector<1x8x1xf32> to vector<8x1xf32>
    %cst_141 = arith.constant 0.000000e+00 : bf16
    %567 = vector.broadcast %cst_141 : bf16 to vector<32x17xbf16>
    %568 = tpu.concatenate %567, %562, %567 in 1 : vector<32x17xbf16>, vector<32x256xbf16>, vector<32x17xbf16> -> vector<32x290xbf16>
    %c0_142 = arith.constant 0 : index
    %c0_143 = arith.constant 0 : index
    %c0_144 = arith.constant 0 : index
    %569 = vector.load %arg14[%c0_142, %c0_143, %c0_144] : memref<9x8x32xbf16, #tpu.memory_space<vmem>>, vector<9x8x32xbf16>
    %570 = vector.extract_strided_slice %568 {offsets = [0, 0], sizes = [32, 256], strides = [1, 1]} : vector<32x290xbf16> to vector<32x256xbf16>
    %cst_145 = arith.constant 0.000000e+00 : bf16
    %571 = vector.broadcast %cst_145 : bf16 to vector<32x256xbf16>
    %572 = vector.shape_cast %47 : vector<1x256xi1> to vector<1x256xi1>
    %573 = vector.broadcast %572 : vector<1x256xi1> to vector<32x256xi1>
    %574 = arith.select %573, %570, %571 : vector<32x256xi1>, vector<32x256xbf16>
    %575 = vector.extract_strided_slice %569 {offsets = [0, 0, 0], sizes = [1, 8, 32], strides = [1, 1, 1]} : vector<9x8x32xbf16> to vector<1x8x32xbf16>
    %576 = vector.shape_cast %575 : vector<1x8x32xbf16> to vector<8x32xbf16>
    %cst_146 = arith.constant dense<0.000000e+00> : vector<8x256xf32>
    %577 = tpu.matmul %576, %574, %cst_146 {dimension_numbers = #tpu.dot_dimension_numbers<[1], [0], [0], [1], [0, 0, 1, 1], [], []>} : vector<8x32xbf16>, vector<32x256xbf16>, vector<8x256xf32> -> vector<8x256xf32>
    %578 = vector.extract_strided_slice %568 {offsets = [0, 1], sizes = [32, 256], strides = [1, 1]} : vector<32x290xbf16> to vector<32x256xbf16>
    %579 = vector.extract_strided_slice %569 {offsets = [1, 0, 0], sizes = [1, 8, 32], strides = [1, 1, 1]} : vector<9x8x32xbf16> to vector<1x8x32xbf16>
    %580 = vector.shape_cast %579 : vector<1x8x32xbf16> to vector<8x32xbf16>
    %cst_147 = arith.constant dense<0.000000e+00> : vector<8x256xf32>
    %581 = tpu.matmul %580, %578, %cst_147 {dimension_numbers = #tpu.dot_dimension_numbers<[1], [0], [0], [1], [0, 0, 1, 1], [], []>} : vector<8x32xbf16>, vector<32x256xbf16>, vector<8x256xf32> -> vector<8x256xf32>
    %582 = arith.addf %577, %581 : vector<8x256xf32>
    %583 = vector.extract_strided_slice %568 {offsets = [0, 2], sizes = [32, 256], strides = [1, 1]} : vector<32x290xbf16> to vector<32x256xbf16>
    %cst_148 = arith.constant 0.000000e+00 : bf16
    %584 = vector.broadcast %cst_148 : bf16 to vector<32x256xbf16>
    %585 = vector.shape_cast %62 : vector<1x256xi1> to vector<1x256xi1>
    %586 = vector.broadcast %585 : vector<1x256xi1> to vector<32x256xi1>
    %587 = arith.select %586, %583, %584 : vector<32x256xi1>, vector<32x256xbf16>
    %588 = vector.extract_strided_slice %569 {offsets = [2, 0, 0], sizes = [1, 8, 32], strides = [1, 1, 1]} : vector<9x8x32xbf16> to vector<1x8x32xbf16>
    %589 = vector.shape_cast %588 : vector<1x8x32xbf16> to vector<8x32xbf16>
    %cst_149 = arith.constant dense<0.000000e+00> : vector<8x256xf32>
    %590 = tpu.matmul %589, %587, %cst_149 {dimension_numbers = #tpu.dot_dimension_numbers<[1], [0], [0], [1], [0, 0, 1, 1], [], []>} : vector<8x32xbf16>, vector<32x256xbf16>, vector<8x256xf32> -> vector<8x256xf32>
    %591 = arith.addf %582, %590 : vector<8x256xf32>
    %592 = vector.extract_strided_slice %568 {offsets = [0, 16], sizes = [32, 256], strides = [1, 1]} : vector<32x290xbf16> to vector<32x256xbf16>
    %cst_150 = arith.constant 0.000000e+00 : bf16
    %593 = vector.broadcast %cst_150 : bf16 to vector<32x256xbf16>
    %594 = vector.shape_cast %47 : vector<1x256xi1> to vector<1x256xi1>
    %595 = vector.broadcast %594 : vector<1x256xi1> to vector<32x256xi1>
    %596 = arith.select %595, %592, %593 : vector<32x256xi1>, vector<32x256xbf16>
    %597 = vector.extract_strided_slice %569 {offsets = [3, 0, 0], sizes = [1, 8, 32], strides = [1, 1, 1]} : vector<9x8x32xbf16> to vector<1x8x32xbf16>
    %598 = vector.shape_cast %597 : vector<1x8x32xbf16> to vector<8x32xbf16>
    %cst_151 = arith.constant dense<0.000000e+00> : vector<8x256xf32>
    %599 = tpu.matmul %598, %596, %cst_151 {dimension_numbers = #tpu.dot_dimension_numbers<[1], [0], [0], [1], [0, 0, 1, 1], [], []>} : vector<8x32xbf16>, vector<32x256xbf16>, vector<8x256xf32> -> vector<8x256xf32>
    %600 = arith.addf %591, %599 : vector<8x256xf32>
    %601 = vector.extract_strided_slice %568 {offsets = [0, 17], sizes = [32, 256], strides = [1, 1]} : vector<32x290xbf16> to vector<32x256xbf16>
    %602 = vector.extract_strided_slice %569 {offsets = [4, 0, 0], sizes = [1, 8, 32], strides = [1, 1, 1]} : vector<9x8x32xbf16> to vector<1x8x32xbf16>
    %603 = vector.shape_cast %602 : vector<1x8x32xbf16> to vector<8x32xbf16>
    %cst_152 = arith.constant dense<0.000000e+00> : vector<8x256xf32>
    %604 = tpu.matmul %603, %601, %cst_152 {dimension_numbers = #tpu.dot_dimension_numbers<[1], [0], [0], [1], [0, 0, 1, 1], [], []>} : vector<8x32xbf16>, vector<32x256xbf16>, vector<8x256xf32> -> vector<8x256xf32>
    %605 = arith.addf %600, %604 : vector<8x256xf32>
    %606 = vector.extract_strided_slice %568 {offsets = [0, 18], sizes = [32, 256], strides = [1, 1]} : vector<32x290xbf16> to vector<32x256xbf16>
    %cst_153 = arith.constant 0.000000e+00 : bf16
    %607 = vector.broadcast %cst_153 : bf16 to vector<32x256xbf16>
    %608 = vector.shape_cast %62 : vector<1x256xi1> to vector<1x256xi1>
    %609 = vector.broadcast %608 : vector<1x256xi1> to vector<32x256xi1>
    %610 = arith.select %609, %606, %607 : vector<32x256xi1>, vector<32x256xbf16>
    %611 = vector.extract_strided_slice %569 {offsets = [5, 0, 0], sizes = [1, 8, 32], strides = [1, 1, 1]} : vector<9x8x32xbf16> to vector<1x8x32xbf16>
    %612 = vector.shape_cast %611 : vector<1x8x32xbf16> to vector<8x32xbf16>
    %cst_154 = arith.constant dense<0.000000e+00> : vector<8x256xf32>
    %613 = tpu.matmul %612, %610, %cst_154 {dimension_numbers = #tpu.dot_dimension_numbers<[1], [0], [0], [1], [0, 0, 1, 1], [], []>} : vector<8x32xbf16>, vector<32x256xbf16>, vector<8x256xf32> -> vector<8x256xf32>
    %614 = arith.addf %605, %613 : vector<8x256xf32>
    %615 = vector.extract_strided_slice %568 {offsets = [0, 32], sizes = [32, 256], strides = [1, 1]} : vector<32x290xbf16> to vector<32x256xbf16>
    %cst_155 = arith.constant 0.000000e+00 : bf16
    %616 = vector.broadcast %cst_155 : bf16 to vector<32x256xbf16>
    %617 = vector.shape_cast %47 : vector<1x256xi1> to vector<1x256xi1>
    %618 = vector.broadcast %617 : vector<1x256xi1> to vector<32x256xi1>
    %619 = arith.select %618, %615, %616 : vector<32x256xi1>, vector<32x256xbf16>
    %620 = vector.extract_strided_slice %569 {offsets = [6, 0, 0], sizes = [1, 8, 32], strides = [1, 1, 1]} : vector<9x8x32xbf16> to vector<1x8x32xbf16>
    %621 = vector.shape_cast %620 : vector<1x8x32xbf16> to vector<8x32xbf16>
    %cst_156 = arith.constant dense<0.000000e+00> : vector<8x256xf32>
    %622 = tpu.matmul %621, %619, %cst_156 {dimension_numbers = #tpu.dot_dimension_numbers<[1], [0], [0], [1], [0, 0, 1, 1], [], []>} : vector<8x32xbf16>, vector<32x256xbf16>, vector<8x256xf32> -> vector<8x256xf32>
    %623 = arith.addf %614, %622 : vector<8x256xf32>
    %624 = vector.extract_strided_slice %568 {offsets = [0, 33], sizes = [32, 256], strides = [1, 1]} : vector<32x290xbf16> to vector<32x256xbf16>
    %625 = vector.extract_strided_slice %569 {offsets = [7, 0, 0], sizes = [1, 8, 32], strides = [1, 1, 1]} : vector<9x8x32xbf16> to vector<1x8x32xbf16>
    %626 = vector.shape_cast %625 : vector<1x8x32xbf16> to vector<8x32xbf16>
    %cst_157 = arith.constant dense<0.000000e+00> : vector<8x256xf32>
    %627 = tpu.matmul %626, %624, %cst_157 {dimension_numbers = #tpu.dot_dimension_numbers<[1], [0], [0], [1], [0, 0, 1, 1], [], []>} : vector<8x32xbf16>, vector<32x256xbf16>, vector<8x256xf32> -> vector<8x256xf32>
    %628 = arith.addf %623, %627 : vector<8x256xf32>
    %629 = vector.extract_strided_slice %568 {offsets = [0, 34], sizes = [32, 256], strides = [1, 1]} : vector<32x290xbf16> to vector<32x256xbf16>
    %cst_158 = arith.constant 0.000000e+00 : bf16
    %630 = vector.broadcast %cst_158 : bf16 to vector<32x256xbf16>
    %631 = vector.shape_cast %62 : vector<1x256xi1> to vector<1x256xi1>
    %632 = vector.broadcast %631 : vector<1x256xi1> to vector<32x256xi1>
    %633 = arith.select %632, %629, %630 : vector<32x256xi1>, vector<32x256xbf16>
    %634 = vector.extract_strided_slice %569 {offsets = [8, 0, 0], sizes = [1, 8, 32], strides = [1, 1, 1]} : vector<9x8x32xbf16> to vector<1x8x32xbf16>
    %635 = vector.shape_cast %634 : vector<1x8x32xbf16> to vector<8x32xbf16>
    %cst_159 = arith.constant dense<0.000000e+00> : vector<8x256xf32>
    %636 = tpu.matmul %635, %633, %cst_159 {dimension_numbers = #tpu.dot_dimension_numbers<[1], [0], [0], [1], [0, 0, 1, 1], [], []>} : vector<8x32xbf16>, vector<32x256xbf16>, vector<8x256xf32> -> vector<8x256xf32>
    %637 = arith.addf %628, %636 : vector<8x256xf32>
    %638 = vector.broadcast %564 : vector<8x1xf32> to vector<8x256xf32>
    %639 = arith.mulf %637, %638 : vector<8x256xf32>
    %640 = vector.broadcast %566 : vector<8x1xf32> to vector<8x256xf32>
    %641 = arith.addf %639, %640 : vector<8x256xf32>
    %642 = arith.addf %641, %31 : vector<8x256xf32>
    %cst_160 = arith.constant 0.000000e+00 : f32
    %643 = vector.broadcast %cst_160 : f32 to vector<8x256xf32>
    %644 = arith.maximumf %642, %643 : vector<8x256xf32>
    %645 = vector.shape_cast %644 : vector<8x256xf32> to vector<1x8x256xf32>
    %c0_161 = arith.constant 0 : index
    %c0_162 = arith.constant 0 : index
    %c0_163 = arith.constant 0 : index
    %646 = vector.load %arg17[%c0_161, %c0_162, %c0_163] : memref<1x8x256xf32, #tpu.memory_space<vmem>>, vector<1x8x256xf32>
    tpu.vector_store %arg17[%c0_161, %c0_162, %c0_163], %645 {strides = array<i32>} : memref<1x8x256xf32, #tpu.memory_space<vmem>>, vector<1x8x256xf32>,
    return
  }
  func.func @transform_0(%arg0: i32) -> (i32, i32, i32) {
    %c0_i32 = arith.constant 0 : i32
    %c0_i32_0 = arith.constant 0 : i32
    %c0_i32_1 = arith.constant 0 : i32
    return %arg0, %c0_i32, %c0_i32_0 : i32, i32, i32
  }
  func.func @transform_1(%arg0: i32) -> (i32, i32) {
    %c0_i32 = arith.constant 0 : i32
    %c0_i32_0 = arith.constant 0 : i32
    %c0_i32_1 = arith.constant 0 : i32
    return %c0_i32, %c0_i32_0 : i32, i32
  }
  func.func @transform_2(%arg0: i32) -> (i32, i32) {
    %c0_i32 = arith.constant 0 : i32
    %c0_i32_0 = arith.constant 0 : i32
    %c0_i32_1 = arith.constant 0 : i32
    return %c0_i32, %c0_i32_0 : i32, i32
  }
  func.func @transform_3(%arg0: i32) -> (i32, i32) {
    %c0_i32 = arith.constant 0 : i32
    %c0_i32_0 = arith.constant 0 : i32
    %c0_i32_1 = arith.constant 0 : i32
    return %c0_i32, %c0_i32_0 : i32, i32
  }
  func.func @transform_4(%arg0: i32) -> (i32, i32, i32) {
    %c0_i32 = arith.constant 0 : i32
    %c0_i32_0 = arith.constant 0 : i32
    %c0_i32_1 = arith.constant 0 : i32
    %c0_i32_2 = arith.constant 0 : i32
    return %c0_i32, %c0_i32_0, %c0_i32_1 : i32, i32, i32
  }
  func.func @transform_5(%arg0: i32) -> (i32, i32, i32) {
    %c0_i32 = arith.constant 0 : i32
    %c0_i32_0 = arith.constant 0 : i32
    %c0_i32_1 = arith.constant 0 : i32
    %c0_i32_2 = arith.constant 0 : i32
    return %c0_i32, %c0_i32_0, %c0_i32_1 : i32, i32, i32
  }
  func.func @transform_6(%arg0: i32) -> (i32, i32, i32) {
    %c0_i32 = arith.constant 0 : i32
    %c0_i32_0 = arith.constant 0 : i32
    %c0_i32_1 = arith.constant 0 : i32
    %c0_i32_2 = arith.constant 0 : i32
    return %c0_i32, %c0_i32_0, %c0_i32_1 : i32, i32, i32
  }
  func.func @transform_7(%arg0: i32) -> (i32, i32, i32) {
    %c0_i32 = arith.constant 0 : i32
    %c0_i32_0 = arith.constant 0 : i32
    %c0_i32_1 = arith.constant 0 : i32
    %c0_i32_2 = arith.constant 0 : i32
    return %c0_i32, %c0_i32_0, %c0_i32_1 : i32, i32, i32
  }
  func.func @transform_8(%arg0: i32) -> (i32, i32, i32) {
    %c0_i32 = arith.constant 0 : i32
    %c0_i32_0 = arith.constant 0 : i32
    %c0_i32_1 = arith.constant 0 : i32
    %c0_i32_2 = arith.constant 0 : i32
    return %c0_i32, %c0_i32_0, %c0_i32_1 : i32, i32, i32
  }
  func.func @transform_9(%arg0: i32) -> (i32, i32, i32) {
    %c0_i32 = arith.constant 0 : i32
    %c0_i32_0 = arith.constant 0 : i32
    %c0_i32_1 = arith.constant 0 : i32
    %c0_i32_2 = arith.constant 0 : i32
    return %c0_i32, %c0_i32_0, %c0_i32_1 : i32, i32, i32
  }
  func.func @transform_10(%arg0: i32) -> (i32, i32, i32) {
    %c0_i32 = arith.constant 0 : i32
    %c0_i32_0 = arith.constant 0 : i32
    %c0_i32_1 = arith.constant 0 : i32
    %c0_i32_2 = arith.constant 0 : i32
    return %c0_i32, %c0_i32_0, %c0_i32_1 : i32, i32, i32
  }
  func.func @transform_11(%arg0: i32) -> (i32, i32, i32) {
    %c0_i32 = arith.constant 0 : i32
    %c0_i32_0 = arith.constant 0 : i32
    %c0_i32_1 = arith.constant 0 : i32
    %c0_i32_2 = arith.constant 0 : i32
    return %c0_i32, %c0_i32_0, %c0_i32_1 : i32, i32, i32
  }
  func.func @transform_12(%arg0: i32) -> (i32, i32, i32) {
    %c0_i32 = arith.constant 0 : i32
    %c0_i32_0 = arith.constant 0 : i32
    %c0_i32_1 = arith.constant 0 : i32
    %c0_i32_2 = arith.constant 0 : i32
    return %c0_i32, %c0_i32_0, %c0_i32_1 : i32, i32, i32
  }
  func.func @transform_13(%arg0: i32) -> (i32, i32, i32) {
    %c0_i32 = arith.constant 0 : i32
    %c0_i32_0 = arith.constant 0 : i32
    %c0_i32_1 = arith.constant 0 : i32
    %c0_i32_2 = arith.constant 0 : i32
    return %c0_i32, %c0_i32_0, %c0_i32_1 : i32, i32, i32
  }
  func.func @transform_14(%arg0: i32) -> (i32, i32, i32) {
    %c0_i32 = arith.constant 0 : i32
    %c0_i32_0 = arith.constant 0 : i32
    %c0_i32_1 = arith.constant 0 : i32
    %c0_i32_2 = arith.constant 0 : i32
    return %c0_i32, %c0_i32_0, %c0_i32_1 : i32, i32, i32
  }
  func.func @transform_15(%arg0: i32) -> (i32, i32, i32) {
    %c0_i32 = arith.constant 0 : i32
    %c0_i32_0 = arith.constant 0 : i32
    %c0_i32_1 = arith.constant 0 : i32
    %c0_i32_2 = arith.constant 0 : i32
    return %c0_i32, %c0_i32_0, %c0_i32_1 : i32, i32, i32
  }
  func.func @transform_16(%arg0: i32) -> (i32, i32, i32) {
    %c0_i32 = arith.constant 0 : i32
    %c0_i32_0 = arith.constant 0 : i32
    %c0_i32_1 = arith.constant 0 : i32
    return %arg0, %c0_i32, %c0_i32_0 : i32, i32, i32
  }
}

</mosaic_0001>

<bundles_post_ra>
// kernel: rfb_forward.1
= control target key start
LH: loop header
LB: loop body
LE: loop exit
PB: predicated region body
PF: predicated region fallthrough
CT: control target
= control target key end

     0   :  { %s5613_s21 = smov 0   ;;  %s7763_s0 = inlined_call_operand.vmem [shape: bf16[2,8,256], index: 0, kind: input, shape index: {}]   ;;  %s7764_s1 = inlined_call_operand.vmem [shape: bf16[40,8], index: 1, kind: input, shape index: {}]   ;;  %s7765_s2 = inlined_call_operand.vmem [shape: f32[40,1], index: 2, kind: input, shape index: {}]   ;;  %s7766_s3 = inlined_call_operand.vmem [shape: f32[40,1], index: 3, kind: input, shape index: {}]   ;;  %s7767_s4 = inlined_call_operand.vmem [shape: bf16[3,8,8], index: 4, kind: input, shape index: {}]   ;;  %s7768_s5 = inlined_call_operand.vmem [shape: bf16[3,8,8], index: 5, kind: input, shape index: {}]   ;;  %s7769_s6 = inlined_call_operand.vmem [shape: bf16[9,8,8], index: 6, kind: input, shape index: {}]   ;;  %s7770_s7 = inlined_call_operand.vmem [shape: bf16[5,8,8], index: 7, kind: input, shape index: {}]   ;;  %s7771_s8 = inlined_call_operand.vmem [shape: bf16[5,8,8], index: 8, kind: input, shape index: {}]   ;;  %s7772_s9 = inlined_call_operand.vmem [shape: bf16[9,8,8], index: 9, kind: input, shape index: {}]   ;;  %s7773_s10 = inlined_call_operand.vmem [shape: bf16[7,8,8], index: 10, kind: input, shape index: {}]   ;;  %s7774_s11 = inlined_call_operand.vmem [shape: bf16[7,8,8], index: 11, kind: input, shape index: {}]   ;;  %s7775_s12 = inlined_call_operand.vmem [shape: bf16[9,8,8], index: 12, kind: input, shape index: {}]   ;;  %s7776_s13 = inlined_call_operand.vmem [shape: bf16[9,8,32], index: 13, kind: input, shape index: {}]   ;;  %s7777_s14 = inlined_call_operand.vmem [shape: f32[10,8,1], index: 14, kind: input, shape index: {}]   ;;  %s7778_s15 = inlined_call_operand.vmem [shape: f32[10,8,1], index: 15, kind: input, shape index: {}]   ;;  %s7779_s16 = inlined_call_operand.vmem [shape: f32[2,8,256], index: 16, kind: output, shape index: {}]  }
   0x1   :  { %7870 = sst [smem:[#allocation2_spill]] %s7763_s0 }
   0x2   :  { %7871 = sst [smem:[#allocation3_spill]] %s7764_s1 }
   0x3   :  { %7872 = sst [smem:[#allocation4_spill]] %s7767_s4 }
   0x4 LB: > { %s5250_s22 = sadd.s32 4294967295, %s5477_s21   ;;  %p5254_p0 = scmp.ge.s32.totalorder %s5477_s21, 1  ;;  %s5477_s21 = sphi %s5613_s21, %s26_s21  }
   0x5   : > { %p462_p1 = scmp.lt.s32.totalorder %s5477_s21, 3 }
   0x7   : > { %p463_p2 = pnand %p5254_p0, %p462_p1 }
   0x8   : > { %p512_p3 = scmp.lt.s32.totalorder (!%p463_p2), %s5250_s22, 1  ;;  %s7873_s28 = sld [smem:[#allocation2_spill]] (!%p463_p2) }
   0x9   : > { %466 = sbr.rel (%p463_p2) target bundleno = 3929 (0xf59), region = 84  ;;  %s7874_s1 = sld [smem:[#allocation3_spill]] (!%p463_p2) }
   0xa   : > { %s7818_s19 = smov (!%p463_p2), 2   ;;  %s5481_s20 = smov (!%p463_p2), 1  }
   0xb   : > { %s7828_s23 = smov (!%p463_p2), 127   ;;  %s7824_s24 = smov (!%p463_p2), 126  }
   0xc   : > { %s7885_s4 = sld [smem:[#allocation4_spill]] (!%p463_p2)  ;;  %s7781_s26 = smov (!%p463_p2), 16  }
   0xd   : > { %s7830_s27 = smov (!%p463_p2), 112   ;;  %s7834_s30 = smov (!%p463_p2), 96  }
   0xe   : > { %v640_v0 = vld [vmem:[%s7765_s2 + $0x8] sm:$0xff]  ;;  %v5479_v1 = vmov 0   ;;  %s8338_s22 = smov (!%p512_p3, %s5250_s22), 1  ;;  %vm7791_vm0 = vcmask 1043456   ;;  %vm7786_vm1 = vcmask 64512   ;;  %v525_v11 = vlaneseq  ;;  %v723_v53 = vld [vmem:[%s7777_s14] sm:$0xff] }
   0xf   : > { %5468 = vset.pattern.permute.xlu0 %v5479_v1  ;;  %5469 = vset.pattern.permute.xlu1 %v5479_v1  ;;  %s5407_s25 = sshll.u32 %s8338_s22, 3  ;;  %v680_v5 = vld [vmem:[%s7766_s3 + $0x8] sm:$0xff]  ;;  %v5409_v10 = vld [vmem:[%s7874_s1] sm:$0xff]  ;;  %vm7789_vm5 = vcmask 7168   ;;  %v5665_v35 = vunpack.c.l.b16 %v5479_v1  ;;  %v5668_v36 = vunpack.c.h.b16 %v5479_v1  ;;  %vm7792_vm6 = vcmask 15360   ;;  %s5489_s0 = smov 54  }
  0x10   : > { %651 = vperm.xlu0 %5468, %v640_v0   ;;  %5470 = vset.pattern.permute.xlu2 %v5479_v1  ;;  %s516_s29 = scalar_lea.vmem %s7873_s28, %s5407_s25  ;;  %v526_v12 = vand.u32 127, %v525_v11  ;;  %v7875_v43 = vmov 0  ;;  %v7877_v52 = vmov 0  ;;  %v7879_v54 = vmov 0  ;;  %s5487_s28 = smov 6  }
  0x11   : > { %v552_v2 = vld [vmem:[%s516_s29] sm:$0xff]  ;;  %v7881_v0 = vmov 0  ;;  %s7816_s29 = smov 48   ;;  %s5491_s25 = smov 102  }
  0x12   : > { %v572_v3 = vunpack.c.l.b16 %v552_v2  ;;  %v573_v4 = vunpack.c.h.b16 %v552_v2  ;;  %v527_v13 = vadd.s32 128, %v526_v12  ;;  %v5643_v14 = vand.u32 15, %v526_v12  ;;  %s7814_s17 = smov 122   ;;  %s5496_s18 = smov 80  }
  0x14   : > { %v574_v6 = vpack.c.b16 %v572_v3, %v572_v3  ;;  %v575_v7 = vpack.c.b16 %v573_v4, %v573_v4  ;;  %v5649_v18 = vand.u32 15, %v527_v13  ;;  %vm873_vm2 = vcmp.lt.s32.totalorder %v5643_v14, 15 }
  0x15   : > { %v7883_v3 = vmov 0 }
  0x16   : > { %v588_v8 = vsel %vm7791_vm0, %v574_v6, 0  ;;  %v591_v9 = vsel %vm7791_vm0, %v575_v7, 0  ;;  %vm874_vm3 = vcmp.lt.s32.totalorder %v5649_v18, 15 }
  0x17   : > { %600 = vmatpush.bf16.msra.mxu0 %v588_v8  ;;  %623 = vmatpush.bf16.msra.mxu1 %v591_v9  ;;  %vm879_vm4 = vmpackc.low %vm874_vm3, %vm873_vm2  ;;  %vm766_vm2 = vcmp.ge.s32.totalorder %v5643_v14, 1  ;;  %vm767_vm3 = vcmp.ge.s32.totalorder %v5649_v18, 1 }
  0x18   : > { %691 = vperm.xlu0 %5468, %v680_v5   ;;  %v880_v19 = vsel %vm879_vm4, 65537, %v5479_v1  ;;  %vm772_vm4 = vmpackc.low %vm767_vm3, %vm766_vm2  ;;  %vm7785_vm2 = vcmask 1039360   ;;  %vm7784_vm3 = vcmask 1031168  }
  0x19   : > { %v5654_v20 = vperm.slane %v880_v19, 0  ;;  %v5658_v28 = vperm.slane %v880_v19, 4  ;;  %v773_v57 = vsel %vm772_vm4, 65537, %v5479_v1  ;;  %v733_v19 = vld [vmem:[%s7778_s15] sm:$0xff]  ;;  %vm7780_vm4 = vcmask 130048  }
  0x1a   : > { %5267 = vmatmul.msk.bf16.vlgmr.msra.gmra.mxu0 %vm7786_vm1, %v5409_v10  ;;  %5270 = vmatmul.msk.bf16.vlgmr.msra.gmra.mxu1 %vm7786_vm1, %v5409_v10  ;;  %v5710_v58 = vperm.slane %v773_v57, 0  ;;  %v5712_v59 = vperm.slane %v773_v57, 4 }
  0x1b   : > { %883 = vrot.lane.b32.xlu2 %v5654_v20, %s7818_s19 }
  0x1c   : > { %v776_v60 = vunpack.c.l.b16 %v5710_v58  ;;  %v777_v61 = vunpack.c.h.b16 %v5710_v58  ;;  %v783_v62 = vunpack.c.l.b16 %v5712_v59  ;;  %v784_v63 = vunpack.c.h.b16 %v5712_v59 }
  0x23   : > { %885 = vrot.lane.b32.xlu2 %v5658_v28, %s7818_s19 }
  0x75   : > { %v884_v34 = vpop.permute.xlu2 %883 }
  0x76   : > { %v889_v37 = vunpack.c.l.b16 %v884_v34  ;;  %v890_v38 = vunpack.c.h.b16 %v884_v34 }
  0x78   : > { %vm893_vm7 = vcmp.ne.s32.totalorder %v889_v37, %v5665_v35  ;;  %vm894_vm8 = vcmp.ne.s32.totalorder %v890_v38, %v5668_v36 }
  0x79   : > { %vm5675_vm9 = vmpackc.low %vm894_vm8, %vm893_vm7  ;;  %vm780_vm7 = vcmp.ne.s32.totalorder %v776_v60, %v5665_v35  ;;  %vm781_vm8 = vcmp.ne.s32.totalorder %v777_v61, %v5668_v36 }
  0x7a   : > { %v7876_v43 = vsel %vm5675_vm9, 4294967295, %v7875_v43 }
  0x7d   : > { %v886_v41 = vpop.permute.xlu2 %885 }
  0x7e   : > { %v888_v42 = vsel %vm7792_vm6, %v884_v34, %v886_v41  ;;  %v903_v44 = vunpack.c.l.b16 %v886_v41  ;;  %v904_v45 = vunpack.c.h.b16 %v886_v41  ;;  %vm1286_vm6 = vcmask 48128  }
  0x7f   : > { %v896_v46 = vunpack.c.l.b16 %v888_v42  ;;  %v897_v47 = vunpack.c.h.b16 %v888_v42 }
  0x80   : > { %vm907_vm10 = vcmp.ne.s32.totalorder %v903_v44, %v5665_v35  ;;  %vm908_vm11 = vcmp.ne.s32.totalorder %v904_v45, %v5668_v36 }
  0x81   : > { %vm900_vm12 = vcmp.ne.s32.totalorder %v896_v46, %v5665_v35  ;;  %vm901_vm13 = vcmp.ne.s32.totalorder %v897_v47, %v5668_v36  ;;  %vm5690_vm14 = vmpackc.low %vm908_vm11, %vm907_vm10  ;;  %vm787_vm10 = vcmp.ne.s32.totalorder %v783_v62, %v5665_v35  ;;  %vm788_vm11 = vcmp.ne.s32.totalorder %v784_v63, %v5668_v36 }
  0x82   : > { %v652_v15 = vpop.permute.xlu0 %651  ;;  %v7878_v52 = vsel %vm5690_vm14, 4294967295, %v7877_v52  ;;  %vm5697_vm15 = vmpackc.low %vm901_vm13, %vm900_vm12 }
  0x83   : > { %v7880_v54 = vsel %vm5697_vm15, 4294967295, %v7879_v54  ;;  %vm5722_vm12 = vmpackc.low %vm781_vm8, %vm780_vm7  ;;  %vm1272_vm7 = vcmp.lt.s32.totalorder %v5643_v14, 13  ;;  %vm1273_vm8 = vcmp.lt.s32.totalorder %v5649_v18, 13 }
  0x84   : > { %v7882_v0 = vsel %vm5722_vm12, 4294967295, %v7881_v0  ;;  %vm5726_vm13 = vmpackc.low %vm788_vm11, %vm787_vm10  ;;  %vm7783_vm11 = vcmask 916480  }
  0x85   : > { %v7884_v3 = vsel %vm5726_vm13, 4294967295, %v7883_v3  ;;  %vm1278_vm10 = vmpackc.low %vm1273_vm8, %vm1272_vm7  ;;  %vm7793_vm7 = vcmask 785408   ;;  %vm1165_vm8 = vcmp.ge.s32.totalorder %v5643_v14, 3 }
  0x8a   : > { %v692_v25 = vpop.permute.xlu0 %691 }
  0x97   : > { %v5645_v16 = vpop.f32.mrf.mxu0  ;;  %v5647_v17 = vpop.f32.mrf.mxu1 }
  0x9f   : > { %v604_v21 = vpop.f32.mrf.mxu0  ;;  %v627_v22 = vpop.f32.mrf.mxu1 }
  0xa0   : > { %v671_v23 = vmul.f32 %v652_v15, %v604_v21  ;;  %v672_v24 = vmul.f32 %v652_v15, %v627_v22  ;;  %v764_v15 = vld [vmem:[%s7885_s4 + $0x4] sm:$0xf] }
  0xa2   : > { %v711_v26 = vadd.f32 %v692_v25, %v671_v23  ;;  %v712_v27 = vadd.f32 %v692_v25, %v672_v24 }
  0xa4   : > { %v720_v29 = vpack.c.bf16 %v712_v27, %v711_v26 }
  0xa6   : > { %v744_v30 = vunpack.c.l.b16 %v720_v29  ;;  %v745_v32 = vunpack.c.h.b16 %v720_v29  ;;  %v763_v29 = vld [vmem:[%s7885_s4] sm:$0xf] }
  0xa8   : > { %v746_v31 = vpack.c.b16 %v744_v30, %v744_v30  ;;  %v747_v33 = vpack.c.b16 %v745_v32, %v745_v32  ;;  %v765_v30 = vld [vmem:[%s7885_s4 + $0x8] sm:$0xf] }
  0xaa   : > { %748 = vrot.lane.b32.xlu1 %v746_v31, %s5481_s20 }
  0xb2   : > { %750 = vrot.lane.b32.xlu1 %v747_v33, %s5481_s20 }
 0x11c   : > { %v749_v39 = vpop.permute.xlu1 %748 }
 0x11d   : > { %v758_v40 = vsel %vm7789_vm5, 0, %v749_v39 }
 0x11e   : > { %794 = vrot.lane.b32.xlu0 %v758_v40, %s7828_s23  ;;  %v910_v49 = vsel %vm5675_vm9, %v758_v40, 0  ;;  %v790_v6 = vsel %vm5722_vm12, %v758_v40, 0 }
 0x11f   : > { %v842_v12 = vsel %vm7791_vm0, %v790_v6, 0 }
 0x124   : > { %v751_v48 = vpop.permute.xlu1 %750 }
 0x125   : > { %v761_v50 = vsel %vm7789_vm5, %v751_v48, 0  ;;  %v753_v51 = vsel %vm7789_vm5, %v749_v39, %v751_v48 }
 0x126   : > { %916 = vrot.lane.b32.xlu0 %v910_v49, %s7824_s24  ;;  %798 = vrot.lane.b32.xlu2 %v761_v50, %s7828_s23  ;;  %v912_v55 = vsel %vm5690_vm14, %v761_v50, 0  ;;  %v911_v56 = vsel %vm5697_vm15, %v753_v51, 0  ;;  %v791_v7 = vsel %vm5726_vm13, %v753_v51, 0 }
 0x127   : > { %796 = vrot.lane.b32.xlu1 %v753_v51, %s7828_s23  ;;  %v845_v13 = vsel %vm7791_vm0, %v791_v7, 0  ;;  %v5410_v7 = vld [vmem:[%s7874_s1 + $0x8] sm:$0xff] }
 0x128   : > { %5268 = vmatmul.msk.bf16.gmra.mxu0 %vm7786_vm1, %v5410_v7  ;;  %5271 = vmatmul.msk.bf16.gmra.mxu1 %vm7786_vm1, %v5410_v7 }
 0x12e   : > { %964 = vperm.xlu0 %5468, %v723_v53   ;;  %920 = vrot.lane.b32.xlu2 %v912_v55, %s7824_s24 }
 0x12f   : > { %918 = vrot.lane.b32.xlu1 %v911_v56, %s7824_s24 }
 0x137   : > { %971 = vperm.xlu1 %5469, %v733_v19  }
 0x180   : > { %v799_v2 = vpop.permute.xlu2 %798 }
 0x188   : > { %v921_v21 = vpop.permute.xlu2 %920 }
 0x190   : > { %v795_v4 = vpop.permute.xlu0 %794 }
 0x198   : > { %v917_v22 = vpop.permute.xlu0 %916 }
 0x199   : > { %v797_v5 = vpop.permute.xlu1 %796 }
 0x19a   : > { %v801_v8 = vsel %vm7785_vm2, %v795_v4, %v797_v5  ;;  %v802_v9 = vsel %vm7785_vm2, %v797_v5, %v799_v2 }
 0x19b   : > { %v807_v10 = vsel %vm7791_vm0, %v801_v8, 0  ;;  %v810_v11 = vsel %vm7791_vm0, %v802_v9, 0  ;;  %v724_v8 = vld [vmem:[%s7777_s14 + $0x8] sm:$0xff]  ;;  %v557_v9 = vld [vmem:[%s7874_s1 + $0x10] sm:$0xf]  ;;  %s5523_s1 = smov 17  }
 0x19c   : > { %819 = vmatpush.bf16.msra.mxu2 %v807_v10  ;;  %832 = vmatpush.bf16.msra.mxu3 %v810_v11  ;;  %v567_v10 = vunpack.c.l.b16 %v557_v9 }
 0x19e   : > { %v570_v11 = vpack.c.b16 %v567_v10, %v567_v10 }
 0x19f   : > { %5273 = vmatmul.msk.bf16.vlgmr.msra.gmra.mxu2 %vm7786_vm1, %v764_v15  ;;  %5274 = vmatmul.msk.bf16.vlgmr.msra.gmra.mxu3 %vm7786_vm1, %v764_v15 }
 0x1a0   : > { %854 = vmatpush.bf16.msrb.mxu2 %v842_v12  ;;  %867 = vmatpush.bf16.msrb.mxu3 %v845_v13  ;;  %v965_v48 = vpop.permute.xlu0 %964 }
 0x1a1   : > { %v919_v23 = vpop.permute.xlu1 %918  ;;  %5269 = vmatmul.msk.bf16.gmra.mxu0 %vm7786_vm1, %v570_v11  ;;  %5272 = vmatmul.msk.bf16.gmra.mxu1 %vm7786_vm1, %v570_v11 }
 0x1a2   : > { %v923_v24 = vsel %vm7784_vm3, %v917_v22, %v919_v23  ;;  %v924_v25 = vsel %vm7784_vm3, %v919_v23, %v921_v21  ;;  %v1279_v21 = vsel %vm1278_vm10, 65537, %v5479_v1  ;;  %v641_v23 = vld [vmem:[%s7765_s2 + $0x10] sm:$0xff]  ;;  %vm1166_vm10 = vcmp.ge.s32.totalorder %v5649_v18, 3 }
 0x1a3   : > { %v929_v26 = vsel %vm7791_vm0, %v923_v24, 0  ;;  %v932_v27 = vsel %vm7791_vm0, %v924_v25, 0  ;;  %v5791_v22 = vperm.slane %v1279_v21, 4  ;;  %v993_v24 = vld [vmem:[%s7768_s5] sm:$0xf]  ;;  %vm1146_vm3 = vcmask 416768  }
 0x1a4   : > { %941 = vmatpush.bf16.msra.mxu2 %v929_v26  ;;  %954 = vmatpush.bf16.msra.mxu3 %v932_v27 }
 0x1a9   : > { %v972_v49 = vpop.permute.xlu1 %971 }
 0x1af   : > { %5275 = vmatmul.msk.bf16.vlgmr.msrb.gmra.mxu2 %vm7786_vm1, %v763_v29  ;;  %5276 = vmatmul.msk.bf16.vlgmr.msrb.gmra.mxu3 %vm7786_vm1, %v763_v29 }
 0x1bf   : > { %5277 = vmatmul.msk.bf16.vlgmr.msra.gmra.mxu2 %vm7786_vm1, %v765_v30  ;;  %5278 = vmatmul.msk.bf16.vlgmr.msra.gmra.mxu3 %vm7786_vm1, %v765_v30  ;;  %v994_v30 = vld [vmem:[%s7768_s5 + $0x4] sm:$0xf] }
 0x222   : > { %v821_v31 = vpop.f32.mrf.mxu2  ;;  %v834_v32 = vpop.f32.mrf.mxu3 }
 0x22a   : > { %v823_v33 = vpop.f32.mrf.mxu2  ;;  %v836_v34 = vpop.f32.mrf.mxu3 }
 0x232   : > { %v856_v37 = vpop.f32.mrf.mxu2  ;;  %v869_v38 = vpop.f32.mrf.mxu3 }
 0x233   : > { %v857_v41 = vadd.f32 %v856_v37, %v821_v31  ;;  %v870_v42 = vadd.f32 %v869_v38, %v834_v32  ;;  %v5811_v37 = vpop.f32.mrf.mxu0  ;;  %v734_v38 = vld [vmem:[%s7778_s15 + $0x8] sm:$0xff] }
 0x23a   : > { %v858_v39 = vpop.f32.mrf.mxu2  ;;  %v871_v40 = vpop.f32.mrf.mxu3 }
 0x23b   : > { %v995_v39 = vld [vmem:[%s7768_s5 + $0x8] sm:$0xf] }
 0x242   : > { %v943_v44 = vpop.f32.mrf.mxu2  ;;  %v956_v45 = vpop.f32.mrf.mxu3 }
 0x243   : > { %v960_v46 = vadd.f32 %v943_v44, %v857_v41  ;;  %v961_v47 = vadd.f32 %v956_v45, %v870_v42  ;;  %v5820_v41 = vpop.f32.mrf.mxu0 }
 0x245   : > { %v967_v50 = vmul.f32 %v965_v48, %v960_v46  ;;  %v968_v51 = vmul.f32 %v965_v48, %v961_v47 }
 0x247   : > { %v974_v53 = vadd.f32 %v972_v49, %v967_v50  ;;  %v975_v55 = vadd.f32 %v972_v49, %v968_v51  ;;  %v5830_v50 = vpop.f32.mrf.mxu1 }
 0x249   : > { %v976_v56 = vpack.c.bf16 %v975_v55, %v974_v53 }
 0x24a   : > { %v945_v57 = vpop.f32.mrf.mxu2  ;;  %v958_v60 = vpop.f32.mrf.mxu3 }
 0x24b   : > { %v979_v61 = vunpack.c.h.b16 %v976_v56  ;;  %v978_v62 = vunpack.c.l.b16 %v976_v56  ;;  %v5825_v46 = vpop.f32.mrf.mxu0 }
 0x24d   : > { %v981_v63 = vpack.c.b16 %v979_v61, %v979_v61  ;;  %v980_v2 = vpack.c.b16 %v978_v62, %v978_v62 }
 0x24f   : > { %984 = vrot.lane.b32.xlu0 %v981_v63, %s7781_s26  ;;  %982 = vrot.lane.b32.xlu2 %v980_v2, %s7781_s26  ;;  %v5832_v51 = vpop.f32.mrf.mxu1  ;;  %s5492_s26 = smov 3  }
 0x253   : > { %v614_v49 = vpop.f32.mrf.mxu0 }
 0x254   : > { %v7886_v49 = vmov 0 }
 0x257   : > { %v5834_v53 = vpop.f32.mrf.mxu1 }
 0x25f   : > { %v637_v55 = vpop.f32.mrf.mxu1 }
 0x260   : > { %v7890_v55 = vmov 0 }
 0x2a9   : > { %v983_v4 = vpop.permute.xlu2 %982 }
 0x2aa   : > { %v990_v5 = vsel %vm7780_vm4, 0, %v983_v4 }
 0x2ab   : > { %998 = vrot.lane.b32.xlu1 %v990_v5, %s7830_s27  ;;  %v1045_v6 = vsel %vm7791_vm0, %v990_v5, 0 }
 0x2ac   : > { %1057 = vmatpush.bf16.msrb.mxu2 %v1045_v6 }
 0x2af   : > { %5281 = vmatmul.msk.bf16.vlgmr.msrb.gmra.mxu2 %vm7786_vm1, %v993_v24 }
 0x2b3   : > { %1076 = vrot.lane.b32.xlu1 %v990_v5, %s7834_s30  ;;  %v1280_v5 = vperm.slane %v1279_v21, 0 }
 0x2bb   : > { %1124 = vperm.xlu1 %5469, %v724_v8  }
 0x2c1   : > { %v985_v12 = vpop.permute.xlu0 %984 }
 0x2c2   : > { %v992_v13 = vsel %vm7780_vm4, %v985_v12, 0  ;;  %v987_v15 = vsel %vm7780_vm4, %v983_v4, %v985_v12  ;;  %vm1171_vm4 = vmpackc.low %vm1166_vm10, %vm1165_vm8 }
 0x2c3   : > { %1002 = vrot.lane.b32.xlu0 %v992_v13, %s7830_s27  ;;  %1000 = vrot.lane.b32.xlu2 %v987_v15, %s7830_s27  ;;  %v1048_v19 = vsel %vm7791_vm0, %v987_v15, 0  ;;  %v1172_v2 = vsel %vm1171_vm4, 65537, %v5479_v1 }
 0x2c4   : > { %1070 = vmatpush.bf16.msrb.mxu3 %v1048_v19  ;;  %v1173_v4 = vperm.slane %v1172_v2, 0  ;;  %v1174_v7 = vperm.slane %v1172_v2, 4 }
 0x2c6   : > { %1361 = vrot.lane.b32.xlu1 %v1173_v4, %s7816_s29 }
 0x2c7   : > { %5282 = vmatmul.msk.bf16.vlgmr.msrb.gmra.mxu3 %vm7786_vm1, %v993_v24 }
 0x2cb   : > { %1080 = vrot.lane.b32.xlu0 %v992_v13, %s7834_s30  ;;  %1078 = vrot.lane.b32.xlu2 %v987_v15, %s7834_s30 }
 0x2d3   : > { %1284 = vrot.lane.b32.xlu0 %v5791_v22, %s5487_s28  ;;  %1131 = vperm.xlu2 %5470, %v734_v38   ;;  %v681_v38 = vld [vmem:[%s7766_s3 + $0x10] sm:$0xff] }
 0x2db   : > { %656 = vperm.xlu0 %5468, %v641_v23   ;;  %1282 = vrot.lane.b32.xlu2 %v1280_v5, %s5487_s28  ;;  %s5490_s28 = smov 51  }
 0x2e3   : > { %1363 = vrot.lane.b32.xlu2 %v1174_v7, %s7816_s29  ;;  %s5500_s29 = smov 4  }
 0x2eb   : > { %1486 = vrot.lane.b32.xlu2 %v1280_v5, %s5489_s0 }
 0x2f3   : > { %1567 = vrot.lane.b32.xlu2 %v1174_v7, %s7834_s30 }
 0x2fb   : > { %1832 = vrot.lane.b32.xlu2 %v5710_v58, %s5481_s20 }
 0x31d   : > { %v999_v25 = vpop.permute.xlu1 %998  ;;  %v1001_v26 = vpop.permute.xlu2 %1000 }
 0x31e   : > { %v1005_v27 = vsel %vm7783_vm11, %v999_v25, %v1001_v26 }
 0x31f   : > { %v1011_v29 = vsel %vm7791_vm0, %v1005_v27, 0 }
 0x320   : > { %1023 = vmatpush.bf16.msrb.mxu0 %v1011_v29 }
 0x323   : > { %5279 = vmatmul.msk.bf16.vlgmr.msrb.gmra.mxu0 %vm7786_vm1, %v994_v30 }
 0x325   : > { %v1077_v31 = vpop.permute.xlu1 %1076  ;;  %v1079_v32 = vpop.permute.xlu2 %1078 }
 0x326   : > { %v1083_v33 = vsel %vm7793_vm7, %v1077_v31, %v1079_v32 }
 0x327   : > { %v1089_v34 = vsel %vm7791_vm0, %v1083_v33, 0 }
 0x328   : > { %1101 = vmatpush.bf16.msra.mxu0 %v1089_v34 }
 0x32d   : > { %v1125_v15 = vpop.permute.xlu1 %1124  ;;  %v1132_v24 = vpop.permute.xlu2 %1131 }
 0x332   : > { %v1059_v56 = vpop.f32.mrf.mxu2 }
 0x333   : > { %5283 = vmatmul.msk.bf16.vlgmr.msra.gmra.mxu0 %vm7786_vm1, %v995_v39 }
 0x335   : > { %v1003_v40 = vpop.permute.xlu0 %1002 }
 0x336   : > { %v1006_v42 = vsel %vm7783_vm11, %v1001_v26, %v1003_v40 }
 0x337   : > { %v1014_v44 = vsel %vm7791_vm0, %v1006_v42, 0  ;;  %v1175_v42 = vunpack.c.l.b16 %v1173_v4 }
 0x338   : > { %1036 = vmatpush.bf16.msrb.mxu1 %v1014_v44  ;;  %v5857_v40 = vpop.permute.xlu1 %1361  ;;  %v1176_v44 = vunpack.c.h.b16 %v1173_v4 }
 0x339   : > { %vm5860_vm4 = vcmp.ne.s32.totalorder %v1175_v42, %v5665_v35 }
 0x33a   : > { %v1061_v57 = vpop.f32.mrf.mxu2  ;;  %v7887_v49 = vsel %vm5860_vm4, 4294967295, %v7886_v49  ;;  %vm5865_vm8 = vcmp.ne.s32.totalorder %v1176_v44, %v5668_v36 }
 0x33b   : > { %5280 = vmatmul.msk.bf16.vlgmr.msrb.gmra.mxu1 %vm7786_vm1, %v994_v30  ;;  %vm7788_vm2 = vmpackc.low %vm5865_vm8, %vm5860_vm4  ;;  %vm2068_vm4 = vcmp.lt.s32.totalorder %v5649_v18, 14 }
 0x33d   : > { %v1081_v45 = vpop.permute.xlu0 %1080 }
 0x33e   : > { %v1084_v47 = vsel %vm7793_vm7, %v1079_v32, %v1081_v45 }
 0x33f   : > { %v1092_v48 = vsel %vm7791_vm0, %v1084_v47, 0  ;;  %v1182_v47 = vunpack.c.l.b16 %v1174_v7 }
 0x340   : > { %1114 = vmatpush.bf16.msra.mxu1 %v1092_v48  ;;  %v1183_v48 = vunpack.c.h.b16 %v1174_v7 }
 0x341   : > { %vm5870_vm10 = vcmp.ne.s32.totalorder %v1182_v47, %v5665_v35 }
 0x342   : > { %v7891_v55 = vsel %vm5870_vm10, 4294967295, %v7890_v55  ;;  %vm5875_vm11 = vcmp.ne.s32.totalorder %v1183_v48, %v5668_v36 }
 0x34a   : > { %v1072_v60 = vpop.f32.mrf.mxu3 }
 0x34b   : > { %5284 = vmatmul.msk.bf16.vlgmr.msra.gmra.mxu1 %vm7786_vm1, %v995_v39  ;;  %v5855_v39 = vpop.permute.xlu0 %1284  ;;  %vm7787_vm1 = vmpackc.low %vm5875_vm11, %vm5870_vm10 }
 0x352   : > { %v1074_v62 = vpop.f32.mrf.mxu3 }
 0x353   : > { %v657_v45 = vpop.permute.xlu0 %656 }
 0x3a0   : > { %v1025_v61 = vpop.f32.mrf.mxu0 }
 0x3a1   : > { %v1060_v11 = vadd.f32 %v1059_v56, %v1025_v61  ;;  %v7892_v56 = vmov 0 }
 0x3a2   : > { %v7893_v56 = vsel %vm5875_vm11, 4294967295, %v7892_v56  ;;  %vm2067_vm11 = vcmp.lt.s32.totalorder %v5643_v14, 14 }
 0x3a8   : > { %v1027_v63 = vpop.f32.mrf.mxu0 }
 0x3b0   : > { %v1103_v6 = vpop.f32.mrf.mxu0 }
 0x3b1   : > { %v1120_v12 = vadd.f32 %v1103_v6, %v1060_v11 }
 0x3b3   : > { %v1127_v23 = vmul.f32 %v1125_v15, %v1120_v12 }
 0x3b5   : > { %v1134_v26 = vadd.f32 %v1132_v24, %v1127_v23  ;;  %v7894_v23 = vmov 0 }
 0x3b8   : > { %v1038_v8 = vpop.f32.mrf.mxu1  ;;  %v1105_v9 = vpop.f32.mrf.mxu0 }
 0x3b9   : > { %v1073_v13 = vadd.f32 %v1072_v60, %v1038_v8  ;;  %v674_v8 = vmul.f32 %v657_v45, %v5830_v50  ;;  %v673_v9 = vmul.f32 %v657_v45, %v5811_v37  ;;  %v3069_v50 = vld [vmem:[%s7773_s10 + $0x10] sm:$0xf] }
 0x3c0   : > { %v1040_v10 = vpop.f32.mrf.mxu1 }
 0x3c8   : > { %v1116_v19 = vpop.f32.mrf.mxu1 }
 0x3c9   : > { %v1121_v21 = vadd.f32 %v1116_v19, %v1073_v13 }
 0x3cb   : > { %v1128_v25 = vmul.f32 %v1125_v15, %v1121_v21 }
 0x3cd   : > { %v1135_v27 = vadd.f32 %v1132_v24, %v1128_v25 }
 0x3cf   : > { %v1136_v29 = vpack.c.bf16 %v1135_v27, %v1134_v26 }
 0x3d0   : > { %v1118_v30 = vpop.f32.mrf.mxu1 }
 0x3d1   : > { %v1139_v31 = vunpack.c.h.b16 %v1136_v29  ;;  %v1138_v32 = vunpack.c.l.b16 %v1136_v29 }
 0x3d3   : > { %v1141_v33 = vpack.c.b16 %v1139_v31, %v1139_v31  ;;  %v1140_v34 = vpack.c.b16 %v1138_v32, %v1138_v32 }
 0x3d5   : > { %1144 = vrot.lane.b32.xlu1 %v1141_v33, %s5490_s28  ;;  %1142 = vrot.lane.b32.xlu0 %v1140_v34, %s5490_s28  ;;  %s5494_s28 = smov 77   ;;  %v1302_v34 = vunpack.c.l.b16 %v5855_v39 }
 0x3dd   : > { %696 = vperm.xlu1 %5469, %v681_v38   ;;  %1488 = vrot.lane.b32.xlu0 %v5791_v22, %s5489_s0  ;;  %s7822_s0 = smov 125   ;;  %v1303_v38 = vunpack.c.h.b16 %v5855_v39 }
 0x3e5   : > { %1565 = vrot.lane.b32.xlu1 %v1173_v4, %s7834_s30  ;;  %1689 = vrot.lane.b32.xlu0 %v1280_v5, %s5491_s25  ;;  %v1283_v5 = vpop.permute.xlu2 %1282 }
 0x3e6   : > { %v1288_v10 = vunpack.c.l.b16 %v1283_v5  ;;  %v1289_v11 = vunpack.c.h.b16 %v1283_v5  ;;  %v1287_v33 = vsel %vm1286_vm6, %v1283_v5, %v5855_v39  ;;  %vm5959_vm6 = vcmp.ne.s32.totalorder %v1303_v38, %v5668_v36 }
 0x3e7   : > { %v1295_v44 = vunpack.c.l.b16 %v1287_v33  ;;  %v1296_v45 = vunpack.c.h.b16 %v1287_v33  ;;  %v7902_v39 = vmov 0 }
 0x3ed   : > { %1691 = vrot.lane.b32.xlu1 %v5791_v22, %s5491_s25  ;;  %1834 = vrot.lane.b32.xlu0 %v5712_v59, %s5481_s20  ;;  %v7888_v22 = vmov 0  ;;  %v1364_v37 = vpop.permute.xlu2 %1363  ;;  %s5497_s25 = smov 29  }
 0x3ee   : > { %v7889_v22 = vsel %vm5865_vm8, 4294967295, %v7888_v22 }
 0x3f5   : > { %1989 = vrot.lane.b32.xlu0 %v5654_v20, %s5492_s26  ;;  %v1487_v42 = vpop.permute.xlu2 %1486 }
 0x3f6   : > { %v1492_v47 = vunpack.c.l.b16 %v1487_v42  ;;  %v1493_v48 = vunpack.c.h.b16 %v1487_v42 }
 0x3f8   : > { %vm5981_vm13 = vcmp.ne.s32.totalorder %v1493_v48, %v5668_v36 }
 0x3fd   : > { %v1568_v48 = vpop.permute.xlu2 %1567 }
 0x3fe   : > { %v1584_v5 = vunpack.c.l.b16 %v1568_v48 }
 0x447   : > { %v1145_v57 = vpop.permute.xlu1 %1144  ;;  %v1143_v60 = vpop.permute.xlu0 %1142 }
 0x448   : > { %v5887_v61 = vsel %vm1146_vm3, %v1145_v57, 0  ;;  %v5889_v62 = vsel %vm1146_vm3, %v1143_v60, %v1145_v57  ;;  %v5891_v63 = vsel %vm1146_vm3, 0, %v1143_v60  ;;  %vm7790_vm3 = vcmask 392192  }
 0x449   : > { %1197 = vrot.lane.b32.xlu0 %v5887_v61, %s7822_s0  ;;  %v1189_v2 = vsel %vm7788_vm2, %v5891_v63, 0  ;;  %v1190_v4 = vsel %vm7787_vm1, %v5889_v62, 0  ;;  %vm5914_vm1 = vcmp.ne.s32.totalorder %v1288_v10, %v5665_v35  ;;  %vm5919_vm2 = vcmp.ne.s32.totalorder %v1289_v11, %v5668_v36 }
 0x44a   : > { %v1241_v6 = vsel %vm7791_vm0, %v1189_v2, 0  ;;  %v1244_v7 = vsel %vm7791_vm0, %v1190_v4, 0  ;;  %v7895_v23 = vsel %vm5914_vm1, 4294967295, %v7894_v23  ;;  %v1366_v25 = vsel %vm7790_vm3, %v5857_v40, %v1364_v37  ;;  %vm7794_vm5 = vmpackc.low %vm5919_vm2, %vm5914_vm1 }
 0x44b   : > { %1253 = vmatpush.bf16.msrb.mxu0 %v1241_v6  ;;  %1266 = vmatpush.bf16.msrb.mxu1 %v1244_v7  ;;  %v1309_v29 = vsel %vm7794_vm5, %v5891_v63, 0  ;;  %v1374_v30 = vunpack.c.l.b16 %v1366_v25  ;;  %v1375_v31 = vunpack.c.h.b16 %v1366_v25  ;;  %v7904_v2 = vmov 0  ;;  %vm2073_vm1 = vmpackc.low %vm2068_vm4, %vm2067_vm11 }
 0x44c   : > { %vm5976_vm5 = vcmp.ne.s32.totalorder %v1492_v47, %v5665_v35  ;;  %v1381_v7 = vunpack.c.l.b16 %v1364_v37  ;;  %vm7918_vm11 = vcmask 785408  }
 0x44d   : > { %vm1378_vm3 = vcmp.ne.s32.totalorder %v1374_v30, %v5665_v35  ;;  %vm1379_vm0 = vcmp.ne.s32.totalorder %v1375_v31, %v5668_v36  ;;  %vm1498_vm9 = vmpackc.low %vm5981_vm13, %vm5976_vm5 }
 0x44e   : > { %vm1380_vm7 = vmpackc.low %vm1379_vm0, %vm1378_vm3  ;;  %vm5954_vm0 = vcmp.ne.s32.totalorder %v1302_v34, %v5665_v35  ;;  %vm5971_vm3 = vcmp.ne.s32.totalorder %v1296_v45, %v5668_v36  ;;  %vm1385_vm5 = vcmp.ne.s32.totalorder %v1381_v7, %v5665_v35  ;;  %v1585_v7 = vunpack.c.h.b16 %v1568_v48 }
 0x44f   : > { %v697_v12 = vpop.permute.xlu1 %696  ;;  %v1389_v32 = vsel %vm1380_vm7, %v5889_v62, 0  ;;  %vm5966_vm7 = vcmp.ne.s32.totalorder %v1295_v44, %v5665_v35  ;;  %v7905_v2 = vsel %vm5971_vm3, 4294967295, %v7904_v2  ;;  %vm7803_vm12 = vmpackc.low %vm5959_vm6, %vm5954_vm0 }
 0x450   : > { %v713_v13 = vadd.f32 %v697_v12, %v673_v9  ;;  %v714_v15 = vadd.f32 %v697_v12, %v674_v8  ;;  %v7903_v39 = vsel %vm5966_vm7, 4294967295, %v7902_v39  ;;  %vm7804_vm14 = vmpackc.low %vm5971_vm3, %vm5966_vm7  ;;  %v1382_v8 = vunpack.c.h.b16 %v1364_v37 }
 0x451   : > { %1440 = vrot.lane.b32.xlu0 %v5891_v63, %s5494_s28  ;;  %v1311_v11 = vsel %vm7803_vm12, %v5887_v61, 0  ;;  %v1310_v12 = vsel %vm7804_vm14, %v5889_v62, 0  ;;  %vm1490_vm3 = vcmask 441344  }
 0x452   : > { %v721_v19 = vpack.c.bf16 %v714_v15, %v713_v13  ;;  %v1367_v13 = vunpack.c.l.b16 %v5857_v40  ;;  %v1368_v15 = vunpack.c.h.b16 %v5857_v40  ;;  %vm1386_vm13 = vcmp.ne.s32.totalorder %v1382_v8, %v5668_v36 }
 0x453   : > { %vm1387_vm10 = vmpackc.low %vm1386_vm13, %vm1385_vm5  ;;  %vm1588_vm5 = vcmp.ne.s32.totalorder %v1584_v5, %v5665_v35  ;;  %vm1589_vm13 = vcmp.ne.s32.totalorder %v1585_v7, %v5668_v36 }
 0x454   : > { %v1785_v21 = vunpack.c.h.b16 %v721_v19  ;;  %v1784_v24 = vunpack.c.l.b16 %v721_v19  ;;  %v1513_v19 = vsel %vm1498_vm9, %v5891_v63, 0  ;;  %vm1371_vm15 = vcmp.ne.s32.totalorder %v1367_v13, %v5665_v35 }
 0x455   : > { %vm1372_vm9 = vcmp.ne.s32.totalorder %v1368_v15, %v5668_v36  ;;  %v1390_v25 = vsel %vm1387_vm10, %v5887_v61, 0 }
 0x456   : > { %v1787_v26 = vpack.c.b16 %v1785_v21, %v1785_v21  ;;  %v1786_v27 = vpack.c.b16 %v1784_v24, %v1784_v24  ;;  %vm1373_vm7 = vmpackc.low %vm1372_vm9, %vm1371_vm15  ;;  %v1489_v21 = vpop.permute.xlu0 %1488 }
 0x457   : > { %v1566_v6 = vpop.permute.xlu1 %1565  ;;  %v1388_v24 = vsel %vm1373_vm7, %v5891_v63, 0  ;;  %v1506_v31 = vunpack.c.l.b16 %v1489_v21 }
 0x458   : > { %1790 = vrot.lane.b32.xlu2 %v1787_v26, %s7818_s19  ;;  %1788 = vrot.lane.b32.xlu1 %v1786_v27, %s7818_s19  ;;  %v1570_v9 = vunpack.c.l.b16 %v1566_v6  ;;  %v1571_v10 = vunpack.c.h.b16 %v1566_v6  ;;  %v1491_v27 = vsel %vm1490_vm3, %v1487_v42, %v1489_v21  ;;  %v1569_v4 = vsel %vm7918_vm11, %v1566_v6, %v1568_v48  ;;  %s5501_s19 = smov 26   ;;  %v1157_v48 = vld [vmem:[%s7769_s6 + $0x4] sm:$0xf] }
 0x459   : > { %1315 = vrot.lane.b32.xlu0 %v1309_v29, %s7814_s17  ;;  %v6042_v29 = vsel %vm2073_vm1, 65537, %v5479_v1  ;;  %v1499_v34 = vunpack.c.l.b16 %v1491_v27  ;;  %v1500_v38 = vunpack.c.h.b16 %v1491_v27  ;;  %v1577_v8 = vunpack.c.l.b16 %v1569_v4 }
 0x45a   : > { %vm6018_vm12 = vcmp.ne.s32.totalorder %v1570_v9, %v5665_v35  ;;  %vm6023_vm14 = vcmp.ne.s32.totalorder %v1571_v10, %v5668_v36  ;;  %v7836_v33 = vperm.slane %v6042_v29, 4  ;;  %v1578_v9 = vunpack.c.h.b16 %v1569_v4 }
 0x45b   : > { %vm1576_vm8 = vmpackc.low %vm6023_vm14, %vm6018_vm12  ;;  %vm6050_vm14 = vcmp.ne.s32.totalorder %v1506_v31, %v5665_v35  ;;  %vm1503_vm15 = vcmp.ne.s32.totalorder %v1499_v34, %v5665_v35  ;;  %vm1504_vm12 = vcmp.ne.s32.totalorder %v1500_v38, %v5668_v36  ;;  %vm1581_vm9 = vcmp.ne.s32.totalorder %v1577_v8, %v5665_v35  ;;  %v1833_v31 = vpop.permute.xlu2 %1832 }
 0x45c   : > { %v1591_v26 = vsel %vm1576_vm8, %v5891_v63, 0  ;;  %vm1505_vm7 = vmpackc.low %vm1504_vm12, %vm1503_vm15  ;;  %vm1693_vm12 = vcmask 834560   ;;  %v7837_v37 = vperm.slane %v6042_v29, 0  ;;  %v1837_v8 = vunpack.c.l.b16 %v1833_v31 }
 0x45e   : > { %v1690_v15 = vpop.permute.xlu0 %1689 }
 0x45f   : > { %v1692_v30 = vpop.permute.xlu1 %1691  ;;  %v1695_v40 = vunpack.c.l.b16 %v1690_v15 }
 0x460   : > { %1193 = vrot.lane.b32.xlu1 %v5891_v63, %s7822_s0  ;;  %1195 = vrot.lane.b32.xlu2 %v5889_v62, %s7822_s0  ;;  %v1709_v44 = vunpack.c.l.b16 %v1692_v30  ;;  %v1710_v45 = vunpack.c.h.b16 %v1692_v30 }
 0x461   : > { %1396 = vrot.lane.b32.xlu0 %v1389_v32, %s5496_s18  ;;  %v1507_v32 = vunpack.c.h.b16 %v1489_v21  ;;  %v1696_v21 = vunpack.c.h.b16 %v1690_v15  ;;  %vm1699_vm11 = vcmp.ne.s32.totalorder %v1695_v40, %v5665_v35 }
 0x462   : > { %vm1713_vm4 = vcmp.ne.s32.totalorder %v1709_v44, %v5665_v35  ;;  %vm1714_vm8 = vcmp.ne.s32.totalorder %v1710_v45, %v5668_v36 }
 0x463   : > { %vm6055_vm1 = vcmp.ne.s32.totalorder %v1507_v32, %v5668_v36  ;;  %vm1715_vm3 = vmpackc.low %vm1714_vm8, %vm1713_vm4  ;;  %vm1700_vm4 = vcmp.ne.s32.totalorder %v1696_v21, %v5668_v36 }
 0x464   : > { %vm1512_vm10 = vmpackc.low %vm6055_vm1, %vm6050_vm14  ;;  %v1718_v6 = vsel %vm1715_vm3, %v5887_v61, 0  ;;  %vm1582_vm14 = vcmp.ne.s32.totalorder %v1578_v9, %v5668_v36  ;;  %v1838_v9 = vunpack.c.h.b16 %v1833_v31 }
 0x465   : > { %v1515_v10 = vsel %vm1512_vm10, %v5887_v61, 0  ;;  %vm1590_vm1 = vmpackc.low %vm1589_vm13, %vm1588_vm5 }
 0x466   : > { %vm1583_vm15 = vmpackc.low %vm1582_vm14, %vm1581_vm9  ;;  %vm7919_vm14 = vcmask 15360  }
 0x467   : > { %v1592_v13 = vsel %vm1583_vm15, %v5889_v62, 0  ;;  %vm7920_vm15 = vcmask 1043456  }
 0x468   : > { %1442 = vrot.lane.b32.xlu1 %v5889_v62, %s5494_s28  ;;  %1444 = vrot.lane.b32.xlu2 %v5887_v61, %s5494_s28  ;;  %s5498_s28 = smov 74  }
 0x469   : > { %1645 = vrot.lane.b32.xlu0 %v5889_v62, %s5497_s25 }
 0x470   : > { %1319 = vrot.lane.b32.xlu2 %v1311_v11, %s7814_s17  ;;  %1317 = vrot.lane.b32.xlu1 %v1310_v12, %s7814_s17  ;;  %s7841_s17 = smov 32   ;;  %v1514_v11 = vsel %vm1505_vm7, %v5889_v62, 0  ;;  %v1593_v12 = vsel %vm1590_vm1, %v5887_v61, 0  ;;  %vm1701_vm7 = vmpackc.low %vm1700_vm4, %vm1699_vm11  ;;  %vm7840_vm1 = vcmask 1022976   ;;  %vm7922_vm11 = vcmask 64512  }
 0x471   : > { %1519 = vrot.lane.b32.xlu0 %v1513_v19, %s5498_s28  ;;  %v1694_v19 = vsel %vm1693_vm12, %v1690_v15, %v1692_v30  ;;  %v1835_v30 = vpop.permute.xlu0 %1834  ;;  %vm7921_vm12 = vcmask 7168   ;;  %vm1841_vm4 = vcmp.ne.s32.totalorder %v1837_v8, %v5665_v35 }
 0x472   : > { %v1851_v32 = vunpack.c.l.b16 %v1835_v30  ;;  %v1836_v4 = vsel %vm7921_vm12, %v1833_v31, %v1835_v30  ;;  %vm7839_vm12 = vcmask 654336  }
 0x474   : > { %vm1855_vm5 = vcmp.ne.s32.totalorder %v1851_v32, %v5665_v35 }
 0x478   : > { %1394 = vrot.lane.b32.xlu2 %v1388_v24, %s5496_s18  ;;  %1398 = vrot.lane.b32.xlu1 %v1390_v25, %s5496_s18  ;;  %v1702_v24 = vunpack.c.l.b16 %v1694_v19  ;;  %v1703_v25 = vunpack.c.h.b16 %v1694_v19 }
 0x479   : > { %1597 = vrot.lane.b32.xlu0 %v1591_v26, %s7841_s17  ;;  %v1716_v26 = vsel %vm1701_vm7, %v5891_v63, 0  ;;  %v6098_v34 = vpop.permute.xlu0 %1989 }
 0x47a   : > { %vm1706_vm8 = vcmp.ne.s32.totalorder %v1702_v24, %v5665_v35  ;;  %vm1707_vm10 = vcmp.ne.s32.totalorder %v1703_v25, %v5668_v36  ;;  %v1156_v24 = vld [vmem:[%s7769_s6] sm:$0xf] }
 0x47b   : > { %vm1708_vm3 = vmpackc.low %vm1707_vm10, %vm1706_vm8  ;;  %vm1842_vm8 = vcmp.ne.s32.totalorder %v1838_v9, %v5668_v36 }
 0x47c   : > { %v1717_v27 = vsel %vm1708_vm3, %v5889_v62, 0  ;;  %vm1843_vm3 = vmpackc.low %vm1842_vm8, %vm1841_vm4 }
 0x480   : > { %1643 = vrot.lane.b32.xlu2 %v5891_v63, %s5497_s25  ;;  %1991 = vrot.lane.b32.xlu1 %v5658_v28, %s5492_s26 }
 0x481   : > { %2079 = vrot.lane.b32.xlu0 %v7836_v33, %s5500_s29 }
 0x488   : > { %1523 = vrot.lane.b32.xlu2 %v1515_v10, %s5498_s28  ;;  %1521 = vrot.lane.b32.xlu1 %v1514_v11, %s5498_s28  ;;  %v1844_v10 = vunpack.c.l.b16 %v1836_v4  ;;  %v1845_v11 = vunpack.c.h.b16 %v1836_v4  ;;  %v1159_v4 = vld [vmem:[%s7769_s6 + $0xc] sm:$0xf]  ;;  %s7832_s28 = smov 64  }
 0x489   : > { %1726 = vrot.lane.b32.xlu0 %v1718_v6, %s5501_s19 }
 0x48a   : > { %vm1848_vm10 = vcmp.ne.s32.totalorder %v1844_v10, %v5665_v35  ;;  %vm1849_vm7 = vcmp.ne.s32.totalorder %v1845_v11, %v5668_v36 }
 0x490   : > { %1601 = vrot.lane.b32.xlu2 %v1593_v12, %s7841_s17  ;;  %1599 = vrot.lane.b32.xlu1 %v1592_v13, %s7841_s17 }
 0x498   : > { %2077 = vrot.lane.b32.xlu2 %v7837_v37, %s5500_s29  ;;  %1647 = vrot.lane.b32.xlu1 %v5887_v61, %s5497_s25  ;;  %v1852_v61 = vunpack.c.h.b16 %v1835_v30  ;;  %s7826_s25 = smov 124  }
 0x49a   : > { %vm1856_vm13 = vcmp.ne.s32.totalorder %v1852_v61, %v5668_v36  ;;  %v1995_v61 = vunpack.c.l.b16 %v6098_v34 }
 0x49b   : > { %vm1857_vm9 = vmpackc.low %vm1856_vm13, %vm1855_vm5 }
 0x49c   : > { %vm7923_vm5 = vmmov %vm7919_vm14  ;;  %vm1999_vm8 = vcmp.ne.s32.totalorder %v1995_v61, %v5665_v35 }
 0x49d   : > { %vm7924_vm13 = vmmov %vm7923_vm5 }
 0x4a0   : > { %1722 = vrot.lane.b32.xlu1 %v1716_v26, %s5501_s19  ;;  %1724 = vrot.lane.b32.xlu2 %v1717_v27, %s5501_s19  ;;  %s5511_s19 = smov 38  }
 0x4b2   : > { %v1791_v38 = vpop.permute.xlu2 %1790 }
 0x4b3   : > { %v6101_v44 = vsel %vm7919_vm14, %v1791_v38, 0  ;;  %vm7925_vm14 = vmmov %vm7922_vm11 }
 0x4b4   : > { %v1860_v63 = vsel %vm1857_vm9, %v6101_v44, 0  ;;  %vm1850_vm9 = vmpackc.low %vm1849_vm7, %vm1848_vm10  ;;  %5287 = vmatmul.msk.bf16.vlgmr.msrb.gmra.mxu0 %vm7925_vm14, %v1156_v24 }
 0x4b5   : > { %1868 = vrot.lane.b32.xlu0 %v1860_v63, %s7828_s23  ;;  %vm7929_vm7 = vmmov %vm7925_vm14 }
 0x4ba   : > { %v1196_v62 = vpop.permute.xlu2 %1195 }
 0x4bb   : > { %v1198_v45 = vpop.permute.xlu0 %1197 }
 0x4bc   : > { %v1201_v42 = vsel %vm7840_vm1, %v1196_v62, %v1198_v45 }
 0x4bd   : > { %v1209_v47 = vsel %vm7920_vm15, %v1201_v42, 0  ;;  %1948 = vrot.lane.b32.xlu0 %v6101_v44, %s7824_s24  ;;  %vm7926_vm15 = vmmov %vm7922_vm11 }
 0x4be   : > { %1231 = vmatpush.bf16.msra.mxu3 %v1209_v47  ;;  %5288 = vmatmul.msk.bf16.vlgmr.msrb.gmra.mxu1 %vm7926_vm15, %v1156_v24 }
 0x4c1   : > { %5286 = vmatmul.msk.bf16.vlgmr.msra.gmra.mxu3 %vm7922_vm11, %v1157_v48  ;;  %vm7927_vm11 = vcmask 1043456  }
 0x4c2   : > { %v1445_v5 = vpop.permute.xlu2 %1444  ;;  %vm7928_vm4 = vmmov %vm7927_vm11 }
 0x4c3   : > { %v1441_v7 = vpop.permute.xlu0 %1440  ;;  %vm7931_vm14 = vmmov %vm7928_vm4 }
 0x4c4   : > { %vm7932_vm15 = vmmov %vm7928_vm4 }
 0x4ca   : > { %v1789_v6 = vpop.permute.xlu1 %1788  ;;  %v1320_v12 = vpop.permute.xlu2 %1319 }
 0x4cb   : > { %v6119_v13 = vsel %vm7923_vm5, %v1789_v6, %v1791_v38  ;;  %v6122_v15 = vsel %vm7924_vm13, 0, %v1789_v6  ;;  %v1316_v19 = vpop.permute.xlu0 %1315  ;;  %v1996_v38 = vunpack.c.h.b16 %v6098_v34  ;;  %vm7930_vm5 = vmmov %vm7929_vm7  ;;  %vm1446_vm13 = vcmask 629760  }
 0x4cc   : > { %v1858_v40 = vsel %vm1843_vm3, %v6122_v15, 0  ;;  %v1859_v21 = vsel %vm1850_vm9, %v6119_v13, 0  ;;  %vm7820_vm9 = vcmask 998400  }
 0x4cd   : > { %1864 = vrot.lane.b32.xlu1 %v1858_v40, %s7828_s23  ;;  %1866 = vrot.lane.b32.xlu2 %v1859_v21, %s7828_s23  ;;  %vm2000_vm10 = vcmp.ne.s32.totalorder %v1996_v38, %v5668_v36  ;;  %s5506_s23 = smov 42  }
 0x4ce   : > { %vm2001_vm3 = vmpackc.low %vm2000_vm10, %vm1999_vm8 }
 0x4cf   : > { %v2016_v47 = vsel %vm2001_vm3, %v6122_v15, 0  ;;  %vm7934_vm8 = vmmov %vm7930_vm5  ;;  %vm1807_vm3 = vcmp.ge.s32.totalorder %v5649_v18, 2 }
 0x4d0   : > { %vm7935_vm10 = vmmov %vm7930_vm5 }
 0x4d2   : > { %v1194_v25 = vpop.permute.xlu1 %1193  ;;  %v1395_v26 = vpop.permute.xlu2 %1394 }
 0x4d3   : > { %v1200_v27 = vsel %vm7840_vm1, %v1194_v25, %v1196_v62  ;;  %v1397_v30 = vpop.permute.xlu0 %1396 }
 0x4d4   : > { %v1206_v31 = vsel %vm7927_vm11, %v1200_v27, 0  ;;  %v1401_v32 = vsel %vm7839_vm12, %v1395_v26, %v1397_v30  ;;  %vm7933_vm11 = vmmov %vm7928_vm4 }
 0x4d5   : > { %1218 = vmatpush.bf16.msra.mxu2 %v1206_v31  ;;  %1944 = vrot.lane.b32.xlu1 %v6122_v15, %s7824_s24  ;;  %v1407_v63 = vsel %vm7928_vm4, %v1401_v32, 0 }
 0x4d6   : > { %1946 = vrot.lane.b32.xlu2 %v6119_v13, %s7824_s24  ;;  %1419 = vmatpush.bf16.msra.mxu0 %v1407_v63  ;;  %s8025_s24 = smov 96  }
 0x4d8   : > { %5285 = vmatmul.msk.bf16.vlgmr.msra.gmra.mxu2 %vm7929_vm7, %v1157_v48  ;;  %vm1806_vm7 = vcmp.ge.s32.totalorder %v5643_v14, 2 }
 0x4d9   : > { %5291 = vmatmul.msk.bf16.vlgmr.msra.gmra.mxu0 %vm7930_vm5, %v1159_v4  ;;  %vm7936_vm5 = vmmov %vm7928_vm4 }
 0x4da   : > { %v1443_v62 = vpop.permute.xlu1 %1442  ;;  %v6146_v45 = vpop.permute.xlu2 %1643 }
 0x4db   : > { %v6148_v42 = vpop.permute.xlu0 %1645  ;;  %v1447_v8 = vsel %vm1446_vm13, %v1441_v7, %v1443_v62  ;;  %v1448_v48 = vsel %vm1446_vm13, %v1443_v62, %v1445_v5  ;;  %v1158_v5 = vld [vmem:[%s7769_s6 + $0x8] sm:$0xf]  ;;  %vm1812_vm13 = vmpackc.low %vm1807_vm3, %vm1806_vm7 }
 0x4dc   : > { %v1453_v25 = vsel %vm7933_vm11, %v1447_v8, 0  ;;  %v1456_v7 = vsel %vm7928_vm4, %v1448_v48, 0  ;;  %v6180_v32 = vsel %vm1812_vm13, 65537, %v5479_v1  ;;  %vm7821_vm11 = vcmask 31744  }
 0x4dd   : > { %2022 = vrot.lane.b32.xlu1 %v2016_v47, %s7822_s0  ;;  %v6184_v63 = vperm.slane %v6180_v32, 4 }
 0x4e2   : > { %v1318_v9 = vpop.permute.xlu1 %1317  ;;  %v6156_v10 = vpop.permute.xlu2 %1523 }
 0x4e3   : > { %v1322_v11 = vsel %vm7820_vm9, %v1316_v19, %v1318_v9  ;;  %v1323_v6 = vsel %vm7820_vm9, %v1318_v9, %v1320_v12  ;;  %v6160_v40 = vpop.permute.xlu0 %1519 }
 0x4e4   : > { %v1328_v21 = vsel %vm7931_vm14, %v1322_v11, 0  ;;  %v1331_v24 = vsel %vm7932_vm15, %v1323_v6, 0  ;;  %vm1993_vm14 = vcmask 23552   ;;  %vm7937_vm15 = vmmov %vm7934_vm8 }
 0x4e5   : > { %1340 = vmatpush.bf16.msrb.mxu2 %v1328_v21  ;;  %1353 = vmatpush.bf16.msrb.mxu3 %v1331_v24 }
 0x4e8   : > { %5290 = vmatmul.msk.bf16.vlgmr.msrb.gmra.mxu3 %vm7934_vm8, %v1158_v5  ;;  %5289 = vmatmul.msk.bf16.vlgmr.msrb.gmra.mxu2 %vm7935_vm10, %v1158_v5 }
 0x4e9   : > { %1465 = vmatpush.bf16.msra.mxu2 %v1453_v25  ;;  %1478 = vmatpush.bf16.msra.mxu3 %v1456_v7 }
 0x4ea   : > { %v1399_v12 = vpop.permute.xlu1 %1398  ;;  %v6173_v19 = vpop.permute.xlu2 %1601 }
 0x4eb   : > { %v1402_v26 = vsel %vm7839_vm12, %v1397_v30, %v1399_v12  ;;  %v6176_v27 = vpop.permute.xlu0 %1597 }
 0x4ec   : > { %v1410_v31 = vsel %vm7936_vm5, %v1402_v26, 0 }
 0x4ed   : > { %1432 = vmatpush.bf16.msra.mxu1 %v1410_v31 }
 0x4f0   : > { %5292 = vmatmul.msk.bf16.vlgmr.msra.gmra.mxu1 %vm7937_vm15, %v1159_v4  ;;  %v1160_v4 = vld [vmem:[%s7769_s6 + $0x10] sm:$0xf]  ;;  %vm1649_vm15 = vcmask 236544  }
 0x4f2   : > { %v1992_v61 = vpop.permute.xlu1 %1991  ;;  %v2078_v38 = vpop.permute.xlu2 %2077 }
 0x4f3   : > { %v1994_v30 = vsel %vm1993_vm14, %v6098_v34, %v1992_v61  ;;  %v2080_v62 = vpop.permute.xlu0 %2079  ;;  %v2009_v47 = vunpack.c.l.b16 %v1992_v61  ;;  %v2010_v8 = vunpack.c.h.b16 %v1992_v61  ;;  %v2083_v48 = vunpack.c.l.b16 %v2078_v38 }
 0x4f4   : > { %v2082_v9 = vsel %vm7821_vm11, %v2078_v38, %v2080_v62  ;;  %v2084_v11 = vunpack.c.h.b16 %v2078_v38  ;;  %v2002_v6 = vunpack.c.l.b16 %v1994_v30  ;;  %v2003_v21 = vunpack.c.h.b16 %v1994_v30 }
 0x4f5   : > { %vm2013_vm4 = vcmp.ne.s32.totalorder %v2009_v47, %v5665_v35  ;;  %vm2014_vm8 = vcmp.ne.s32.totalorder %v2010_v8, %v5668_v36  ;;  %vm2087_vm10 = vcmp.ne.s32.totalorder %v2083_v48, %v5665_v35  ;;  %v2097_v34 = vunpack.c.l.b16 %v2080_v62 }
 0x4f6   : > { %vm2015_vm7 = vmpackc.low %vm2014_vm8, %vm2013_vm4  ;;  %vm2088_vm3 = vcmp.ne.s32.totalorder %v2084_v11, %v5668_v36  ;;  %vm6197_vm5 = vcmp.ne.s32.totalorder %v2002_v6, %v5665_v35  ;;  %vm2007_vm13 = vcmp.ne.s32.totalorder %v2003_v21, %v5668_v36  ;;  %v2098_v25 = vunpack.c.h.b16 %v2080_v62 }
 0x4f7   : > { %v2018_v7 = vsel %vm2015_vm7, %v6101_v44, 0  ;;  %vm2089_vm9 = vmpackc.low %vm2088_vm3, %vm2087_vm10  ;;  %v2090_v5 = vunpack.c.l.b16 %v2082_v9  ;;  %v2091_v12 = vunpack.c.h.b16 %v2082_v9  ;;  %vm7940_vm8 = vcmask 64512  }
 0x4f8   : > { %2026 = vrot.lane.b32.xlu0 %v2018_v7, %s7822_s0  ;;  %v2104_v26 = vsel %vm2089_vm9, %v6122_v15, 0  ;;  %vm2008_vm4 = vmpackc.low %vm2007_vm13, %vm6197_vm5  ;;  %5294 = vmatmul.msk.bf16.vlgmr.msra.gmra.mxu3 %vm7940_vm8, %v1160_v4  ;;  %vm1525_vm11 = vcmask 605184   ;;  %vm6211_vm7 = vcmp.ne.s32.totalorder %v2097_v34, %v5665_v35  ;;  %vm6216_vm10 = vcmp.ne.s32.totalorder %v2098_v25, %v5668_v36 }
 0x4f9   : > { %2110 = vrot.lane.b32.xlu1 %v2104_v26, %s7826_s25  ;;  %v2017_v31 = vsel %vm2008_vm4, %v6119_v13, 0  ;;  %vm7945_vm9 = vmmov %vm7940_vm8  ;;  %v1650_v30 = vsel %vm1649_vm15, %v6146_v45, %v6148_v42  ;;  %v1823_v47 = vunpack.c.l.b16 %v6184_v63  ;;  %v1824_v8 = vunpack.c.h.b16 %v6184_v63 }
 0x4fa   : > { %5293 = vmatmul.msk.bf16.vlgmr.msra.gmra.mxu2 %vm7945_vm9, %v1160_v4  ;;  %2024 = vrot.lane.b32.xlu2 %v2017_v31, %s7822_s0  ;;  %v1522_v62 = vpop.permute.xlu1 %1521  ;;  %vm6230_vm3 = vcmp.ne.s32.totalorder %v2090_v5, %v5665_v35  ;;  %vm6235_vm5 = vcmp.ne.s32.totalorder %v2091_v12, %v5668_v36  ;;  %vm7950_vm13 = vcmask 1043456   ;;  %vm2103_vm8 = vmpackc.low %vm6216_vm10, %vm6211_vm7  ;;  %v726_v4 = vld [vmem:[%s7777_s14 + $0x18] sm:$0xff]  ;;  %v1725_v34 = vpop.permute.xlu2 %1724  ;;  %vm1728_vm7 = vcmask 211968   ;;  %v1801_v5 = vld [vmem:[%s7770_s7] sm:$0xf]  ;;  %s5513_s0 = smov 86  }
 0x4fb   : > { %v1526_v48 = vsel %vm1525_vm11, %v6160_v40, %v1522_v62  ;;  %v1527_v9 = vsel %vm1525_vm11, %v1522_v62, %v6156_v10  ;;  %vm7951_vm4 = vmmov %vm7950_vm13  ;;  %v1161_v40 = vld [vmem:[%s7769_s6 + $0x14] sm:$0xf]  ;;  %v1727_v24 = vpop.permute.xlu0 %1726  ;;  %v2106_v25 = vsel %vm2103_vm8, %v6101_v44, 0  ;;  %vm6258_vm10 = vcmp.ne.s32.totalorder %v1823_v47, %v5665_v35 }
 0x4fc   : > { %v1532_v45 = vsel %vm7950_vm13, %v1526_v48, 0  ;;  %v1535_v21 = vsel %vm7951_vm4, %v1527_v9, 0  ;;  %vm7952_vm11 = vmmov %vm7951_vm4  ;;  %vm6263_vm13 = vcmp.ne.s32.totalorder %v1824_v8, %v5668_v36  ;;  %vm7849_vm4 = vcmask 261120   ;;  %v1162_v8 = vld [vmem:[%s7769_s6 + $0x18] sm:$0xf] }
 0x4fd   : > { %1544 = vmatpush.bf16.msrb.mxu0 %v1532_v45  ;;  %1557 = vmatpush.bf16.msrb.mxu1 %v1535_v21  ;;  %v1656_v10 = vsel %vm7952_vm11, %v1650_v30, 0  ;;  %vm2096_vm9 = vmpackc.low %vm6235_vm5, %vm6230_vm3  ;;  %vm7957_vm11 = vcmask 64512   ;;  %v1730_v44 = vsel %vm1728_vm7, %v1725_v34, %v1727_v24  ;;  %vm7959_vm8 = vcmask 1043456   ;;  %v1163_v45 = vld [vmem:[%s7769_s6 + $0x1c] sm:$0xf] }
 0x4fe   : > { %v2105_v12 = vsel %vm2096_vm9, %v6119_v13, 0  ;;  %vm7958_vm3 = vmmov %vm7957_vm11  ;;  %v6284_v62 = vperm.slane %v6180_v32, 0  ;;  %v1164_v24 = vld [vmem:[%s7769_s6 + $0x20] sm:$0xf] }
 0x4ff   : > { %vm1829_vm5 = vmpackc.low %vm6263_vm13, %vm6258_vm10 }
 0x500   : > { %2114 = vrot.lane.b32.xlu0 %v2106_v25, %s7826_s25  ;;  %5296 = vmatmul.msk.bf16.vlgmr.msrb.gmra.mxu1 %vm7957_vm11, %v1161_v40  ;;  %vm7960_vm9 = vmmov %vm7959_vm8  ;;  %v1816_v48 = vunpack.c.l.b16 %v6284_v62  ;;  %v1817_v9 = vunpack.c.h.b16 %v6284_v62 }
 0x501   : > { %1668 = vmatpush.bf16.msra.mxu0 %v1656_v10  ;;  %2158 = vperm.xlu1 %5469, %v726_v4   ;;  %vm7961_vm11 = vmmov %vm7959_vm8 }
 0x502   : > { %5295 = vmatmul.msk.bf16.vlgmr.msrb.gmra.mxu0 %vm7958_vm3, %v1161_v40  ;;  %2112 = vrot.lane.b32.xlu2 %v2105_v12, %s7826_s25  ;;  %v1600_v26 = vpop.permute.xlu1 %1599  ;;  %v1738_v47 = vsel %vm7961_vm11, %v1730_v44, 0  ;;  %vm7962_vm10 = vmmov %vm7958_vm3  ;;  %v1802_v12 = vld [vmem:[%s7770_s7 + $0x4] sm:$0xf]  ;;  %s5512_s25 = smov 91  }
 0x503   : > { %v1604_v31 = vsel %vm7849_vm4, %v6176_v27, %v1600_v26  ;;  %v1605_v61 = vsel %vm7849_vm4, %v1600_v26, %v6173_v19  ;;  %v1831_v27 = vsel %vm1829_vm5, %v6119_v13, 0  ;;  %v736_v19 = vld [vmem:[%s7778_s15 + $0x18] sm:$0xff]  ;;  %vm7963_vm13 = vmmov %vm7959_vm8 }
 0x504   : > { %v1610_v38 = vsel %vm7959_vm8, %v1604_v31, 0  ;;  %v1613_v30 = vsel %vm7960_vm9, %v1605_v61, 0  ;;  %v1914_v32 = vsel %vm7963_vm13, %v1831_v27, 0  ;;  %vm7964_vm5 = vmmov %vm7959_vm8  ;;  %vm1820_vm8 = vcmp.ne.s32.totalorder %v1816_v48, %v5665_v35 }
 0x505   : > { %1622 = vmatpush.bf16.msrb.mxu2 %v1610_v38  ;;  %1635 = vmatpush.bf16.msrb.mxu3 %v1613_v30  ;;  %vm1821_vm9 = vcmp.ne.s32.totalorder %v1817_v9, %v5668_v36  ;;  %vm7966_vm13 = vmmov %vm7958_vm3  ;;  %v1803_v38 = vld [vmem:[%s7770_s7 + $0x8] sm:$0xf] }
 0x506   : > { %vm1822_vm11 = vmpackc.low %vm1821_vm9, %vm1820_vm8  ;;  %vm7971_vm9 = vcmask 1039360  }
 0x507   : > { %v1830_v10 = vsel %vm1822_vm11, %v6122_v15, 0 }
 0x508   : > { %5298 = vmatmul.msk.bf16.vlgmr.msrb.gmra.mxu3 %vm7962_vm10, %v1162_v8  ;;  %vm7965_vm10 = vmmov %vm7958_vm3 }
 0x509   : > { %1760 = vmatpush.bf16.msra.mxu3 %v1738_v47 }
 0x50a   : > { %5297 = vmatmul.msk.bf16.vlgmr.msrb.gmra.mxu2 %vm7958_vm3, %v1162_v8  ;;  %2165 = vperm.xlu2 %5470, %v736_v19   ;;  %v1648_v11 = vpop.permute.xlu1 %1647  ;;  %vm7968_vm3 = vmmov %vm7964_vm5 }
 0x50b   : > { %v1651_v13 = vsel %vm1649_vm15, %v6148_v42, %v1648_v11  ;;  %vm7967_vm15 = vmmov %vm7964_vm5  ;;  %v1911_v4 = vsel %vm7968_vm3, %v1830_v10, 0 }
 0x50c   : > { %v1659_v6 = vsel %vm7964_vm5, %v1651_v13, 0  ;;  %vm7969_vm5 = vmmov %vm7965_vm10 }
 0x50d   : > { %1936 = vmatpush.bf16.msrb.mxu3 %v1914_v32  ;;  %1681 = vmatpush.bf16.msra.mxu1 %v1659_v6  ;;  %vm7970_vm8 = vmmov %vm7969_vm5 }
 0x50e   : > { %vm7972_vm11 = vmmov %vm7968_vm3 }
 0x510   : > { %5300 = vmatmul.msk.bf16.vlgmr.msra.gmra.mxu1 %vm7965_vm10, %v1163_v45  ;;  %vm7974_vm10 = vmmov %vm7969_vm5 }
 0x512   : > { %5299 = vmatmul.msk.bf16.vlgmr.msra.gmra.mxu0 %vm7966_vm13, %v1163_v45  ;;  %v1723_v21 = vpop.permute.xlu1 %1722  ;;  %vm7975_vm13 = vmmov %vm7969_vm5 }
 0x513   : > { %v1729_v42 = vsel %vm1728_vm7, %v1723_v21, %v1725_v34  ;;  %vm7973_vm7 = vmmov %vm7969_vm5 }
 0x514   : > { %v1735_v40 = vsel %vm7967_vm15, %v1729_v42, 0  ;;  %vm7976_vm15 = vcmask 1031168   ;;  %v1804_v42 = vld [vmem:[%s7770_s7 + $0xc] sm:$0xf] }
 0x515   : > { %1747 = vmatpush.bf16.msra.mxu2 %v1735_v40 }
 0x518   : > { %5302 = vmatmul.msk.bf16.vlgmr.msra.gmra.mxu3 %vm7969_vm5, %v1164_v24 }
 0x519   : > { %1923 = vmatpush.bf16.msrb.mxu2 %v1911_v4 }
 0x51a   : > { %5301 = vmatmul.msk.bf16.vlgmr.msra.gmra.mxu2 %vm7970_vm8, %v1164_v24  ;;  %vm7977_vm8 = vmmov %vm7971_vm9 }
 0x527   : > { %v1867_v25 = vpop.permute.xlu2 %1866  ;;  %v1869_v7 = vpop.permute.xlu0 %1868 }
 0x528   : > { %v1871_v15 = vsel %vm7971_vm9, %v1867_v25, %v1869_v7  ;;  %5306 = vmatmul.msk.bf16.vlgmr.msrb.gmra.mxu3 %vm7974_vm10, %v1801_v5  ;;  %vm7978_vm9 = vmmov %vm7968_vm3 }
 0x529   : > { %v1879_v34 = vsel %vm7972_vm11, %v1871_v15, 0  ;;  %vm7979_vm11 = vmmov %vm7969_vm5 }
 0x52a   : > { %1901 = vmatpush.bf16.msrb.mxu1 %v1879_v34  ;;  %5305 = vmatmul.msk.bf16.vlgmr.msrb.gmra.mxu2 %vm7973_vm7, %v1801_v5  ;;  %vm7980_vm7 = vmmov %vm7976_vm15 }
 0x52b   : > { %vm7981_vm10 = vmmov %vm7968_vm3 }
 0x52d   : > { %5304 = vmatmul.msk.bf16.vlgmr.msrb.gmra.mxu1 %vm7975_vm13, %v1802_v12  ;;  %vm7982_vm13 = vmmov %vm7969_vm5 }
 0x52f   : > { %v1949_v44 = vpop.permute.xlu0 %1948 }
 0x530   : > { %v1947_v26 = vpop.permute.xlu2 %1946 }
 0x531   : > { %v1951_v31 = vsel %vm7976_vm15, %v1947_v26, %v1949_v44  ;;  %v1255_v11 = vpop.f32.mrf.mxu0  ;;  %vm7983_vm15 = vmmov %vm7968_vm3 }
 0x532   : > { %v1959_v61 = vsel %vm7968_vm3, %v1951_v31, 0  ;;  %vm7984_vm3 = vmmov %vm7969_vm5 }
 0x533   : > { %1981 = vmatpush.bf16.msra.mxu1 %v1959_v61 }
 0x539   : > { %v1257_v4 = vpop.f32.mrf.mxu0 }
 0x53b   : > { %v1268_v13 = vpop.f32.mrf.mxu1 }
 0x53d   : > { %5308 = vmatmul.msk.bf16.vlgmr.msra.gmra.mxu1 %vm7969_vm5, %v1803_v38  ;;  %vm2116_vm5 = vcmask 1014784  }
 0x53f   : > { %v1865_v30 = vpop.permute.xlu1 %1864 }
 0x540   : > { %v1870_v47 = vsel %vm7977_vm8, %v1865_v30, %v1867_v25  ;;  %vm7985_vm8 = vmmov %vm7978_vm9 }
 0x541   : > { %v1876_v8 = vsel %vm7978_vm9, %v1870_v47, 0  ;;  %vm7986_vm9 = vmmov %vm7985_vm8 }
 0x542   : > { %1888 = vmatpush.bf16.msrb.mxu0 %v1876_v8 }
 0x543   : > { %v1270_v24 = vpop.f32.mrf.mxu1 }
 0x544   : > { %v1233_v27 = vpop.f32.mrf.mxu3 }
 0x545   : > { %5303 = vmatmul.msk.bf16.vlgmr.msrb.gmra.mxu0 %vm7979_vm11, %v1802_v12  ;;  %v1269_v40 = vadd.f32 %v1268_v13, %v1233_v27  ;;  %vm7987_vm11 = vmmov %vm7984_vm3 }
 0x547   : > { %v1945_v19 = vpop.permute.xlu1 %1944 }
 0x548   : > { %v1950_v32 = vsel %vm7980_vm7, %v1945_v19, %v1947_v26  ;;  %vm7988_vm7 = vmmov %vm7984_vm3 }
 0x549   : > { %v1956_v48 = vsel %vm7981_vm10, %v1950_v32, 0  ;;  %vm7989_vm10 = vmmov %vm7985_vm8 }
 0x54a   : > { %1968 = vmatpush.bf16.msra.mxu0 %v1956_v48  ;;  %v1805_v48 = vld [vmem:[%s7770_s7 + $0x10] sm:$0xf] }
 0x54c   : > { %v1235_v9 = vpop.f32.mrf.mxu3 }
 0x54f   : > { %v2023_v6 = vpop.permute.xlu1 %2022 }
 0x554   : > { %v2025_v45 = vpop.permute.xlu2 %2024 }
 0x555   : > { %v2028_v21 = vsel %vm7840_vm1, %v2023_v6, %v2025_v45  ;;  %5307 = vmatmul.msk.bf16.vlgmr.msra.gmra.mxu0 %vm7982_vm13, %v1803_v38  ;;  %vm7990_vm13 = vmmov %vm7984_vm3 }
 0x556   : > { %v2034_v10 = vsel %vm7983_vm15, %v2028_v21, 0  ;;  %v1421_v15 = vpop.f32.mrf.mxu0  ;;  %vm7991_vm15 = vmmov %vm7985_vm8 }
 0x557   : > { %2046 = vmatpush.bf16.msra.mxu2 %v2034_v10 }
 0x55a   : > { %5309 = vmatmul.msk.bf16.vlgmr.msra.gmra.mxu2 %vm7984_vm3, %v1804_v42  ;;  %vm7992_vm3 = vmmov %vm7985_vm8 }
 0x55b   : > { %v1220_v25 = vpop.f32.mrf.mxu2 }
 0x55c   : > { %v1256_v7 = vadd.f32 %v1255_v11, %v1220_v25  ;;  %v2113_v12 = vpop.permute.xlu2 %2112 }
 0x55e   : > { %v1423_v5 = vpop.f32.mrf.mxu0 }
 0x563   : > { %v1222_v34 = vpop.f32.mrf.mxu2 }
 0x56a   : > { %v2027_v44 = vpop.permute.xlu0 %2026 }
 0x56b   : > { %v2111_v26 = vpop.permute.xlu1 %2110  ;;  %v2029_v31 = vsel %vm7840_vm1, %v2025_v45, %v2027_v44  ;;  %v1342_v61 = vpop.f32.mrf.mxu2  ;;  %vm2772_vm1 = vcmask 736256  }
 0x56c   : > { %v2117_v38 = vsel %vm2116_vm5, %v2111_v26, %v2113_v12  ;;  %v2037_v30 = vsel %vm7985_vm8, %v2029_v31, 0  ;;  %v1359_v47 = vadd.f32 %v1342_v61, %v1256_v7  ;;  %v1355_v8 = vpop.f32.mrf.mxu3  ;;  %vm2449_vm8 = vcmp.ge.s32.totalorder %v5643_v14, 5 }
 0x56d   : > { %v2123_v27 = vsel %vm7986_vm9, %v2117_v38, 0  ;;  %2059 = vmatpush.bf16.msra.mxu3 %v2037_v30  ;;  %v1360_v19 = vadd.f32 %v1355_v8, %v1269_v40  ;;  %v1434_v32 = vpop.f32.mrf.mxu1  ;;  %vm2450_vm9 = vcmp.ge.s32.totalorder %v5649_v18, 5 }
 0x56e   : > { %2135 = vmatpush.bf16.msrb.mxu0 %v2123_v27  ;;  %v1438_v9 = vadd.f32 %v1421_v15, %v1359_v47 }
 0x56f   : > { %v1439_v11 = vadd.f32 %v1434_v32, %v1360_v19 }
 0x570   : > { %5310 = vmatmul.msk.bf16.vlgmr.msra.gmra.mxu3 %vm7987_vm11, %v1804_v42  ;;  %vm2455_vm11 = vmpackc.low %vm2450_vm9, %vm2449_vm8  ;;  %vm7995_vm8 = vcmask 916480  }
 0x571   : > { %5311 = vmatmul.msk.bf16.vlgmr.msrb.gmra.mxu0 %vm7988_vm7, %v1805_v48  ;;  %vm2556_vm7 = vcmp.lt.s32.totalorder %v5643_v14, 11  ;;  %vm7996_vm9 = vmmov %vm7995_vm8 }
 0x572   : > { %v2115_v13 = vpop.permute.xlu0 %2114 }
 0x573   : > { %v2118_v6 = vsel %vm2116_vm5, %v2113_v12, %v2115_v13  ;;  %v1344_v45 = vpop.f32.mrf.mxu2 }
 0x574   : > { %v2126_v21 = vsel %vm7989_vm10, %v2118_v6, 0  ;;  %v1357_v10 = vpop.f32.mrf.mxu3  ;;  %vm2557_vm10 = vcmp.lt.s32.totalorder %v5649_v18, 11 }
 0x575   : > { %2148 = vmatpush.bf16.msrb.mxu1 %v2126_v21  ;;  %v1436_v40 = vpop.f32.mrf.mxu1 }
 0x578   : > { %5312 = vmatmul.msk.bf16.vlgmr.msrb.gmra.mxu1 %vm7990_vm13, %v1805_v48  ;;  %vm2562_vm13 = vmpackc.low %vm2557_vm10, %vm2556_vm7 }
 0x57c   : > { %v1480_v24 = vpop.f32.mrf.mxu3 }
 0x57d   : > { %v1467_v4 = vpop.f32.mrf.mxu2  ;;  %v1485_v7 = vadd.f32 %v1480_v24, %v1439_v11  ;;  %v1559_v15 = vpop.f32.mrf.mxu1 }
 0x57e   : > { %v1484_v25 = vadd.f32 %v1467_v4, %v1438_v9 }
 0x57f   : > { %v1546_v34 = vpop.f32.mrf.mxu0  ;;  %v1564_v5 = vadd.f32 %v1559_v15, %v1485_v7 }
 0x580   : > { %v1563_v42 = vadd.f32 %v1546_v34, %v1484_v25 }
 0x584   : > { %v1482_v26 = vpop.f32.mrf.mxu3 }
 0x585   : > { %v1469_v44 = vpop.f32.mrf.mxu2  ;;  %v1561_v31 = vpop.f32.mrf.mxu1 }
 0x587   : > { %v1548_v12 = vpop.f32.mrf.mxu0 }
 0x58c   : > { %v1637_v38 = vpop.f32.mrf.mxu3 }
 0x58d   : > { %v1624_v61 = vpop.f32.mrf.mxu2  ;;  %v1642_v47 = vadd.f32 %v1637_v38, %v1564_v5  ;;  %v1683_v8 = vpop.f32.mrf.mxu1 }
 0x58e   : > { %v1641_v30 = vadd.f32 %v1624_v61, %v1563_v42 }
 0x58f   : > { %v1670_v27 = vpop.f32.mrf.mxu0  ;;  %v1688_v32 = vadd.f32 %v1683_v8, %v1642_v47 }
 0x590   : > { %v1687_v19 = vadd.f32 %v1670_v27, %v1641_v30 }
 0x594   : > { %v1639_v13 = vpop.f32.mrf.mxu3 }
 0x595   : > { %v1626_v48 = vpop.f32.mrf.mxu2  ;;  %v1685_v9 = vpop.f32.mrf.mxu1 }
 0x597   : > { %v1672_v11 = vpop.f32.mrf.mxu0 }
 0x59c   : > { %v1762_v45 = vpop.f32.mrf.mxu3 }
 0x59d   : > { %v1749_v6 = vpop.f32.mrf.mxu2  ;;  %v6361_v10 = vadd.f32 %v1762_v45, %v1688_v32 }
 0x59e   : > { %v6359_v21 = vadd.f32 %v1749_v6, %v1687_v19  ;;  %v2159_v6 = vpop.permute.xlu1 %2158 }
 0x5a4   : > { %v1764_v4 = vpop.f32.mrf.mxu3 }
 0x5a5   : > { %v1751_v40 = vpop.f32.mrf.mxu2 }
 0x5aa   : > { %v1903_v24 = vpop.f32.mrf.mxu1 }
 0x5ac   : > { %v1938_v15 = vpop.f32.mrf.mxu3 }
 0x5ad   : > { %v1925_v25 = vpop.f32.mrf.mxu2  ;;  %v1939_v27 = vadd.f32 %v1938_v15, %v1903_v24 }
 0x5b2   : > { %v1905_v7 = vpop.f32.mrf.mxu1 }
 0x5b4   : > { %v1940_v5 = vpop.f32.mrf.mxu3 }
 0x5b5   : > { %v1927_v34 = vpop.f32.mrf.mxu2  ;;  %v2166_v5 = vpop.permute.xlu2 %2165 }
 0x5ba   : > { %v1983_v42 = vpop.f32.mrf.mxu1 }
 0x5bb   : > { %v1988_v48 = vadd.f32 %v1983_v42, %v1939_v27 }
 0x5c2   : > { %v1890_v44 = vpop.f32.mrf.mxu0  ;;  %v1985_v26 = vpop.f32.mrf.mxu1 }
 0x5c3   : > { %v1926_v47 = vadd.f32 %v1925_v25, %v1890_v44 }
 0x5ca   : > { %v1892_v31 = vpop.f32.mrf.mxu0 }
 0x5d2   : > { %v1970_v12 = vpop.f32.mrf.mxu0 }
 0x5d3   : > { %v1987_v8 = vadd.f32 %v1970_v12, %v1926_v47 }
 0x5da   : > { %v1972_v61 = vpop.f32.mrf.mxu0 }
 0x5dd   : > { %v2048_v38 = vpop.f32.mrf.mxu2 }
 0x5de   : > { %v2065_v32 = vadd.f32 %v2048_v38, %v1987_v8 }
 0x5e5   : > { %v2050_v30 = vpop.f32.mrf.mxu2 }
 0x5ee   : > { %v2137_v19 = vpop.f32.mrf.mxu0 }
 0x5ef   : > { %v2154_v13 = vadd.f32 %v2137_v19, %v2065_v32 }
 0x5f1   : > { %v2161_v40 = vmul.f32 %v2159_v6, %v2154_v13  ;;  %v737_v13 = vld [vmem:[%s7778_s15 + $0x20] sm:$0xff] }
 0x5f3   : > { %v2061_v9 = vpop.f32.mrf.mxu3  ;;  %v2168_v26 = vadd.f32 %v2166_v5, %v2161_v40  ;;  %v6404_v40 = vsel %vm2562_vm13, 65537, %v5479_v1 }
 0x5f4   : > { %v2066_v11 = vadd.f32 %v2061_v9, %v1988_v48  ;;  %v727_v48 = vld [vmem:[%s7777_s14 + $0x20] sm:$0xff]  ;;  %v642_v9 = vld [vmem:[%s7765_s2 + $0x18] sm:$0xff] }
 0x5f5   : > { %v2150_v45 = vpop.f32.mrf.mxu1 }
 0x5f6   : > { %v2155_v4 = vadd.f32 %v2150_v45, %v2066_v11  ;;  %v2139_v7 = vpop.f32.mrf.mxu0  ;;  %v682_v11 = vld [vmem:[%s7766_s3 + $0x18] sm:$0xff] }
 0x5f8   : > { %v2162_v34 = vmul.f32 %v2159_v6, %v2155_v4  ;;  %v2456_v6 = vsel %vm2455_vm11, 65537, %v5479_v1  ;;  %v2564_v4 = vperm.slane %v6404_v40, 0  ;;  %vm7997_vm11 = vcmask 1043456  }
 0x5f9   : > { %v6397_v45 = vperm.slane %v2456_v6, 0  ;;  %vm7998_vm7 = vmmov %vm7997_vm11 }
 0x5fa   : > { %v2169_v31 = vadd.f32 %v2166_v5, %v2162_v34  ;;  %v2186_v34 = vld [vmem:[%s7771_s8] sm:$0xf] }
 0x5fb   : > { %v2063_v61 = vpop.f32.mrf.mxu3 }
 0x5fc   : > { %v2170_v30 = vpack.c.bf16 %v2169_v31, %v2168_v26  ;;  %v6414_v26 = vperm.slane %v2456_v6, 4 }
 0x5fd   : > { %v2152_v25 = vpop.f32.mrf.mxu1 }
 0x5fe   : > { %v2173_v44 = vunpack.c.h.b16 %v2170_v30  ;;  %v2172_v24 = vunpack.c.l.b16 %v2170_v30 }
 0x600   : > { %v2175_v15 = vpack.c.b16 %v2173_v44, %v2173_v44  ;;  %v2174_v12 = vpack.c.b16 %v2172_v24, %v2172_v24 }
 0x602   : > { %2178 = vrot.lane.b32.xlu1 %v2175_v15, %s7841_s17  ;;  %2176 = vrot.lane.b32.xlu0 %v2174_v12, %s7841_s17 }
 0x674   : > { %v2179_v42 = vpop.permute.xlu1 %2178  ;;  %v2177_v38 = vpop.permute.xlu0 %2176 }
 0x675   : > { %v2180_v47 = vsel %vm7849_vm4, %v2177_v38, %v2179_v42  ;;  %v2183_v8 = vsel %vm7849_vm4, 0, %v2177_v38  ;;  %v2185_v27 = vsel %vm7849_vm4, %v2179_v42, 0  ;;  %v2187_v42 = vld [vmem:[%s7771_s8 + $0x4] sm:$0xf] }
 0x676   : > { %2197 = vrot.lane.b32.xlu1 %v2185_v27, %s7830_s27  ;;  %2193 = vrot.lane.b32.xlu2 %v2183_v8, %s7830_s27  ;;  %v2239_v19 = vsel %vm7991_vm15, %v2183_v8, 0  ;;  %v2242_v32 = vsel %vm7992_vm3, %v2180_v47, 0  ;;  %vm7993_vm15 = vcmask 64512  }
 0x677   : > { %2195 = vrot.lane.b32.xlu0 %v2180_v47, %s7830_s27  ;;  %2251 = vmatpush.bf16.msra.mxu0 %v2239_v19  ;;  %s5504_s27 = smov 10   ;;  %vm7994_vm3 = vmmov %vm7993_vm15 }
 0x678   : > { %2264 = vmatpush.bf16.msra.mxu1 %v2242_v32  ;;  %vm7999_vm10 = vmmov %vm7994_vm3 }
 0x679   : > { %vm8000_vm13 = vmmov %vm7994_vm3 }
 0x67a   : > { %5315 = vmatmul.msk.bf16.vlgmr.msra.gmra.mxu0 %vm7993_vm15, %v2186_v34  ;;  %vm8001_vm15 = vcmask 785408  }
 0x67b   : > { %5316 = vmatmul.msk.bf16.vlgmr.msra.gmra.mxu1 %vm7994_vm3, %v2186_v34  ;;  %vm8002_vm3 = vmmov %vm8001_vm15 }
 0x67e   : > { %2274 = vrot.lane.b32.xlu1 %v2185_v27, %s7834_s30  ;;  %2270 = vrot.lane.b32.xlu2 %v2183_v8, %s7834_s30 }
 0x67f   : > { %2272 = vrot.lane.b32.xlu0 %v2180_v47, %s7834_s30  ;;  %s5505_s30 = smov 90  }
 0x686   : > { %2364 = vrot.lane.b32.xlu1 %v2185_v27, %s7832_s28  ;;  %2360 = vrot.lane.b32.xlu2 %v2183_v8, %s7832_s28 }
 0x687   : > { %2362 = vrot.lane.b32.xlu0 %v2180_v47, %s7832_s28  ;;  %s5510_s28 = smov 118  }
 0x68e   : > { %2319 = vrot.lane.b32.xlu1 %v2185_v27, %s5496_s18  ;;  %2315 = vrot.lane.b32.xlu2 %v2183_v8, %s5496_s18 }
 0x68f   : > { %2317 = vrot.lane.b32.xlu0 %v2180_v47, %s5496_s18 }
 0x696   : > { %2408 = vperm.xlu2 %5470, %v727_v48   ;;  %2647 = vrot.lane.b32.xlu1 %v6414_v26, %s5496_s18 }
 0x697   : > { %2415 = vperm.xlu0 %5468, %v737_v13  }
 0x69e   : > { %661 = vperm.xlu2 %5470, %v642_v9  }
 0x69f   : > { %2645 = vrot.lane.b32.xlu0 %v6397_v45, %s5496_s18 }
 0x6a6   : > { %701 = vperm.xlu2 %5470, %v682_v11  }
 0x6a7   : > { %2566 = vrot.lane.b32.xlu0 %v2564_v4, %s5504_s27 }
 0x6af   : > { %2768 = vrot.lane.b32.xlu0 %v2564_v4, %s5505_s30 }
 0x6b7   : > { %2849 = vrot.lane.b32.xlu0 %v6414_v26, %s7841_s17 }
 0x6bf   : > { %2962 = vrot.lane.b32.xlu0 %v2564_v4, %s5506_s23 }
 0x6d0   : > { %v2194_v7 = vpop.permute.xlu2 %2193 }
 0x6d8   : > { %v2271_v5 = vpop.permute.xlu2 %2270 }
 0x6e0   : > { %v2361_v31 = vpop.permute.xlu2 %2360 }
 0x6e8   : > { %v2198_v61 = vpop.permute.xlu1 %2197  ;;  %v2316_v30 = vpop.permute.xlu2 %2315 }
 0x6e9   : > { %v2196_v25 = vpop.permute.xlu0 %2195 }
 0x6ea   : > { %v2199_v44 = vsel %vm7995_vm8, %v2194_v7, %v2196_v25  ;;  %v2200_v24 = vsel %vm7996_vm9, %v2196_v25, %v2198_v61  ;;  %vm8003_vm8 = vmmov %vm7998_vm7 }
 0x6eb   : > { %v2205_v15 = vsel %vm7997_vm11, %v2199_v44, 0  ;;  %v2208_v12 = vsel %vm7998_vm7, %v2200_v24, 0  ;;  %vm8004_vm9 = vmmov %vm7998_vm7  ;;  %vm7838_vm11 = vcmask 523264  }
 0x6ec   : > { %2217 = vmatpush.bf16.msrb.mxu2 %v2205_v15  ;;  %2230 = vmatpush.bf16.msrb.mxu3 %v2208_v12 }
 0x6ef   : > { %5313 = vmatmul.msk.bf16.vlgmr.msrb.gmra.mxu2 %vm7999_vm10, %v2187_v42  ;;  %5314 = vmatmul.msk.bf16.vlgmr.msrb.gmra.mxu3 %vm8000_vm13, %v2187_v42  ;;  %vm8005_vm10 = vmmov %vm7998_vm7 }
 0x6f0   : > { %v2275_v38 = vpop.permute.xlu1 %2274  ;;  %v6430_v47 = vpop.permute.xlu2 %2408 }
 0x6f1   : > { %v2273_v8 = vpop.permute.xlu0 %2272 }
 0x6f2   : > { %v2276_v27 = vsel %vm8001_vm15, %v2271_v5, %v2273_v8  ;;  %v2277_v19 = vsel %vm8002_vm3, %v2273_v8, %v2275_v38  ;;  %v2188_v5 = vld [vmem:[%s7771_s8 + $0x8] sm:$0xf]  ;;  %vm8006_vm15 = vmmov %vm8000_vm13 }
 0x6f3   : > { %v2282_v32 = vsel %vm8003_vm8, %v2276_v27, 0  ;;  %v2285_v48 = vsel %vm8004_vm9, %v2277_v19, 0  ;;  %vm8007_vm3 = vmmov %vm7998_vm7 }
 0x6f4   : > { %2294 = vmatpush.bf16.msra.mxu2 %v2282_v32  ;;  %2307 = vmatpush.bf16.msra.mxu3 %v2285_v48  ;;  %vm8008_vm8 = vmmov %vm8007_vm3 }
 0x6f5   : > { %vm8009_vm9 = vmmov %vm8000_vm13 }
 0x6f7   : > { %v2253_v48 = vpop.f32.mrf.mxu0 }
 0x6f8   : > { %v2365_v13 = vpop.permute.xlu1 %2364  ;;  %v662_v9 = vpop.permute.xlu2 %661 }
 0x6f9   : > { %v2363_v11 = vpop.permute.xlu0 %2362  ;;  %v675_v61 = vmul.f32 %v662_v9, %v5820_v41  ;;  %v676_v25 = vmul.f32 %v662_v9, %v5832_v51  ;;  %v2189_v51 = vld [vmem:[%s7771_s8 + $0xc] sm:$0xf]  ;;  %v2565_v9 = vperm.slane %v6404_v40, 4 }
 0x6fa   : > { %v2367_v6 = vsel %vm7838_vm11, %v2361_v31, %v2363_v11  ;;  %v2368_v4 = vsel %vm7838_vm11, %v2363_v11, %v2365_v13  ;;  %v2266_v13 = vpop.f32.mrf.mxu1  ;;  %vm2570_vm11 = vcmask 80896  }
 0x6fb   : > { %v2373_v7 = vsel %vm7998_vm7, %v2367_v6, 0  ;;  %v2376_v34 = vsel %vm8005_vm10, %v2368_v4, 0  ;;  %vm8010_vm7 = vmmov %vm8009_vm9  ;;  %2568 = vrot.lane.b32.xlu1 %v2565_v9, %s5504_s27  ;;  %s5507_s27 = smov 85  }
 0x6fc   : > { %2385 = vmatpush.bf16.msrb.mxu2 %v2373_v7  ;;  %2398 = vmatpush.bf16.msrb.mxu3 %v2376_v34  ;;  %vm8011_vm10 = vmmov %vm8010_vm7 }
 0x6ff   : > { %5317 = vmatmul.msk.bf16.vlgmr.msra.gmra.mxu2 %vm8000_vm13, %v2188_v5  ;;  %5318 = vmatmul.msk.bf16.vlgmr.msra.gmra.mxu3 %vm8006_vm15, %v2188_v5  ;;  %vm8012_vm13 = vmmov %vm8010_vm7  ;;  %v2255_v11 = vpop.f32.mrf.mxu0  ;;  %vm2430_vm15 = vcmask 695296  }
 0x700   : > { %v2320_v31 = vpop.permute.xlu1 %2319  ;;  %v702_v44 = vpop.permute.xlu2 %701 }
 0x701   : > { %v715_v24 = vadd.f32 %v702_v44, %v675_v61  ;;  %v716_v15 = vadd.f32 %v702_v44, %v676_v25  ;;  %v2318_v12 = vpop.permute.xlu0 %2317 }
 0x702   : > { %v2321_v42 = vsel %vm7839_vm12, %v2316_v30, %v2318_v12  ;;  %v2322_v38 = vsel %vm7839_vm12, %v2318_v12, %v2320_v31  ;;  %v2190_v30 = vld [vmem:[%s7771_s8 + $0x10] sm:$0xf]  ;;  %v2268_v6 = vpop.f32.mrf.mxu1 }
 0x703   : > { %v6449_v8 = vpack.c.bf16 %v716_v15, %v715_v24  ;;  %v2327_v27 = vsel %vm8007_vm3, %v2321_v42, 0  ;;  %v2330_v41 = vsel %vm8008_vm8, %v2322_v38, 0  ;;  %2770 = vrot.lane.b32.xlu1 %v2565_v9, %s5505_s30  ;;  %s8013_s30 = smov 2  }
 0x704   : > { %2339 = vmatpush.bf16.msrb.mxu0 %v2327_v27  ;;  %2352 = vmatpush.bf16.msrb.mxu1 %v2330_v41 }
 0x705   : > { %v3049_v19 = vunpack.c.h.b16 %v6449_v8 }
 0x707   : > { %v3051_v32 = vpack.c.b16 %v3049_v19, %v3049_v19  ;;  %5319 = vmatmul.msk.bf16.vlgmr.msrb.gmra.mxu0 %vm8009_vm9, %v2189_v51  ;;  %5320 = vmatmul.msk.bf16.vlgmr.msrb.gmra.mxu1 %vm8010_vm7, %v2189_v51 }
 0x709   : > { %3054 = vrot.lane.b32.xlu0 %v3051_v32, %s5492_s26  ;;  %v2416_v33 = vpop.permute.xlu0 %2415 }
 0x70f   : > { %5321 = vmatmul.msk.bf16.vlgmr.msrb.gmra.mxu2 %vm8011_vm10, %v2190_v30  ;;  %5322 = vmatmul.msk.bf16.vlgmr.msrb.gmra.mxu3 %vm8012_vm13, %v2190_v30 }
 0x772   : > { %v2219_v4 = vpop.f32.mrf.mxu2  ;;  %v2232_v7 = vpop.f32.mrf.mxu3 }
 0x773   : > { %v2254_v12 = vadd.f32 %v2253_v48, %v2219_v4  ;;  %v2267_v42 = vadd.f32 %v2266_v13, %v2232_v7 }
 0x77a   : > { %v2221_v34 = vpop.f32.mrf.mxu2  ;;  %v2234_v5 = vpop.f32.mrf.mxu3 }
 0x782   : > { %v2296_v61 = vpop.f32.mrf.mxu2  ;;  %v2309_v25 = vpop.f32.mrf.mxu3 }
 0x783   : > { %v2313_v27 = vadd.f32 %v2296_v61, %v2254_v12  ;;  %v2314_v41 = vadd.f32 %v2309_v25, %v2267_v42  ;;  %v2466_v12 = vunpack.c.l.b16 %v6414_v26  ;;  %v2467_v42 = vunpack.c.h.b16 %v6414_v26 }
 0x784   : > { %v2341_v31 = vpop.f32.mrf.mxu0  ;;  %v2354_v44 = vpop.f32.mrf.mxu1 }
 0x785   : > { %v2358_v51 = vadd.f32 %v2341_v31, %v2313_v27  ;;  %v2359_v19 = vadd.f32 %v2354_v44, %v2314_v41  ;;  %vm6505_vm9 = vcmp.ne.s32.totalorder %v2466_v12, %v5665_v35  ;;  %vm6510_vm7 = vcmp.ne.s32.totalorder %v2467_v42, %v5668_v36 }
 0x786   : > { %vm2472_vm13 = vmpackc.low %vm6510_vm7, %vm6505_vm9 }
 0x78a   : > { %v2298_v24 = vpop.f32.mrf.mxu2  ;;  %v2311_v15 = vpop.f32.mrf.mxu3 }
 0x78c   : > { %v2343_v38 = vpop.f32.mrf.mxu0  ;;  %v2356_v40 = vpop.f32.mrf.mxu1 }
 0x78d   : > { %v2646_v38 = vpop.permute.xlu0 %2645 }
 0x792   : > { %v2387_v32 = vpop.f32.mrf.mxu2  ;;  %v2400_v30 = vpop.f32.mrf.mxu3 }
 0x793   : > { %v2404_v11 = vadd.f32 %v2387_v32, %v2358_v51  ;;  %v2405_v6 = vadd.f32 %v2400_v30, %v2359_v19  ;;  %v2650_v51 = vunpack.c.l.b16 %v2646_v38  ;;  %v2651_v19 = vunpack.c.h.b16 %v2646_v38 }
 0x795   : > { %v2411_v34 = vmul.f32 %v6430_v47, %v2404_v11  ;;  %v2412_v5 = vmul.f32 %v6430_v47, %v2405_v6  ;;  %v2648_v47 = vpop.permute.xlu1 %2647  ;;  %vm2655_vm9 = vcmp.ne.s32.totalorder %v2651_v19, %v5668_v36 }
 0x796   : > { %v2649_v26 = vsel %vm7839_vm12, %v2646_v38, %v2648_v47 }
 0x797   : > { %v2418_v37 = vadd.f32 %v2416_v33, %v2411_v34  ;;  %v2419_v24 = vadd.f32 %v2416_v33, %v2412_v5  ;;  %v3048_v33 = vunpack.c.l.b16 %v6449_v8  ;;  %v2459_v8 = vunpack.c.l.b16 %v6397_v45 }
 0x798   : > { %v2657_v6 = vunpack.c.l.b16 %v2649_v26  ;;  %v2658_v34 = vunpack.c.h.b16 %v2649_v26 }
 0x799   : > { %v2420_v15 = vpack.c.bf16 %v2419_v24, %v2418_v37  ;;  %v3050_v37 = vpack.c.b16 %v3048_v33, %v3048_v33  ;;  %vm6495_vm3 = vcmp.ne.s32.totalorder %v2459_v8, %v5665_v35  ;;  %v2665_v33 = vunpack.c.h.b16 %v2648_v47 }
 0x79a   : > { %v2389_v48 = vpop.f32.mrf.mxu2  ;;  %v2402_v13 = vpop.f32.mrf.mxu3  ;;  %vm2661_vm7 = vcmp.ne.s32.totalorder %v2657_v6, %v5665_v35 }
 0x79b   : > { %v2423_v4 = vunpack.c.h.b16 %v2420_v15  ;;  %v2422_v7 = vunpack.c.l.b16 %v2420_v15  ;;  %v2567_v13 = vpop.permute.xlu0 %2566 }
 0x79c   : > { %v2572_v42 = vunpack.c.l.b16 %v2567_v13  ;;  %v2573_v38 = vunpack.c.h.b16 %v2567_v13 }
 0x79d   : > { %v2425_v61 = vpack.c.b16 %v2423_v4, %v2423_v4  ;;  %v2424_v25 = vpack.c.b16 %v2422_v7, %v2422_v7 }
 0x79f   : > { %2428 = vrot.lane.b32.xlu2 %v2425_v61, %s5507_s27  ;;  %2426 = vrot.lane.b32.xlu1 %v2424_v25, %s5507_s27  ;;  %v2664_v25 = vunpack.c.l.b16 %v2648_v47  ;;  %s5514_s27 = smov 5  }
 0x7a3   : > { %v2769_v47 = vpop.permute.xlu0 %2768 }
 0x7a4   : > { %v2775_v12 = vunpack.c.h.b16 %v2769_v47 }
 0x7a7   : > { %2847 = vrot.lane.b32.xlu2 %v6397_v45, %s7841_s17  ;;  %3074 = vrot.lane.b32.xlu1 %v6284_v62, %s5481_s20  ;;  %s5515_s17 = smov 14  }
 0x7af   : > { %3076 = vrot.lane.b32.xlu2 %v6184_v63, %s5481_s20  ;;  %2964 = vrot.lane.b32.xlu1 %v2565_v9, %s5506_s23  ;;  %s5508_s20 = smov 123   ;;  %v2569_v63 = vpop.permute.xlu1 %2568  ;;  %v2460_v9 = vunpack.c.h.b16 %v6397_v45  ;;  %s8024_s23 = smov 48  }
 0x7b0   : > { %v2571_v4 = vsel %vm2570_vm11, %v2567_v13, %v2569_v63  ;;  %v2586_v7 = vunpack.c.l.b16 %v2569_v63  ;;  %v2587_v61 = vunpack.c.h.b16 %v2569_v63  ;;  %v2774_v63 = vunpack.c.l.b16 %v2769_v47 }
 0x7b1   : > { %vm6500_vm8 = vcmp.ne.s32.totalorder %v2460_v9, %v5668_v36  ;;  %v2579_v8 = vunpack.c.l.b16 %v2571_v4  ;;  %v2580_v9 = vunpack.c.h.b16 %v2571_v4 }
 0x7b2   : > { %vm2465_vm10 = vmpackc.low %vm6500_vm8, %vm6495_vm3  ;;  %vm8022_vm3 = vcmask 1043456   ;;  %vm2654_vm8 = vcmp.ne.s32.totalorder %v2650_v51, %v5665_v35  ;;  %vm2590_vm11 = vcmp.ne.s32.totalorder %v2586_v7, %v5665_v35 }
 0x7b7   : > { %3052 = vrot.lane.b32.xlu2 %v3050_v37, %s5492_s26  ;;  %3184 = vrot.lane.b32.xlu1 %v5710_v58, %s8013_s30  ;;  %v6490_v44 = vpop.permute.xlu1 %2770  ;;  %s5509_s26 = smov 43  }
 0x7b8   : > { %v2773_v41 = vsel %vm2772_vm1, %v2769_v47, %v6490_v44  ;;  %v2788_v6 = vunpack.c.l.b16 %v6490_v44 }
 0x7b9   : > { %v2781_v51 = vunpack.c.l.b16 %v2773_v41  ;;  %v2782_v19 = vunpack.c.h.b16 %v2773_v41 }
 0x7ba   : > { %vm2792_vm1 = vcmp.ne.s32.totalorder %v2788_v6, %v5665_v35 }
 0x7bf   : > { %3186 = vrot.lane.b32.xlu2 %v5712_v59, %s8013_s30 }
 0x7f9   : > { %v2429_v31 = vpop.permute.xlu2 %2428 }
 0x7fa   : > { %v6484_v62 = vsel %vm2430_vm15, %v2429_v31, 0 }
 0x7fb   : > { %2481 = vrot.lane.b32.xlu1 %v6484_v62, %s5508_s20 }
 0x811   : > { %v2427_v32 = vpop.permute.xlu1 %2426 }
 0x812   : > { %v6524_v30 = vsel %vm2430_vm15, %v2427_v32, %v2429_v31  ;;  %v6527_v11 = vsel %vm2430_vm15, 0, %v2427_v32  ;;  %vm8023_vm15 = vmmov %vm8022_vm3 }
 0x813   : > { %2477 = vrot.lane.b32.xlu2 %v6527_v11, %s5508_s20  ;;  %2724 = vrot.lane.b32.xlu1 %v6524_v30, %s5509_s26  ;;  %v2473_v5 = vsel %vm2465_vm10, %v6527_v11, 0  ;;  %v2474_v24 = vsel %vm2472_vm13, %v6524_v30, 0  ;;  %vm2662_vm10 = vcmp.ne.s32.totalorder %v2658_v34, %v5668_v36  ;;  %vm2656_vm13 = vmpackc.low %vm2655_vm9, %vm2654_vm8  ;;  %vm2669_vm8 = vcmp.ne.s32.totalorder %v2665_v33, %v5668_v36 }
 0x814   : > { %2479 = vrot.lane.b32.xlu0 %v6524_v30, %s5508_s20  ;;  %v2525_v15 = vsel %vm8022_vm3, %v2473_v5, 0  ;;  %v2528_v48 = vsel %vm8023_vm15, %v2474_v24, 0  ;;  %vm2663_vm12 = vmpackc.low %vm2662_vm10, %vm2661_vm7  ;;  %v2671_v37 = vsel %vm2656_vm13, %v6527_v11, 0  ;;  %vm2591_vm3 = vcmp.ne.s32.totalorder %v2587_v61, %v5668_v36  ;;  %v2850_v5 = vpop.permute.xlu0 %2849  ;;  %v2848_v24 = vpop.permute.xlu2 %2847 }
 0x815   : > { %2537 = vmatpush.bf16.msra.mxu2 %v2525_v15  ;;  %2550 = vmatpush.bf16.msra.mxu3 %v2528_v48  ;;  %v2672_v31 = vsel %vm2663_vm12, %v6524_v30, 0  ;;  %vm2668_vm15 = vcmp.ne.s32.totalorder %v2664_v25, %v5665_v35  ;;  %vm2583_vm9 = vcmp.ne.s32.totalorder %v2579_v8, %v5665_v35  ;;  %vm2584_vm12 = vcmp.ne.s32.totalorder %v2580_v9, %v5668_v36  ;;  %vm2592_vm7 = vmpackc.low %vm2591_vm3, %vm2590_vm11 }
 0x816   : > { %vm2670_vm10 = vmpackc.low %vm2669_vm8, %vm2668_vm15  ;;  %v2595_v40 = vsel %vm2592_vm7, %v6484_v62, 0  ;;  %vm2778_vm11 = vcmp.ne.s32.totalorder %v2774_v63, %v5665_v35  ;;  %vm2779_vm3 = vcmp.ne.s32.totalorder %v2775_v12, %v5668_v36  ;;  %vm2576_vm15 = vcmp.ne.s32.totalorder %v2572_v42, %v5665_v35 }
 0x817   : > { %vm2585_vm13 = vmpackc.low %vm2584_vm12, %vm2583_vm9  ;;  %v2673_v45 = vsel %vm2670_vm10, %v6484_v62, 0  ;;  %vm2577_vm8 = vcmp.ne.s32.totalorder %v2573_v38, %v5668_v36  ;;  %vm2785_vm7 = vcmp.ne.s32.totalorder %v2781_v51, %v5665_v35  ;;  %vm2786_vm10 = vcmp.ne.s32.totalorder %v2782_v19, %v5668_v36 }
 0x818   : > { %v2594_v27 = vsel %vm2585_vm13, %v6524_v30, 0  ;;  %vm2780_vm9 = vmpackc.low %vm2779_vm3, %vm2778_vm11  ;;  %v2789_v34 = vunpack.c.h.b16 %v6490_v44  ;;  %v2853_v48 = vunpack.c.h.b16 %v2848_v24  ;;  %v2851_v61 = vsel %vm7849_vm4, %v2848_v24, %v2850_v5 }
 0x819   : > { %vm2578_vm12 = vmpackc.low %vm2577_vm8, %vm2576_vm15  ;;  %v2795_v26 = vsel %vm2780_vm9, %v6527_v11, 0  ;;  %v3075_v13 = vpop.permute.xlu1 %3074  ;;  %v2859_v8 = vunpack.c.l.b16 %v2851_v61  ;;  %v2860_v9 = vunpack.c.h.b16 %v2851_v61  ;;  %v8041_v12 = vperm.slane %v6042_v29, 0 }
 0x81a   : > { %v2593_v32 = vsel %vm2578_vm12, %v6527_v11, 0  ;;  %vm2787_vm13 = vmpackc.low %vm2786_vm10, %vm2785_vm7  ;;  %vm2793_vm11 = vcmp.ne.s32.totalorder %v2789_v34, %v5668_v36  ;;  %vm2857_vm8 = vcmp.ne.s32.totalorder %v2853_v48, %v5668_v36 }
 0x81b   : > { %2677 = vrot.lane.b32.xlu1 %v2671_v37, %s8024_s23  ;;  %2679 = vrot.lane.b32.xlu2 %v2672_v31, %s8024_s23  ;;  %v2796_v15 = vsel %vm2787_vm13, %v6524_v30, 0  ;;  %vm2794_vm3 = vmpackc.low %vm2793_vm11, %vm2792_vm1  ;;  %v3079_v37 = vunpack.c.l.b16 %v3075_v13  ;;  %v3080_v31 = vunpack.c.h.b16 %v3075_v13  ;;  %vm6612_vm1 = vcmp.ne.s32.totalorder %v2859_v8, %v5665_v35 }
 0x81c   : > { %2722 = vrot.lane.b32.xlu0 %v6527_v11, %s5509_s26  ;;  %v2852_v11 = vunpack.c.l.b16 %v2848_v24  ;;  %v2797_v44 = vsel %vm2794_vm3, %v6484_v62, 0  ;;  %v2963_v4 = vpop.permute.xlu0 %2962  ;;  %v3077_v7 = vpop.permute.xlu2 %3076  ;;  %vm6617_vm11 = vcmp.ne.s32.totalorder %v2860_v9, %v5668_v36  ;;  %vm8038_vm3 = vcmask 7168  }
 0x81d   : > { %v3093_v25 = vunpack.c.l.b16 %v3077_v7  ;;  %v3094_v33 = vunpack.c.h.b16 %v3077_v7  ;;  %vm6602_vm10 = vcmp.ne.s32.totalorder %v3079_v37, %v5665_v35  ;;  %vm6607_vm13 = vcmp.ne.s32.totalorder %v3080_v31, %v5668_v36 }
 0x81e   : > { %vm2856_vm15 = vcmp.ne.s32.totalorder %v2852_v11, %v5665_v35  ;;  %v3078_v51 = vsel %vm8038_vm3, %v3075_v13, %v3077_v7  ;;  %v2968_v19 = vunpack.c.l.b16 %v2963_v4 }
 0x81f   : > { %vm2858_vm9 = vmpackc.low %vm2857_vm8, %vm2856_vm15  ;;  %vm6590_vm12 = vcmp.ne.s32.totalorder %v3093_v25, %v5665_v35  ;;  %vm6595_vm7 = vcmp.ne.s32.totalorder %v3094_v33, %v5668_v36  ;;  %v3086_v5 = vunpack.c.l.b16 %v3078_v51  ;;  %v3087_v24 = vunpack.c.h.b16 %v3078_v51  ;;  %v2440_v51 = vld [vmem:[%s7772_s9] sm:$0xf] }
 0x820   : > { %v2866_v47 = vsel %vm2858_vm9, %v6524_v30, 0  ;;  %vm3099_vm15 = vmpackc.low %vm6595_vm7, %vm6590_vm12  ;;  %vm2966_vm12 = vcmask 343040   ;;  %vm2972_vm7 = vcmp.ne.s32.totalorder %v2968_v19, %v5665_v35 }
 0x821   : > { %v2965_v63 = vpop.permute.xlu1 %2964  ;;  %vm3085_vm8 = vmpackc.low %vm6607_vm13, %vm6602_vm10  ;;  %vm3090_vm13 = vcmp.ne.s32.totalorder %v3086_v5, %v5665_v35 }
 0x822   : > { %vm2865_vm9 = vmpackc.low %vm6617_vm11, %vm6612_vm1  ;;  %vm3091_vm1 = vcmp.ne.s32.totalorder %v3087_v24, %v5668_v36 }
 0x823   : > { %2603 = vrot.lane.b32.xlu2 %v2595_v40, %s5510_s28  ;;  %2601 = vrot.lane.b32.xlu1 %v2594_v27, %s5510_s28  ;;  %v2867_v48 = vsel %vm2865_vm9, %v6484_v62, 0  ;;  %vm3092_vm3 = vmpackc.low %vm3091_vm1, %vm3090_vm13 }
 0x824   : > { %2681 = vrot.lane.b32.xlu0 %v2673_v45, %s8024_s23  ;;  %v3055_v41 = vpop.permute.xlu0 %3054  ;;  %v8043_v45 = vperm.slane %v6042_v29, 4 }
 0x825   : > { %v6635_v6 = vsel %vm1993_vm14, %v3055_v41, 0 }
 0x829   : > { %v3185_v13 = vpop.permute.xlu1 %3184 }
 0x82a   : > { %v3189_v7 = vunpack.c.l.b16 %v3185_v13  ;;  %v3190_v61 = vunpack.c.h.b16 %v3185_v13 }
 0x82b   : > { %2726 = vrot.lane.b32.xlu2 %v6484_v62, %s5509_s26  ;;  %2801 = vrot.lane.b32.xlu1 %v2795_v26, %s5511_s19  ;;  %v3053_v26 = vpop.permute.xlu2 %3052  ;;  %s8042_s26 = smov 126  }
 0x82c   : > { %2599 = vrot.lane.b32.xlu0 %v2593_v32, %s5510_s28  ;;  %v2969_v32 = vunpack.c.h.b16 %v2963_v4  ;;  %v6638_v34 = vsel %vm1993_vm14, 0, %v3053_v26  ;;  %v6651_v37 = vsel %vm1993_vm14, %v3053_v26, %v3055_v41  ;;  %s8072_s28 = smov 125  }
 0x82d   : > { %v3100_v11 = vsel %vm3085_vm8, %v6638_v34, 0  ;;  %v3101_v8 = vsel %vm3092_vm3, %v6651_v37, 0  ;;  %vm3194_vm8 = vcmp.ne.s32.totalorder %v3190_v61, %v5668_v36 }
 0x82e   : > { %vm2973_vm10 = vcmp.ne.s32.totalorder %v2969_v32, %v5668_v36 }
 0x82f   : > { %vm2974_vm11 = vmpackc.low %vm2973_vm10, %vm2972_vm7 }
 0x830   : > { %v2982_v31 = vsel %vm2974_vm11, %v6524_v30, 0 }
 0x833   : > { %2803 = vrot.lane.b32.xlu2 %v2796_v15, %s5511_s19  ;;  %2918 = vrot.lane.b32.xlu1 %v6484_v62, %s5512_s25  ;;  %v3102_v15 = vsel %vm3099_vm15, %v6635_v6, 0  ;;  %v3187_v9 = vpop.permute.xlu2 %3186  ;;  %vm3193_vm15 = vcmp.ne.s32.totalorder %v3189_v7, %v5665_v35 }
 0x834   : > { %2916 = vrot.lane.b32.xlu0 %v6524_v30, %s5512_s25  ;;  %vm3195_vm7 = vmpackc.low %vm3194_vm8, %vm3193_vm15  ;;  %v3203_v38 = vunpack.c.l.b16 %v3187_v9  ;;  %v3204_v40 = vunpack.c.h.b16 %v3187_v9 }
 0x836   : > { %vm3207_vm3 = vcmp.ne.s32.totalorder %v3203_v38, %v5665_v35  ;;  %vm3208_vm15 = vcmp.ne.s32.totalorder %v3204_v40, %v5668_v36  ;;  %v2442_v40 = vld [vmem:[%s7772_s9 + $0x8] sm:$0xf] }
 0x837   : > { %vm3209_vm8 = vmpackc.low %vm3208_vm15, %vm3207_vm3  ;;  %vm2728_vm15 = vcmask 351232  }
 0x83b   : > { %2920 = vrot.lane.b32.xlu2 %v5479_v1, %s5512_s25  ;;  %3310 = vrot.lane.b32.xlu1 %v5658_v28, %s5500_s29  ;;  %s5520_s25 = smov 9  }
 0x83c   : > { %2805 = vrot.lane.b32.xlu0 %v2797_v44, %s5511_s19  ;;  %v2967_v44 = vsel %vm2966_vm12, %v2963_v4, %v2965_v63  ;;  %vm8040_vm12 = vcmask 15360   ;;  %v3210_v63 = vsel %vm3195_vm7, %v6638_v34, 0  ;;  %vm8046_vm7 = vcmask 1043456   ;;  %s8143_s19 = smov 32  }
 0x83d   : > { %v2975_v25 = vunpack.c.l.b16 %v2967_v44  ;;  %v2976_v33 = vunpack.c.h.b16 %v2967_v44  ;;  %v3188_v4 = vsel %vm8040_vm12, %v3185_v13, %v3187_v9  ;;  %vm2483_vm12 = vcmask 1006592   ;;  %v2441_v44 = vld [vmem:[%s7772_s9 + $0x4] sm:$0xf]  ;;  %vm8051_vm3 = vmmov %vm8046_vm7 }
 0x83e   : > { %v3196_v30 = vunpack.c.l.b16 %v3188_v4 }
 0x83f   : > { %vm2979_vm9 = vcmp.ne.s32.totalorder %v2975_v25, %v5665_v35  ;;  %vm2980_vm14 = vcmp.ne.s32.totalorder %v2976_v33, %v5668_v36 }
 0x840   : > { %vm2981_vm10 = vmpackc.low %vm2980_vm14, %vm2979_vm9  ;;  %vm3200_vm13 = vcmp.ne.s32.totalorder %v3196_v30, %v5665_v35  ;;  %vm8044_vm9 = vcmask 64512  }
 0x841   : > { %v2983_v42 = vsel %vm2981_vm10, %v6484_v62, 0  ;;  %v3212_v62 = vsel %vm3209_vm8, %v6635_v6, 0  ;;  %5325 = vmatmul.msk.bf16.vlgmr.msra.gmra.mxu2 %vm8044_vm9, %v2440_v51  ;;  %vm8045_vm14 = vmmov %vm8044_vm9  ;;  %vm2605_vm8 = vcmask 965632  }
 0x842   : > { %5326 = vmatmul.msk.bf16.vlgmr.msra.gmra.mxu3 %vm8045_vm14, %v2440_v51  ;;  %vm8047_vm10 = vmmov %vm8046_vm7 }
 0x843   : > { %2871 = vrot.lane.b32.xlu2 %v2866_v47, %s8025_s24  ;;  %2875 = vrot.lane.b32.xlu1 %v5479_v1, %s8025_s24  ;;  %v3197_v47 = vunpack.c.h.b16 %v3188_v4 }
 0x844   : > { %3308 = vrot.lane.b32.xlu0 %v5654_v20, %s5500_s29  ;;  %s8039_s29 = smov 127  }
 0x845   : > { %vm3201_vm1 = vcmp.ne.s32.totalorder %v3197_v47, %v5668_v36 }
 0x846   : > { %vm3202_vm11 = vmpackc.low %vm3201_vm1, %vm3200_vm13 }
 0x847   : > { %v3211_v27 = vsel %vm3202_vm11, %v6651_v37, 0  ;;  %vm8048_vm13 = vmmov %vm8044_vm9  ;;  %vm8050_vm11 = vcmask 392192  }
 0x848   : > { %vm8049_vm1 = vmmov %vm8044_vm9 }
 0x849   : > { %vm8052_vm9 = vmmov %vm8049_vm1 }
 0x84a   : > { %vm8053_vm14 = vmmov %vm8050_vm11 }
 0x84b   : > { %3110 = vrot.lane.b32.xlu1 %v3102_v15, %s8039_s29  ;;  %3106 = vrot.lane.b32.xlu2 %v3100_v11, %s8039_s29 }
 0x84c   : > { %2873 = vrot.lane.b32.xlu0 %v2867_v48, %s8025_s24 }
 0x853   : > { %2990 = vrot.lane.b32.xlu1 %v5479_v1, %s5513_s0  ;;  %2986 = vrot.lane.b32.xlu2 %v2982_v31, %s5513_s0  ;;  %v2443_v31 = vld [vmem:[%s7772_s9 + $0xc] sm:$0xf] }
 0x854   : > { %3108 = vrot.lane.b32.xlu0 %v3101_v8, %s8039_s29 }
 0x85b   : > { %3385 = vrot.lane.b32.xlu2 %v8041_v12, %s5514_s27  ;;  %3216 = vrot.lane.b32.xlu1 %v3210_v63, %s8042_s26 }
 0x85c   : > { %2988 = vrot.lane.b32.xlu0 %v2983_v42, %s5513_s0  ;;  %s8078_s0 = smov 122  }
 0x863   : > { %3218 = vrot.lane.b32.xlu2 %v3211_v27, %s8042_s26 }
 0x864   : > { %3387 = vrot.lane.b32.xlu0 %v8043_v45, %s5514_s27  ;;  %s8067_s27 = smov 124  }
 0x86c   : > { %3220 = vrot.lane.b32.xlu0 %v3212_v62, %s8042_s26 }
 0x86d   : > { %v2478_v41 = vpop.permute.xlu2 %2477  ;;  %v2482_v29 = vpop.permute.xlu1 %2481 }
 0x875   : > { %v2680_v26 = vpop.permute.xlu2 %2679 }
 0x87d   : > { %v2604_v19 = vpop.permute.xlu2 %2603 }
 0x885   : > { %v2725_v32 = vpop.permute.xlu1 %2724  ;;  %v2727_v11 = vpop.permute.xlu2 %2726 }
 0x886   : > { %v2480_v5 = vpop.permute.xlu0 %2479  ;;  %v2730_v9 = vsel %vm2728_vm15, %v2725_v32, %v2727_v11 }
 0x887   : > { %v2484_v24 = vsel %vm2483_vm12, %v2478_v41, %v2480_v5  ;;  %v2485_v15 = vsel %vm2483_vm12, %v2480_v5, %v2482_v29  ;;  %v2445_v5 = vld [vmem:[%s7772_s9 + $0x14] sm:$0xf] }
 0x888   : > { %v2490_v48 = vsel %vm8046_vm7, %v2484_v24, 0  ;;  %v2493_v13 = vsel %vm8047_vm10, %v2485_v15, 0  ;;  %vm8054_vm7 = vmmov %vm8051_vm3 }
 0x889   : > { %2502 = vmatpush.bf16.msra.mxu0 %v2490_v48  ;;  %2515 = vmatpush.bf16.msra.mxu1 %v2493_v13  ;;  %vm8055_vm10 = vmmov %vm8051_vm3 }
 0x88c   : > { %5324 = vmatmul.msk.bf16.vlgmr.msra.gmra.mxu1 %vm8048_vm13, %v2441_v44  ;;  %5323 = vmatmul.msk.bf16.vlgmr.msra.gmra.mxu0 %vm8049_vm1, %v2441_v44  ;;  %vm8056_vm13 = vmmov %vm8051_vm3  ;;  %vm2807_vm1 = vcmask 310272   ;;  %v2444_v44 = vld [vmem:[%s7772_s9 + $0x10] sm:$0xf] }
 0x88d   : > { %v2678_v7 = vpop.permute.xlu1 %2677  ;;  %v2804_v8 = vpop.permute.xlu2 %2803  ;;  %v2738_v38 = vsel %vm8056_vm13, %v2730_v9, 0 }
 0x88e   : > { %v2723_v61 = vpop.permute.xlu0 %2722  ;;  %v2683_v25 = vsel %vm8050_vm11, %v2678_v7, %v2680_v26  ;;  %vm8057_vm11 = vmmov %vm8052_vm9 }
 0x88f   : > { %v2689_v33 = vsel %vm8051_vm3, %v2683_v25, 0  ;;  %vm8058_vm3 = vmmov %vm8052_vm9  ;;  %v2729_v62 = vsel %vm2728_vm15, %v2723_v61, %v2725_v32  ;;  %vm2922_vm15 = vcmask 744448  }
 0x890   : > { %2701 = vmatpush.bf16.msrb.mxu2 %v2689_v33  ;;  %v2735_v24 = vsel %vm8054_vm7, %v2729_v62, 0  ;;  %vm8062_vm13 = vmmov %vm8058_vm3 }
 0x893   : > { %5329 = vmatmul.msk.bf16.vlgmr.msrb.gmra.mxu2 %vm8052_vm9, %v2443_v31  ;;  %vm8059_vm9 = vmmov %vm8054_vm7 }
 0x895   : > { %v2602_v4 = vpop.permute.xlu1 %2601  ;;  %v2921_v27 = vpop.permute.xlu2 %2920 }
 0x896   : > { %v2682_v30 = vpop.permute.xlu0 %2681  ;;  %v2607_v47 = vsel %vm2605_vm8, %v2602_v4, %v2604_v19 }
 0x897   : > { %v2684_v63 = vsel %vm8053_vm14, %v2680_v26, %v2682_v30  ;;  %v2615_v12 = vsel %vm8054_vm7, %v2607_v47, 0  ;;  %vm8060_vm14 = vmmov %vm8054_vm7  ;;  %v2447_v47 = vld [vmem:[%s7772_s9 + $0x1c] sm:$0xf] }
 0x898   : > { %v2692_v42 = vsel %vm8055_vm10, %v2684_v63, 0  ;;  %2637 = vmatpush.bf16.msrb.mxu1 %v2615_v12  ;;  %vm8061_vm10 = vmmov %vm8058_vm3 }
 0x899   : > { %2714 = vmatpush.bf16.msrb.mxu3 %v2692_v42 }
 0x89c   : > { %2760 = vmatpush.bf16.msra.mxu1 %v2738_v38  ;;  %5330 = vmatmul.msk.bf16.vlgmr.msrb.gmra.mxu3 %vm8058_vm3, %v2443_v31 }
 0x89d   : > { %5328 = vmatmul.msk.bf16.vlgmr.msrb.gmra.mxu1 %vm8057_vm11, %v2442_v40  ;;  %v2802_v45 = vpop.permute.xlu1 %2801  ;;  %v2872_v32 = vpop.permute.xlu2 %2871  ;;  %vm8064_vm11 = vmmov %vm8058_vm3 }
 0x89e   : > { %v2600_v41 = vpop.permute.xlu0 %2599  ;;  %v2808_v26 = vsel %vm2807_vm1, %v2802_v45, %v2804_v8  ;;  %vm8065_vm3 = vmmov %vm8054_vm7 }
 0x89f   : > { %v2606_v51 = vsel %vm2605_vm8, %v2600_v41, %v2602_v4  ;;  %v2814_v29 = vsel %vm8059_vm9, %v2808_v26, 0  ;;  %vm8063_vm8 = vmmov %vm8054_vm7 }
 0x8a0   : > { %v2612_v19 = vsel %vm8060_vm14, %v2606_v51, 0  ;;  %2826 = vmatpush.bf16.msra.mxu2 %v2814_v29  ;;  %vm8066_vm7 = vmmov %vm8065_vm3 }
 0x8a1   : > { %2624 = vmatpush.bf16.msrb.mxu0 %v2612_v19 }
 0x8a3   : > { %5333 = vmatmul.msk.bf16.vlgmr.msra.gmra.mxu2 %vm8061_vm10, %v2445_v5 }
 0x8a4   : > { %5327 = vmatmul.msk.bf16.vlgmr.msrb.gmra.mxu0 %vm8062_vm13, %v2442_v40 }
 0x8a5   : > { %2747 = vmatpush.bf16.msra.mxu0 %v2735_v24  ;;  %v2919_v15 = vpop.permute.xlu1 %2918  ;;  %v3107_v9 = vpop.permute.xlu2 %3106 }
 0x8a6   : > { %v2917_v11 = vpop.permute.xlu0 %2916  ;;  %v2924_v61 = vsel %vm2922_vm15, %v2919_v15, %v2921_v27 }
 0x8a7   : > { %v2923_v48 = vsel %vm2922_vm15, %v2917_v11, %v2919_v15  ;;  %v2932_v63 = vsel %vm8066_vm7, %v2924_v61, 0 }
 0x8a8   : > { %v2929_v13 = vsel %vm8063_vm8, %v2923_v48, 0  ;;  %vm8071_vm8 = vcmask 31744   ;;  %v2446_v48 = vld [vmem:[%s7772_s9 + $0x18] sm:$0xf] }
 0x8a9   : > { %2941 = vmatpush.bf16.msrb.mxu2 %v2929_v13 }
 0x8ad   : > { %5332 = vmatmul.msk.bf16.vlgmr.msra.gmra.mxu1 %vm8064_vm11, %v2444_v44  ;;  %v3311_v7 = vpop.permute.xlu1 %3310  ;;  %v2987_v41 = vpop.permute.xlu2 %2986 }
 0x8ae   : > { %v2806_v25 = vpop.permute.xlu0 %2805  ;;  %v3327_v33 = vunpack.c.l.b16 %v3311_v7  ;;  %v3328_v31 = vunpack.c.h.b16 %v3311_v7 }
 0x8af   : > { %v2809_v4 = vsel %vm2807_vm1, %v2804_v8, %v2806_v25  ;;  %vm8068_vm1 = vmmov %vm8064_vm11 }
 0x8b0   : > { %v2817_v30 = vsel %vm8065_vm3, %v2809_v4, 0  ;;  %vm3331_vm9 = vcmp.ne.s32.totalorder %v3327_v33, %v5665_v35  ;;  %vm3332_vm14 = vcmp.ne.s32.totalorder %v3328_v31, %v5668_v36  ;;  %vm8069_vm15 = vmmov %vm8068_vm1 }
 0x8b1   : > { %2839 = vmatpush.bf16.msra.mxu3 %v2817_v30  ;;  %vm3333_vm10 = vmpackc.low %vm3332_vm14, %vm3331_vm9 }
 0x8b2   : > { %v3336_v12 = vsel %vm3333_vm10, %v6635_v6, 0  ;;  %vm8070_vm13 = vmmov %vm8068_vm1 }
 0x8b3   : > { %3344 = vrot.lane.b32.xlu0 %v3336_v12, %s8067_s27  ;;  %5337 = vmatmul.msk.bf16.vlgmr.msrb.gmra.mxu2 %vm8068_vm1, %v2447_v47  ;;  %vm8073_vm1 = vcmask 785408  }
 0x8b4   : > { %5331 = vmatmul.msk.bf16.vlgmr.msra.gmra.mxu0 %vm8069_vm15, %v2444_v44  ;;  %5334 = vmatmul.msk.bf16.vlgmr.msra.gmra.mxu3 %vm8070_vm13, %v2445_v5  ;;  %vm8074_vm15 = vmmov %vm8073_vm1  ;;  %vm8075_vm13 = vcmask 1043456  }
 0x8b5   : > { %2954 = vmatpush.bf16.msrb.mxu3 %v2932_v63  ;;  %v2876_v8 = vpop.permute.xlu1 %2875 }
 0x8b6   : > { %v3309_v42 = vpop.permute.xlu0 %3308 }
 0x8b7   : > { %v3312_v38 = vsel %vm8071_vm8, %v3309_v42, %v3311_v7  ;;  %v3313_v40 = vunpack.c.l.b16 %v3309_v42  ;;  %v3314_v27 = vunpack.c.h.b16 %v3309_v42  ;;  %vm8076_vm8 = vmmov %vm8075_vm13 }
 0x8b8   : > { %v3320_v45 = vunpack.c.l.b16 %v3312_v38  ;;  %v3321_v62 = vunpack.c.h.b16 %v3312_v38 }
 0x8b9   : > { %vm3317_vm11 = vcmp.ne.s32.totalorder %v3313_v40, %v5665_v35  ;;  %vm3318_vm3 = vcmp.ne.s32.totalorder %v3314_v27, %v5668_v36 }
 0x8ba   : > { %vm3319_vm9 = vmpackc.low %vm3318_vm3, %vm3317_vm11  ;;  %vm3324_vm14 = vcmp.ne.s32.totalorder %v3320_v45, %v5665_v35  ;;  %vm3325_vm7 = vcmp.ne.s32.totalorder %v3321_v62, %v5668_v36  ;;  %vm8079_vm3 = vcmask 64512  }
 0x8bb   : > { %v3334_v26 = vsel %vm3319_vm9, %v6638_v34, 0  ;;  %3267 = vrot.lane.b32.xlu0 %v6635_v6, %s8072_s28  ;;  %vm3326_vm10 = vmpackc.low %vm3325_vm7, %vm3324_vm14  ;;  %vm8082_vm7 = vcmask 1039360  }
 0x8bc   : > { %3340 = vrot.lane.b32.xlu1 %v3334_v26, %s8067_s27  ;;  %v3335_v51 = vsel %vm3326_vm10, %v6651_v37, 0  ;;  %vm8077_vm11 = vmpackc.low %vm5959_vm6, %vm5954_vm0 }
 0x8bd   : > { %3342 = vrot.lane.b32.xlu2 %v3335_v51, %s8067_s27  ;;  %v3111_v29 = vpop.permute.xlu1 %3110  ;;  %v3465_v13 = vsel %vm8077_vm11, %v6635_v6, 0  ;;  %vm8080_vm9 = vmmov %vm8079_vm3  ;;  %s8139_s27 = smov 112  }
 0x8be   : > { %v2874_v19 = vpop.permute.xlu0 %2873  ;;  %vm8081_vm14 = vmmov %vm8079_vm3 }
 0x8bf   : > { %v2877_v5 = vsel %vm8073_vm1, %v2872_v32, %v2874_v19  ;;  %v2878_v24 = vsel %vm8074_vm15, %v2874_v19, %v2876_v8  ;;  %v3386_v32 = vpop.permute.xlu2 %3385  ;;  %vm8083_vm0 = vmmov %vm8082_vm7  ;;  %vm8086_vm1 = vnez %v7895_v23  ;;  %v729_v19 = vld [vmem:[%s7777_s14 + $0x30] sm:$0xff] }
 0x8c0   : > { %v2883_v15 = vsel %vm8075_vm13, %v2877_v5, 0  ;;  %v2886_v11 = vsel %vm8076_vm8, %v2878_v24, 0  ;;  %vm8084_vm6 = vmmov %vm8076_vm8  ;;  %v3391_v33 = vunpack.c.l.b16 %v3386_v32  ;;  %v3392_v31 = vunpack.c.h.b16 %v3386_v32 }
 0x8c1   : > { %2895 = vmatpush.bf16.msrb.mxu0 %v2883_v15  ;;  %2908 = vmatpush.bf16.msrb.mxu1 %v2886_v11  ;;  %vm8085_vm10 = vmmov %vm8084_vm6  ;;  %vm8088_vm13 = vnez %v7905_v2  ;;  %vm8089_vm8 = vnez %v7903_v39 }
 0x8c2   : > { %vm8087_vm15 = vmpackc.low %vm5919_vm2, %vm8086_vm1  ;;  %vm6793_vm2 = vcmp.ne.s32.totalorder %v3392_v31, %v5668_v36  ;;  %vm8100_vm1 = vnez %v7891_v55  ;;  %v2448_v55 = vld [vmem:[%s7772_s9 + $0x20] sm:$0xf] }
 0x8c3   : > { %3473 = vrot.lane.b32.xlu0 %v3465_v13, %s8078_s0  ;;  %v3463_v4 = vsel %vm8087_vm15, %v6638_v34, 0  ;;  %vm8090_vm11 = vmpackc.low %vm8088_vm13, %vm8089_vm8  ;;  %vm8102_vm13 = vcmask 1043456   ;;  %v3065_v13 = vld [vmem:[%s7773_s10] sm:$0xf] }
 0x8c4   : > { %3263 = vrot.lane.b32.xlu1 %v6638_v34, %s8072_s28  ;;  %5335 = vmatmul.msk.bf16.vlgmr.msrb.gmra.mxu0 %vm8079_vm3, %v2446_v48  ;;  %vm2992_vm3 = vcmask 703488   ;;  %vm8103_vm8 = vmmov %vm8102_vm13 }
 0x8c5   : > { %3265 = vrot.lane.b32.xlu2 %v6651_v37, %s8072_s28  ;;  %v2991_v44 = vpop.permute.xlu1 %2990  ;;  %5336 = vmatmul.msk.bf16.vlgmr.msrb.gmra.mxu1 %vm8080_vm9, %v2446_v48  ;;  %vm6788_vm9 = vcmp.ne.s32.totalorder %v3391_v33, %v5665_v35  ;;  %v739_v48 = vld [vmem:[%s7778_s15 + $0x30] sm:$0xff]  ;;  %s8142_s28 = smov 64  }
 0x8c6   : > { %v3109_v7 = vpop.permute.xlu0 %3108  ;;  %5338 = vmatmul.msk.bf16.vlgmr.msrb.gmra.mxu3 %vm8081_vm14, %v2447_v47  ;;  %vm8095_vm14 = vcmask 1031168  }
 0x8c7   : > { %v3112_v57 = vsel %vm8082_vm7, %v3107_v9, %v3109_v7  ;;  %v3113_v60 = vsel %vm8083_vm0, %v3109_v7, %v3111_v29  ;;  %v3464_v9 = vsel %vm8090_vm11, %v6651_v37, 0  ;;  %v3219_v30 = vpop.permute.xlu2 %3218  ;;  %vm8096_vm7 = vnez %v7889_v22  ;;  %vm8104_vm11 = vmmov %vm8103_vm8 }
 0x8c8   : > { %v3118_v61 = vsel %vm8084_vm6, %v3112_v57, 0  ;;  %v3121_v25 = vsel %vm8085_vm10, %v3113_v60, 0  ;;  %vm8097_vm0 = vnez %v7887_v49  ;;  %vm8099_vm10 = vnez %v7893_v56  ;;  %v2539_v60 = vpop.f32.mrf.mxu2 }
 0x8c9   : > { %3130 = vmatpush.bf16.msra.mxu2 %v3118_v61  ;;  %3143 = vmatpush.bf16.msra.mxu3 %v3121_v25  ;;  %vm8098_vm6 = vmpackc.low %vm8096_vm7, %vm8097_vm0  ;;  %v2552_v25 = vpop.f32.mrf.mxu3 }
 0x8ca   : > { %v3072_v63 = vsel %vm8098_vm6, %v6638_v34, 0  ;;  %vm8101_vm15 = vmpackc.low %vm8099_vm10, %vm8100_vm1  ;;  %vm8107_vm6 = vcmask 64512  }
 0x8cb   : > { %v3073_v12 = vsel %vm8101_vm15, %v6651_v37, 0  ;;  %vm8105_vm7 = vmmov %vm8103_vm8 }
 0x8cc   : > { %3469 = vrot.lane.b32.xlu1 %v3463_v4, %s8078_s0  ;;  %v3153_v49 = vsel %vm8105_vm7, %v3072_v63, 0  ;;  %vm8106_vm0 = vmmov %vm8105_vm7 }
 0x8cd   : > { %3471 = vrot.lane.b32.xlu2 %v3464_v9, %s8078_s0  ;;  %v3217_v47 = vpop.permute.xlu1 %3216  ;;  %v3156_v22 = vsel %vm8106_vm0, %v3073_v12, 0  ;;  %vm8111_vm7 = vmmov %vm8107_vm6  ;;  %s8185_s0 = smov 16  }
 0x8ce   : > { %v2989_v2 = vpop.permute.xlu0 %2988  ;;  %v3222_v39 = vsel %vm8095_vm14, %v3217_v47, %v3219_v30  ;;  %vm3397_vm14 = vmpackc.low %vm6793_vm2, %vm6788_vm9 }
 0x8cf   : > { %v2993_v8 = vsel %vm2992_vm3, %v2987_v41, %v2989_v2  ;;  %v2994_v42 = vsel %vm2992_vm3, %v2989_v2, %v2991_v44  ;;  %v3228_v38 = vsel %vm8102_vm13, %v3222_v39, 0  ;;  %v3412_v56 = vsel %vm3397_vm14, %v6638_v34, 0  ;;  %vm8108_vm9 = vmmov %vm8107_vm6 }
 0x8d0   : > { %v2999_v40 = vsel %vm8103_vm8, %v2993_v8, 0  ;;  %v3002_v27 = vsel %vm8104_vm11, %v2994_v42, 0  ;;  %3240 = vmatpush.bf16.msrb.mxu2 %v3228_v38  ;;  %vm3389_vm3 = vcmask 39936   ;;  %vm8109_vm11 = vcmask 1031168   ;;  %vm8110_vm14 = vmmov %vm8106_vm0  ;;  %v2541_v47 = vpop.f32.mrf.mxu2 }
 0x8d1   : > { %3011 = vmatpush.bf16.msra.mxu0 %v2999_v40  ;;  %3024 = vmatpush.bf16.msra.mxu1 %v3002_v27  ;;  %vm8112_vm0 = vmmov %vm8107_vm6  ;;  %v2554_v23 = vpop.f32.mrf.mxu3 }
 0x8d4   : > { %3418 = vrot.lane.b32.xlu1 %v3412_v56, %s5508_s20  ;;  %5339 = vmatmul.msk.bf16.vlgmr.msra.gmra.mxu0 %vm8107_vm6, %v2448_v55  ;;  %vm8114_vm6 = vmmov %vm8112_vm0 }
 0x8d5   : > { %3165 = vmatpush.bf16.msrb.mxu0 %v3153_v49  ;;  %3178 = vmatpush.bf16.msrb.mxu1 %v3156_v22  ;;  %v3068_v22 = vld [vmem:[%s7773_s10 + $0xc] sm:$0xf] }
 0x8d6   : > { %5340 = vmatmul.msk.bf16.vlgmr.msra.gmra.mxu1 %vm8108_vm9, %v2448_v55  ;;  %v3388_v45 = vpop.permute.xlu0 %3387  ;;  %vm8115_vm9 = vmmov %vm8112_vm0 }
 0x8d7   : > { %v3390_v62 = vsel %vm3389_vm3, %v3386_v32, %v3388_v45  ;;  %v3405_v41 = vunpack.c.l.b16 %v3388_v45  ;;  %v3406_v26 = vunpack.c.h.b16 %v3388_v45  ;;  %vm8113_vm3 = vmmov %vm8112_vm0 }
 0x8d8   : > { %v3398_v51 = vunpack.c.l.b16 %v3390_v62  ;;  %v3399_v29 = vunpack.c.h.b16 %v3390_v62 }
 0x8d9   : > { %vm3409_vm2 = vcmp.ne.s32.totalorder %v3405_v41, %v5665_v35  ;;  %vm3410_vm10 = vcmp.ne.s32.totalorder %v3406_v26, %v5668_v36 }
 0x8da   : > { %vm3411_vm1 = vmpackc.low %vm3410_vm10, %vm3409_vm2  ;;  %vm3402_vm15 = vcmp.ne.s32.totalorder %v3398_v51, %v5665_v35  ;;  %vm3403_vm13 = vcmp.ne.s32.totalorder %v3399_v29, %v5668_v36 }
 0x8db   : > { %v3414_v34 = vsel %vm3411_vm1, %v6635_v6, 0  ;;  %vm3404_vm8 = vmpackc.low %vm3403_vm13, %vm3402_vm15  ;;  %v3066_v6 = vld [vmem:[%s7773_s10 + $0x4] sm:$0xf]  ;;  %vm8119_vm15 = vcmask 1022976  }
 0x8dc   : > { %3516 = vperm.xlu1 %5469, %v729_v19   ;;  %3422 = vrot.lane.b32.xlu0 %v3414_v34, %s5508_s20  ;;  %v3413_v5 = vsel %vm3404_vm8, %v6651_v37, 0  ;;  %v3067_v37 = vld [vmem:[%s7773_s10 + $0x8] sm:$0xf]  ;;  %vm8116_vm2 = vmmov %vm8112_vm0 }
 0x8dd   : > { %3420 = vrot.lane.b32.xlu2 %v3413_v5, %s5508_s20  ;;  %5341 = vmatmul.msk.bf16.vlgmr.msra.gmra.mxu2 %vm8111_vm7, %v3066_v6  ;;  %vm8117_vm10 = vmmov %vm8110_vm14  ;;  %s5518_s20 = smov 114  }
 0x8de   : > { %v3221_v24 = vpop.permute.xlu0 %3220  ;;  %5342 = vmatmul.msk.bf16.vlgmr.msra.gmra.mxu3 %vm8112_vm0, %v3066_v6  ;;  %vm8118_vm1 = vmmov %vm8112_vm0  ;;  %v3071_v6 = vld [vmem:[%s7773_s10 + $0x18] sm:$0xf] }
 0x8df   : > { %v3223_v15 = vsel %vm8109_vm11, %v3219_v30, %v3221_v24  ;;  %vm8120_vm13 = vmmov %vm8117_vm10 }
 0x8e0   : > { %v3231_v11 = vsel %vm8110_vm14, %v3223_v15, 0  ;;  %vm8121_vm8 = vmmov %vm8117_vm10 }
 0x8e1   : > { %3253 = vmatpush.bf16.msrb.mxu3 %v3231_v11  ;;  %vm8122_vm11 = vmmov %vm8112_vm0 }
 0x8e2   : > { %vm8123_vm14 = vmmov %vm8112_vm0 }
 0x8e3   : > { %vm8125_vm7 = vmmov %vm8121_vm8 }
 0x8e4   : > { %5343 = vmatmul.msk.bf16.vlgmr.msrb.gmra.mxu0 %vm8115_vm9, %v3065_v13  ;;  %vm8126_vm0 = vmmov %vm8119_vm15 }
 0x8e5   : > { %3523 = vperm.xlu2 %5470, %v739_v48   ;;  %vm8129_vm9 = vmmov %vm8118_vm1 }
 0x8e6   : > { %5344 = vmatmul.msk.bf16.vlgmr.msrb.gmra.mxu1 %vm8116_vm2, %v3065_v13 }
 0x8ed   : > { %5345 = vmatmul.msk.bf16.vlgmr.msrb.gmra.mxu2 %vm8113_vm3, %v3067_v37  ;;  %vm8127_vm3 = vmmov %vm8125_vm7 }
 0x8ee   : > { %5346 = vmatmul.msk.bf16.vlgmr.msrb.gmra.mxu3 %vm8114_vm6, %v3067_v37  ;;  %vm8128_vm6 = vmmov %vm8118_vm1 }
 0x909   : > { %v2504_v32 = vpop.f32.mrf.mxu0  ;;  %v2517_v44 = vpop.f32.mrf.mxu1 }
 0x90a   : > { %v2540_v62 = vadd.f32 %v2539_v60, %v2504_v32  ;;  %v2553_v41 = vadd.f32 %v2552_v25, %v2517_v44 }
 0x911   : > { %v2506_v7 = vpop.f32.mrf.mxu0  ;;  %v2519_v57 = vpop.f32.mrf.mxu1 }
 0x916   : > { %v2703_v27 = vpop.f32.mrf.mxu2 }
 0x917   : > { %v3343_v61 = vpop.permute.xlu2 %3342 }
 0x91a   : > { %v2639_v31 = vpop.f32.mrf.mxu1 }
 0x91b   : > { %v2644_v5 = vadd.f32 %v2639_v31, %v2553_v41 }
 0x91e   : > { %v2705_v11 = vpop.f32.mrf.mxu2 }
 0x91f   : > { %v3266_v63 = vpop.permute.xlu2 %3265  ;;  %v2716_v55 = vpop.f32.mrf.mxu3 }
 0x920   : > { %v2721_v13 = vadd.f32 %v2716_v55, %v2644_v5 }
 0x921   : > { %v2626_v33 = vpop.f32.mrf.mxu0 }
 0x922   : > { %v2641_v39 = vpop.f32.mrf.mxu1  ;;  %v2643_v34 = vadd.f32 %v2626_v33, %v2540_v62 }
 0x924   : > { %v2720_v37 = vadd.f32 %v2703_v27, %v2643_v34 }
 0x925   : > { %v3345_v4 = vpop.permute.xlu0 %3344 }
 0x926   : > { %v3347_v9 = vsel %vm2116_vm5, %v3343_v61, %v3345_v4  ;;  %v2828_v33 = vpop.f32.mrf.mxu2 }
 0x927   : > { %v3355_v30 = vsel %vm8117_vm10, %v3347_v9, 0  ;;  %v3472_v26 = vpop.permute.xlu2 %3471  ;;  %v2718_v32 = vpop.f32.mrf.mxu3  ;;  %vm8131_vm10 = vmmov %vm8127_vm3 }
 0x928   : > { %3377 = vmatpush.bf16.msra.mxu3 %v3355_v30 }
 0x929   : > { %v2628_v2 = vpop.f32.mrf.mxu0 }
 0x92a   : > { %v2762_v45 = vpop.f32.mrf.mxu1 }
 0x92b   : > { %5350 = vmatmul.msk.bf16.vlgmr.msra.gmra.mxu3 %vm8118_vm1, %v3069_v50  ;;  %v2767_v60 = vadd.f32 %v2762_v45, %v2721_v13 }
 0x92d   : > { %v3268_v12 = vpop.permute.xlu0 %3267 }
 0x92e   : > { %v3270_v8 = vsel %vm8119_vm15, %v3266_v63, %v3268_v12  ;;  %v3341_v42 = vpop.permute.xlu1 %3340  ;;  %vm8132_vm15 = vmmov %vm8127_vm3 }
 0x92f   : > { %v3278_v38 = vsel %vm8120_vm13, %v3270_v8, 0  ;;  %v3346_v40 = vsel %vm2116_vm5, %v3341_v42, %v3343_v61  ;;  %vm8124_vm5 = vcmask 998400   ;;  %v2830_v8 = vpop.f32.mrf.mxu2  ;;  %vm8133_vm13 = vmmov %vm8118_vm1 }
 0x930   : > { %v3352_v49 = vsel %vm8121_vm8, %v3346_v40, 0  ;;  %3300 = vmatpush.bf16.msra.mxu1 %v3278_v38  ;;  %vm8130_vm2 = vmmov %vm8124_vm5  ;;  %v3070_v40 = vld [vmem:[%s7773_s10 + $0x14] sm:$0xf] }
 0x931   : > { %3364 = vmatpush.bf16.msra.mxu2 %v3352_v49  ;;  %v2749_v56 = vpop.f32.mrf.mxu0  ;;  %vm8134_vm8 = vmmov %vm8127_vm3 }
 0x932   : > { %v2764_v7 = vpop.f32.mrf.mxu1  ;;  %v2766_v57 = vadd.f32 %v2749_v56, %v2720_v37 }
 0x933   : > { %5348 = vmatmul.msk.bf16.vlgmr.msra.gmra.mxu1 %vm8122_vm11, %v3068_v22  ;;  %vm8135_vm11 = vmmov %vm8118_vm1 }
 0x934   : > { %5349 = vmatmul.msk.bf16.vlgmr.msra.gmra.mxu2 %vm8123_vm14, %v3069_v50  ;;  %v2845_v4 = vadd.f32 %v2828_v33, %v2766_v57 }
 0x935   : > { %v3474_v51 = vpop.permute.xlu0 %3473 }
 0x936   : > { %v3476_v29 = vsel %vm8124_vm5, %v3472_v26, %v3474_v51  ;;  %v3264_v19 = vpop.permute.xlu1 %3263 }
 0x937   : > { %v3484_v24 = vsel %vm8125_vm7, %v3476_v29, 0  ;;  %v3269_v15 = vsel %vm8126_vm0, %v3264_v19, %v3266_v63  ;;  %v2841_v9 = vpop.f32.mrf.mxu3  ;;  %v3421_v39 = vpop.permute.xlu2 %3420  ;;  %vm8140_vm7 = vmmov %vm8127_vm3 }
 0x938   : > { %v3275_v48 = vsel %vm8127_vm3, %v3269_v15, 0  ;;  %3506 = vmatpush.bf16.msrb.mxu3 %v3484_v24  ;;  %v2846_v30 = vadd.f32 %v2841_v9, %v2767_v60  ;;  %v2943_v56 = vpop.f32.mrf.mxu2  ;;  %vm8141_vm0 = vmmov %vm8127_vm3 }
 0x939   : > { %3287 = vmatpush.bf16.msra.mxu0 %v3275_v48  ;;  %v2751_v44 = vpop.f32.mrf.mxu0  ;;  %vm8144_vm3 = vmmov %vm8118_vm1 }
 0x93b   : > { %5354 = vmatmul.msk.bf16.vlgmr.msrb.gmra.mxu3 %vm8128_vm6, %v3071_v6  ;;  %vm8145_vm6 = vmmov %vm8118_vm1 }
 0x93c   : > { %5347 = vmatmul.msk.bf16.vlgmr.msra.gmra.mxu0 %vm8129_vm9, %v3068_v22  ;;  %vm8146_vm9 = vcmask 916480  }
 0x93e   : > { %v3470_v61 = vpop.permute.xlu1 %3469 }
 0x93f   : > { %v3475_v25 = vsel %vm8130_vm2, %v3470_v61, %v3472_v26  ;;  %v2843_v38 = vpop.f32.mrf.mxu3  ;;  %vm8147_vm2 = vmmov %vm8146_vm9 }
 0x940   : > { %v3481_v31 = vsel %vm8131_vm10, %v3475_v25, 0  ;;  %v2945_v5 = vpop.f32.mrf.mxu2  ;;  %vm8148_vm10 = vmmov %vm8141_vm0 }
 0x941   : > { %3493 = vmatpush.bf16.msrb.mxu2 %v3481_v31  ;;  %v2897_v47 = vpop.f32.mrf.mxu0 }
 0x942   : > { %v2914_v50 = vadd.f32 %v2897_v47, %v2845_v4  ;;  %v2910_v23 = vpop.f32.mrf.mxu1 }
 0x943   : > { %v2915_v2 = vadd.f32 %v2910_v23, %v2846_v30 }
 0x944   : > { %5353 = vmatmul.msk.bf16.vlgmr.msrb.gmra.mxu2 %vm8118_vm1, %v3071_v6  ;;  %v2960_v62 = vadd.f32 %v2943_v56, %v2914_v50  ;;  %vm8149_vm1 = vmmov %vm8141_vm0 }
 0x946   : > { %v3419_v63 = vpop.permute.xlu1 %3418 }
 0x947   : > { %v3424_v12 = vsel %vm2483_vm12, %v3419_v63, %v3421_v39 }
 0x948   : > { %v3430_v42 = vsel %vm8132_vm15, %v3424_v12, 0  ;;  %vm8150_vm15 = vmmov %vm8144_vm3 }
 0x949   : > { %3442 = vmatpush.bf16.msrb.mxu0 %v3430_v42  ;;  %v2899_v27 = vpop.f32.mrf.mxu0  ;;  %v2956_v41 = vpop.f32.mrf.mxu3 }
 0x94a   : > { %v2912_v49 = vpop.f32.mrf.mxu1  ;;  %v2961_v26 = vadd.f32 %v2956_v41, %v2915_v2 }
 0x94c   : > { %5351 = vmatmul.msk.bf16.vlgmr.msrb.gmra.mxu0 %vm8133_vm13, %v3070_v40  ;;  %vm8151_vm13 = vmmov %vm8144_vm3 }
 0x94e   : > { %v3423_v22 = vpop.permute.xlu0 %3422  ;;  %v3517_v5 = vpop.permute.xlu1 %3516 }
 0x94f   : > { %v3425_v55 = vsel %vm2483_vm12, %v3421_v39, %v3423_v22  ;;  %vm8136_vm12 = vcmask 392192  }
 0x950   : > { %v3433_v45 = vsel %vm8134_vm8, %v3425_v55, 0  ;;  %vm8137_vm14 = vmmov %vm8136_vm12  ;;  %vm8152_vm8 = vcmask 785408  }
 0x951   : > { %3455 = vmatpush.bf16.msrb.mxu1 %v3433_v45  ;;  %v3013_v51 = vpop.f32.mrf.mxu0  ;;  %v2958_v24 = vpop.f32.mrf.mxu3  ;;  %vm8138_vm5 = vmmov %vm8136_vm12 }
 0x952   : > { %v6892_v29 = vadd.f32 %v3013_v51, %v2960_v62 }
 0x953   : > { %v3026_v19 = vpop.f32.mrf.mxu1 }
 0x954   : > { %v6894_v34 = vadd.f32 %v3026_v19, %v2961_v26  ;;  %5352 = vmatmul.msk.bf16.vlgmr.msrb.gmra.mxu1 %vm8135_vm11, %v3070_v40  ;;  %vm8153_vm11 = vmmov %vm8152_vm8 }
 0x959   : > { %v3015_v15 = vpop.f32.mrf.mxu0 }
 0x95b   : > { %v3028_v11 = vpop.f32.mrf.mxu1 }
 0x960   : > { %v3132_v48 = vpop.f32.mrf.mxu2 }
 0x961   : > { %v3145_v6 = vpop.f32.mrf.mxu3  ;;  %v3167_v32 = vpop.f32.mrf.mxu0 }
 0x962   : > { %v3168_v7 = vadd.f32 %v3167_v32, %v3132_v48  ;;  %v3524_v48 = vpop.permute.xlu2 %3523 }
 0x963   : > { %v3180_v44 = vpop.f32.mrf.mxu1 }
 0x964   : > { %v3181_v57 = vadd.f32 %v3180_v44, %v3145_v6 }
 0x968   : > { %v3134_v37 = vpop.f32.mrf.mxu2 }
 0x969   : > { %v3147_v13 = vpop.f32.mrf.mxu3  ;;  %v3169_v31 = vpop.f32.mrf.mxu0 }
 0x96b   : > { %v3182_v4 = vpop.f32.mrf.mxu1 }
 0x970   : > { %v3242_v60 = vpop.f32.mrf.mxu2 }
 0x971   : > { %v3255_v61 = vpop.f32.mrf.mxu3  ;;  %v3259_v25 = vadd.f32 %v3242_v60, %v3168_v7 }
 0x972   : > { %v3260_v33 = vadd.f32 %v3255_v61, %v3181_v57 }
 0x978   : > { %v3244_v9 = vpop.f32.mrf.mxu2 }
 0x979   : > { %v3257_v30 = vpop.f32.mrf.mxu3 }
 0x9ae   : > { %v3379_v47 = vpop.f32.mrf.mxu3 }
 0x9b0   : > { %v3302_v50 = vpop.f32.mrf.mxu1 }
 0x9b1   : > { %v3307_v55 = vadd.f32 %v3302_v50, %v3260_v33  ;;  %v740_v50 = vld [vmem:[%s7778_s15 + $0x38] sm:$0xff] }
 0x9b3   : > { %v3384_v62 = vadd.f32 %v3379_v47, %v3307_v55  ;;  %v730_v47 = vld [vmem:[%s7777_s14 + $0x38] sm:$0xff] }
 0x9b6   : > { %v3381_v23 = vpop.f32.mrf.mxu3 }
 0x9b7   : > { %v3366_v2 = vpop.f32.mrf.mxu2  ;;  %v3544_v23 = vld [vmem:[%s7774_s11] sm:$0xf] }
 0x9b8   : > { %v3304_v39 = vpop.f32.mrf.mxu1 }
 0x9b9   : > { %v3289_v63 = vpop.f32.mrf.mxu0 }
 0x9ba   : > { %v3306_v38 = vadd.f32 %v3289_v63, %v3259_v25 }
 0x9bc   : > { %v3383_v22 = vadd.f32 %v3366_v2, %v3306_v38 }
 0x9be   : > { %v3508_v12 = vpop.f32.mrf.mxu3 }
 0x9bf   : > { %v3368_v8 = vpop.f32.mrf.mxu2 }
 0x9c1   : > { %v3291_v42 = vpop.f32.mrf.mxu0 }
 0x9c6   : > { %v3510_v40 = vpop.f32.mrf.mxu3 }
 0x9c7   : > { %v3495_v27 = vpop.f32.mrf.mxu2 }
 0x9c9   : > { %v3444_v49 = vpop.f32.mrf.mxu0 }
 0x9ca   : > { %v3461_v56 = vadd.f32 %v3444_v49, %v3383_v22 }
 0x9cc   : > { %v3512_v41 = vadd.f32 %v3495_v27, %v3461_v56  ;;  %v3545_v27 = vld [vmem:[%s7774_s11 + $0x4] sm:$0xf] }
 0x9ce   : > { %v3519_v24 = vmul.f32 %v3517_v5, %v3512_v41 }
 0x9cf   : > { %v3497_v45 = vpop.f32.mrf.mxu2 }
 0x9d0   : > { %v3526_v6 = vadd.f32 %v3524_v48, %v3519_v24 }
 0x9d1   : > { %v3457_v26 = vpop.f32.mrf.mxu1  ;;  %v3446_v51 = vpop.f32.mrf.mxu0 }
 0x9d2   : > { %v3462_v19 = vadd.f32 %v3457_v26, %v3384_v62 }
 0x9d4   : > { %v3513_v15 = vadd.f32 %v3508_v12, %v3462_v19 }
 0x9d6   : > { %v3520_v11 = vmul.f32 %v3517_v5, %v3513_v15 }
 0x9d8   : > { %v3527_v37 = vadd.f32 %v3524_v48, %v3520_v11  ;;  %v3546_v11 = vld [vmem:[%s7774_s11 + $0x8] sm:$0xf] }
 0x9d9   : > { %v3459_v13 = vpop.f32.mrf.mxu1 }
 0x9da   : > { %v3528_v32 = vpack.c.bf16 %v3527_v37, %v3526_v6  ;;  %v3547_v6 = vld [vmem:[%s7774_s11 + $0xc] sm:$0xf] }
 0x9dc   : > { %v3531_v44 = vunpack.c.h.b16 %v3528_v32  ;;  %v3530_v7 = vunpack.c.l.b16 %v3528_v32 }
 0x9de   : > { %v3533_v57 = vpack.c.b16 %v3531_v44, %v3531_v44  ;;  %v3532_v60 = vpack.c.b16 %v3530_v7, %v3530_v7 }
 0x9e0   : > { %3536 = vrot.lane.b32.xlu1 %v3533_v57, %s8024_s23  ;;  %3534 = vrot.lane.b32.xlu0 %v3532_v60, %s8024_s23 }
 0xa52   : > { %v3537_v61 = vpop.permute.xlu1 %3536  ;;  %v3535_v25 = vpop.permute.xlu0 %3534 }
 0xa53   : > { %v3543_v33 = vsel %vm8136_vm12, %v3537_v61, 0  ;;  %v3538_v31 = vsel %vm8137_vm14, %v3535_v25, %v3537_v61  ;;  %v3541_v4 = vsel %vm8138_vm5, 0, %v3535_v25  ;;  %vm8154_vm12 = vmmov %vm8141_vm0  ;;  %vm8156_vm5 = vcmask 654336  }
 0xa54   : > { %3557 = vrot.lane.b32.xlu1 %v3543_v33, %s8139_s27  ;;  %3553 = vrot.lane.b32.xlu2 %v3541_v4, %s8139_s27  ;;  %v3599_v9 = vsel %vm8140_vm7, %v3541_v4, 0  ;;  %v3602_v30 = vsel %vm8141_vm0, %v3538_v31, 0  ;;  %vm8155_vm14 = vmmov %vm8141_vm0 }
 0xa55   : > { %3555 = vrot.lane.b32.xlu0 %v3538_v31, %s8139_s27  ;;  %3611 = vmatpush.bf16.msra.mxu2 %v3599_v9  ;;  %vm8157_vm7 = vmmov %vm8156_vm5 }
 0xa56   : > { %3624 = vmatpush.bf16.msra.mxu3 %v3602_v30  ;;  %v3548_v30 = vld [vmem:[%s7774_s11 + $0x10] sm:$0xf] }
 0xa58   : > { %5357 = vmatmul.msk.bf16.vlgmr.msra.gmra.mxu2 %vm8144_vm3, %v3544_v23  ;;  %vm8158_vm3 = vmmov %vm8141_vm0 }
 0xa59   : > { %5358 = vmatmul.msk.bf16.vlgmr.msra.gmra.mxu3 %vm8145_vm6, %v3544_v23 }
 0xa5c   : > { %3634 = vrot.lane.b32.xlu1 %v3543_v33, %s8025_s24  ;;  %3630 = vrot.lane.b32.xlu2 %v3541_v4, %s8025_s24 }
 0xa5d   : > { %3632 = vrot.lane.b32.xlu0 %v3538_v31, %s8025_s24 }
 0xa64   : > { %3679 = vrot.lane.b32.xlu1 %v3543_v33, %s5496_s18  ;;  %3675 = vrot.lane.b32.xlu2 %v3541_v4, %s5496_s18 }
 0xa65   : > { %3677 = vrot.lane.b32.xlu0 %v3538_v31, %s5496_s18  ;;  %s7843_s18 = smov 110  }
 0xa6c   : > { %3724 = vrot.lane.b32.xlu1 %v3543_v33, %s8142_s28  ;;  %3720 = vrot.lane.b32.xlu2 %v3541_v4, %s8142_s28 }
 0xa6d   : > { %3722 = vrot.lane.b32.xlu0 %v3538_v31, %s8142_s28  ;;  %s5516_s28 = smov 119  }
 0xa74   : > { %3769 = vrot.lane.b32.xlu1 %v3543_v33, %s8024_s23  ;;  %3765 = vrot.lane.b32.xlu2 %v3541_v4, %s8024_s23 }
 0xa75   : > { %3767 = vrot.lane.b32.xlu0 %v3538_v31, %s8024_s23  ;;  %s5517_s23 = smov 121  }
 0xa7c   : > { %3814 = vrot.lane.b32.xlu1 %v3543_v33, %s8143_s19  ;;  %3810 = vrot.lane.b32.xlu2 %v3541_v4, %s8143_s19 }
 0xa7d   : > { %3812 = vrot.lane.b32.xlu0 %v3538_v31, %s8143_s19 }
 0xa84   : > { %3857 = vperm.xlu2 %5470, %v730_v47   ;;  %v3549_v47 = vld [vmem:[%s7774_s11 + $0x14] sm:$0xf] }
 0xa85   : > { %3864 = vperm.xlu0 %5468, %v740_v50  }
 0xaae   : > { %v3554_v2 = vpop.permute.xlu2 %3553 }
 0xab6   : > { %v3631_v63 = vpop.permute.xlu2 %3630 }
 0xabe   : > { %v3676_v45 = vpop.permute.xlu2 %3675 }
 0xac6   : > { %v3558_v39 = vpop.permute.xlu1 %3557  ;;  %v3721_v48 = vpop.permute.xlu2 %3720 }
 0xac7   : > { %v3556_v12 = vpop.permute.xlu0 %3555 }
 0xac8   : > { %v3559_v8 = vsel %vm8146_vm9, %v3554_v2, %v3556_v12  ;;  %v3560_v42 = vsel %vm8147_vm2, %v3556_v12, %v3558_v39  ;;  %vm8159_vm9 = vmmov %vm8145_vm6 }
 0xac9   : > { %v3565_v38 = vsel %vm8148_vm10, %v3559_v8, 0  ;;  %v3568_v40 = vsel %vm8149_vm1, %v3560_v42, 0  ;;  %vm8160_vm2 = vmmov %vm8145_vm6  ;;  %vm8162_vm1 = vcmask 523264   ;;  %v3550_v42 = vld [vmem:[%s7774_s11 + $0x18] sm:$0xf] }
 0xaca   : > { %3577 = vmatpush.bf16.msra.mxu0 %v3565_v38  ;;  %3590 = vmatpush.bf16.msra.mxu1 %v3568_v40  ;;  %vm8161_vm10 = vmmov %vm8160_vm2 }
 0xacd   : > { %5355 = vmatmul.msk.bf16.vlgmr.msra.gmra.mxu0 %vm8150_vm15, %v3545_v27  ;;  %5356 = vmatmul.msk.bf16.vlgmr.msra.gmra.mxu1 %vm8151_vm13, %v3545_v27  ;;  %vm8163_vm15 = vmmov %vm8162_vm1 }
 0xace   : > { %v3635_v49 = vpop.permute.xlu1 %3634  ;;  %vm8164_vm13 = vmmov %vm8141_vm0  ;;  %v3766_v60 = vpop.permute.xlu2 %3765 }
 0xacf   : > { %v3633_v22 = vpop.permute.xlu0 %3632 }
 0xad0   : > { %v3636_v55 = vsel %vm8152_vm8, %v3631_v63, %v3633_v22  ;;  %v3637_v56 = vsel %vm8153_vm11, %v3633_v22, %v3635_v49  ;;  %vm8165_vm8 = vmmov %vm8141_vm0  ;;  %vm8166_vm11 = vcmask 392192  }
 0xad1   : > { %v3642_v62 = vsel %vm8154_vm12, %v3636_v55, 0  ;;  %v3645_v41 = vsel %vm8155_vm14, %v3637_v56, 0  ;;  %vm8167_vm12 = vmmov %vm8166_vm11 }
 0xad2   : > { %3654 = vmatpush.bf16.msrb.mxu0 %v3642_v62  ;;  %3667 = vmatpush.bf16.msrb.mxu1 %v3645_v41  ;;  %vm8168_vm14 = vmmov %vm8141_vm0 }
 0xad6   : > { %v3680_v26 = vpop.permute.xlu1 %3679  ;;  %v3811_v23 = vpop.permute.xlu2 %3810 }
 0xad7   : > { %v3678_v51 = vpop.permute.xlu0 %3677 }
 0xad8   : > { %v3681_v19 = vsel %vm8156_vm5, %v3676_v45, %v3678_v51  ;;  %v3682_v5 = vsel %vm8157_vm7, %v3678_v51, %v3680_v26  ;;  %vm8169_vm5 = vmmov %vm8141_vm0 }
 0xad9   : > { %v3687_v24 = vsel %vm8141_vm0, %v3681_v19, 0  ;;  %v3690_v15 = vsel %vm8158_vm3, %v3682_v5, 0  ;;  %vm8170_vm7 = vmmov %vm8160_vm2 }
 0xada   : > { %3699 = vmatpush.bf16.msrb.mxu2 %v3687_v24  ;;  %3712 = vmatpush.bf16.msrb.mxu3 %v3690_v15  ;;  %vm8171_vm0 = vmmov %vm8160_vm2 }
 0xadb   : > { %vm8172_vm3 = vmmov %vm8171_vm0  ;;  %v3613_v38 = vpop.f32.mrf.mxu2 }
 0xadc   : > { %v3626_v40 = vpop.f32.mrf.mxu3 }
 0xadd   : > { %5359 = vmatmul.msk.bf16.vlgmr.msrb.gmra.mxu0 %vm8145_vm6, %v3546_v11  ;;  %5360 = vmatmul.msk.bf16.vlgmr.msrb.gmra.mxu1 %vm8159_vm9, %v3546_v11  ;;  %vm8173_vm6 = vmmov %vm8171_vm0 }
 0xade   : > { %v3725_v37 = vpop.permute.xlu1 %3724  ;;  %5361 = vmatmul.msk.bf16.vlgmr.msrb.gmra.mxu2 %vm8160_vm2, %v3547_v6  ;;  %5362 = vmatmul.msk.bf16.vlgmr.msrb.gmra.mxu3 %vm8161_vm10, %v3547_v6  ;;  %vm8174_vm9 = vmmov %vm8169_vm5 }
 0xadf   : > { %v3723_v13 = vpop.permute.xlu0 %3722  ;;  %vm8175_vm2 = vmmov %vm8169_vm5 }
 0xae0   : > { %v3726_v32 = vsel %vm8162_vm1, %v3721_v48, %v3723_v13  ;;  %v3727_v44 = vsel %vm8163_vm15, %v3723_v13, %v3725_v37  ;;  %vm8176_vm10 = vmmov %vm8171_vm0  ;;  %vm4005_vm15 = vcmp.lt.s32.totalorder %v5643_v14, 9 }
 0xae1   : > { %v3732_v7 = vsel %vm8164_vm13, %v3726_v32, 0  ;;  %v3735_v57 = vsel %vm8165_vm8, %v3727_v44, 0  ;;  %vm8177_vm1 = vmmov %vm8171_vm0  ;;  %vm4006_vm13 = vcmp.lt.s32.totalorder %v5649_v18, 9 }
 0xae2   : > { %3744 = vmatpush.bf16.msra.mxu0 %v3732_v7  ;;  %3757 = vmatpush.bf16.msra.mxu1 %v3735_v57  ;;  %vm4011_vm8 = vmpackc.low %vm4006_vm13, %vm4005_vm15  ;;  %vm4019_vm15 = vcmask 113664  }
 0xae3   : > { %v3615_v27 = vpop.f32.mrf.mxu2  ;;  %v4012_v22 = vsel %vm4011_vm8, 65537, %v5479_v1 }
 0xae4   : > { %v3628_v49 = vpop.f32.mrf.mxu3  ;;  %v6990_v55 = vperm.slane %v4012_v22, 0 }
 0xae6   : > { %v3770_v61 = vpop.permute.xlu1 %3769  ;;  %4015 = vrot.lane.b32.xlu0 %v6990_v55, %s5515_s17 }
 0xae7   : > { %v3768_v25 = vpop.permute.xlu0 %3767 }
 0xae8   : > { %v3771_v33 = vsel %vm8166_vm11, %v3766_v60, %v3768_v25  ;;  %v3772_v31 = vsel %vm8167_vm12, %v3768_v25, %v3770_v61  ;;  %vm3898_vm11 = vcmp.ge.s32.totalorder %v5643_v14, 7  ;;  %vm3899_vm12 = vcmp.ge.s32.totalorder %v5649_v18, 7 }
 0xae9   : > { %v3777_v4 = vsel %vm8168_vm14, %v3771_v33, 0  ;;  %v3780_v9 = vsel %vm8169_vm5, %v3772_v31, 0  ;;  %vm3904_vm14 = vmpackc.low %vm3899_vm12, %vm3898_vm11  ;;  %vm3879_vm5 = vcmask 973824  }
 0xaea   : > { %3789 = vmatpush.bf16.msra.mxu2 %v3777_v4  ;;  %3802 = vmatpush.bf16.msra.mxu3 %v3780_v9  ;;  %v3905_v62 = vsel %vm3904_vm14, 65537, %v5479_v1 }
 0xaeb   : > { %v6997_v41 = vperm.slane %v3905_v62, 4 }
 0xaed   : > { %5363 = vmatmul.msk.bf16.vlgmr.msra.gmra.mxu0 %vm8170_vm7, %v3548_v30  ;;  %5364 = vmatmul.msk.bf16.vlgmr.msra.gmra.mxu1 %vm8171_vm0, %v3548_v30 }
 0xaee   : > { %v3815_v50 = vpop.permute.xlu1 %3814  ;;  %5365 = vmatmul.msk.bf16.vlgmr.msra.gmra.mxu2 %vm8172_vm3, %v3549_v47  ;;  %5366 = vmatmul.msk.bf16.vlgmr.msra.gmra.mxu3 %vm8173_vm6, %v3549_v47 }
 0xaef   : > { %v3813_v2 = vpop.permute.xlu0 %3812  ;;  %4096 = vrot.lane.b32.xlu0 %v6997_v41, %s8139_s27 }
 0xaf0   : > { %v3816_v39 = vsel %vm7849_vm4, %v3811_v23, %v3813_v2  ;;  %v3817_v63 = vsel %vm7849_vm4, %v3813_v2, %v3815_v50 }
 0xaf1   : > { %v3822_v12 = vsel %vm8174_vm9, %v3816_v39, 0  ;;  %v3825_v8 = vsel %vm8175_vm2, %v3817_v63, 0 }
 0xaf2   : > { %3834 = vmatpush.bf16.msrb.mxu0 %v3822_v12  ;;  %3847 = vmatpush.bf16.msrb.mxu1 %v3825_v8  ;;  %v3858_v8 = vpop.permute.xlu2 %3857 }
 0xafd   : > { %5367 = vmatmul.msk.bf16.vlgmr.msrb.gmra.mxu0 %vm8176_vm10, %v3550_v42  ;;  %5368 = vmatmul.msk.bf16.vlgmr.msrb.gmra.mxu1 %vm8177_vm1, %v3550_v42  ;;  %vm8178_vm10 = vcmask 1043456  }
 0xafe   : > { %vm8179_vm1 = vmmov %vm8178_vm10 }
 0xb4a   : > { %v3579_v56 = vpop.f32.mrf.mxu0  ;;  %v3592_v45 = vpop.f32.mrf.mxu1 }
 0xb4b   : > { %v3614_v13 = vadd.f32 %v3613_v38, %v3579_v56  ;;  %v3627_v32 = vadd.f32 %v3626_v40, %v3592_v45  ;;  %v3865_v40 = vpop.permute.xlu0 %3864 }
 0xb52   : > { %v3581_v26 = vpop.f32.mrf.mxu0  ;;  %v3594_v51 = vpop.f32.mrf.mxu1 }
 0xb5a   : > { %v3656_v19 = vpop.f32.mrf.mxu0  ;;  %v3669_v5 = vpop.f32.mrf.mxu1 }
 0xb5b   : > { %v3673_v61 = vadd.f32 %v3656_v19, %v3614_v13  ;;  %v3674_v25 = vadd.f32 %v3669_v5, %v3627_v32 }
 0xb61   : > { %v3701_v24 = vpop.f32.mrf.mxu2  ;;  %v3714_v15 = vpop.f32.mrf.mxu3 }
 0xb62   : > { %v3658_v11 = vpop.f32.mrf.mxu0  ;;  %v3671_v14 = vpop.f32.mrf.mxu1  ;;  %v3718_v33 = vadd.f32 %v3701_v24, %v3673_v61  ;;  %v3719_v31 = vadd.f32 %v3714_v15, %v3674_v25  ;;  %v7001_v15 = vperm.slane %v4012_v22, 4 }
 0xb63   : > { %v3906_v11 = vperm.slane %v3905_v62, 0 }
 0xb65   : > { %v3908_v22 = vunpack.c.l.b16 %v3906_v11  ;;  %v3909_v62 = vunpack.c.h.b16 %v3906_v11 }
 0xb67   : > { %vm3912_vm7 = vcmp.ne.s32.totalorder %v3908_v22, %v5665_v35  ;;  %vm3913_vm0 = vcmp.ne.s32.totalorder %v3909_v62, %v5668_v36 }
 0xb68   : > { %vm3914_vm9 = vmpackc.low %vm3913_vm0, %vm3912_vm7 }
 0xb69   : > { %v3703_v48 = vpop.f32.mrf.mxu2  ;;  %v3716_v18 = vpop.f32.mrf.mxu3 }
 0xb6a   : > { %v3746_v6 = vpop.f32.mrf.mxu0  ;;  %v3759_v37 = vpop.f32.mrf.mxu1  ;;  %v3915_v18 = vunpack.c.l.b16 %v6997_v41 }
 0xb6b   : > { %v3763_v4 = vadd.f32 %v3746_v6, %v3718_v33  ;;  %v3764_v9 = vadd.f32 %v3759_v37, %v3719_v31  ;;  %v3916_v6 = vunpack.c.h.b16 %v6997_v41 }
 0xb6c   : > { %vm3919_vm3 = vcmp.ne.s32.totalorder %v3915_v18, %v5665_v35 }
 0xb6d   : > { %vm3920_vm6 = vcmp.ne.s32.totalorder %v3916_v6, %v5668_v36 }
 0xb6e   : > { %vm3921_vm2 = vmpackc.low %vm3920_vm6, %vm3919_vm3  ;;  %vm8184_vm6 = vcmask 916480  }
 0xb71   : > { %v3791_v44 = vpop.f32.mrf.mxu2  ;;  %v3804_v7 = vpop.f32.mrf.mxu3 }
 0xb72   : > { %v3748_v57 = vpop.f32.mrf.mxu0  ;;  %v3761_v60 = vpop.f32.mrf.mxu1  ;;  %v3808_v30 = vadd.f32 %v3791_v44, %v3763_v4  ;;  %v3809_v47 = vadd.f32 %v3804_v7, %v3764_v9 }
 0xb73   : > { %v4016_v57 = vpop.permute.xlu0 %4015 }
 0xb74   : > { %v4021_v25 = vunpack.c.l.b16 %v4016_v57  ;;  %v4022_v33 = vunpack.c.h.b16 %v4016_v57 }
 0xb76   : > { %vm7032_vm13 = vcmp.ne.s32.totalorder %v4021_v25, %v5665_v35  ;;  %vm7037_vm8 = vcmp.ne.s32.totalorder %v4022_v33, %v5668_v36 }
 0xb77   : > { %vm4027_vm7 = vmpackc.low %vm7037_vm8, %vm7032_vm13 }
 0xb79   : > { %v3793_v50 = vpop.f32.mrf.mxu2  ;;  %v3806_v23 = vpop.f32.mrf.mxu3 }
 0xb7a   : > { %v3836_v2 = vpop.f32.mrf.mxu0  ;;  %v3849_v39 = vpop.f32.mrf.mxu1 }
 0xb7b   : > { %v3853_v63 = vadd.f32 %v3836_v2, %v3808_v30  ;;  %v3854_v12 = vadd.f32 %v3849_v39, %v3809_v47 }
 0xb7d   : > { %v3860_v42 = vmul.f32 %v3858_v8, %v3853_v63  ;;  %v3861_v38 = vmul.f32 %v3858_v8, %v3854_v12 }
 0xb7f   : > { %v3867_v27 = vadd.f32 %v3865_v40, %v3860_v42  ;;  %v3868_v49 = vadd.f32 %v3865_v40, %v3861_v38  ;;  %v4097_v38 = vpop.permute.xlu0 %4096 }
 0xb81   : > { %v3869_v56 = vpack.c.bf16 %v3868_v49, %v3867_v27  ;;  %v4113_v27 = vunpack.c.l.b16 %v4097_v38  ;;  %v4114_v49 = vunpack.c.h.b16 %v4097_v38 }
 0xb82   : > { %v3838_v45 = vpop.f32.mrf.mxu0  ;;  %v3851_v26 = vpop.f32.mrf.mxu1 }
 0xb83   : > { %v3872_v51 = vunpack.c.h.b16 %v3869_v56  ;;  %v3871_v19 = vunpack.c.l.b16 %v3869_v56 }
 0xb85   : > { %v3874_v5 = vpack.c.b16 %v3872_v51, %v3872_v51  ;;  %v3873_v24 = vpack.c.b16 %v3871_v19, %v3871_v19 }
 0xb87   : > { %3877 = vrot.lane.b32.xlu2 %v3874_v5, %s5516_s28  ;;  %3875 = vrot.lane.b32.xlu1 %v3873_v24, %s5516_s28 }
 0xb8f   : > { %4017 = vrot.lane.b32.xlu1 %v7001_v15, %s5515_s17  ;;  %4094 = vrot.lane.b32.xlu2 %v3906_v11, %s8139_s27  ;;  %s8204_s17 = smov 18  }
 0xb97   : > { %4294 = vrot.lane.b32.xlu1 %v3906_v11, %s8025_s24 }
 0xbe1   : > { %v3878_v14 = vpop.permute.xlu2 %3877 }
 0xbe2   : > { %v7008_v48 = vsel %vm3879_vm5, %v3878_v14, 0 }
 0xbe3   : > { %3930 = vrot.lane.b32.xlu0 %v7008_v48, %s5517_s23 }
 0xbe9   : > { %v4095_v12 = vpop.permute.xlu2 %4094 }
 0xbea   : > { %v4099_v8 = vunpack.c.l.b16 %v4095_v12  ;;  %v4100_v42 = vunpack.c.h.b16 %v4095_v12  ;;  %v4098_v40 = vsel %vm8184_vm6, %v4095_v12, %v4097_v38  ;;  %vm8187_vm6 = vcmask 785408  }
 0xbeb   : > { %4217 = vrot.lane.b32.xlu0 %v6990_v55, %s8042_s26  ;;  %v4106_v45 = vunpack.c.l.b16 %v4098_v40  ;;  %v4107_v26 = vunpack.c.h.b16 %v4098_v40 }
 0xbed   : > { %vm4110_vm13 = vcmp.ne.s32.totalorder %v4106_v45, %v5665_v35  ;;  %vm4111_vm8 = vcmp.ne.s32.totalorder %v4107_v26, %v5668_v36 }
 0xbf9   : > { %v3876_v37 = vpop.permute.xlu1 %3875 }
 0xbfa   : > { %v7020_v13 = vsel %vm3879_vm5, %v3876_v37, %v3878_v14  ;;  %v7023_v32 = vsel %vm3879_vm5, 0, %v3876_v37 }
 0xbfb   : > { %3926 = vrot.lane.b32.xlu1 %v7023_v32, %s5517_s23  ;;  %3928 = vrot.lane.b32.xlu2 %v7020_v13, %s5517_s23  ;;  %v3922_v44 = vsel %vm3914_vm9, %v7023_v32, 0  ;;  %v3923_v7 = vsel %vm3921_vm2, %v7020_v13, 0  ;;  %vm4103_vm9 = vcmp.ne.s32.totalorder %v4099_v8, %v5665_v35  ;;  %vm4104_vm2 = vcmp.ne.s32.totalorder %v4100_v42, %v5668_v36  ;;  %s7845_s23 = smov 18  }
 0xbfc   : > { %v3974_v60 = vsel %vm8178_vm10, %v3922_v44, 0  ;;  %v3977_v61 = vsel %vm8179_vm1, %v3923_v7, 0  ;;  %vm4105_vm10 = vmpackc.low %vm4104_vm2, %vm4103_vm9  ;;  %vm4117_vm1 = vcmp.ne.s32.totalorder %v4113_v27, %v5665_v35 }
 0xbfd   : > { %3986 = vmatpush.bf16.msra.mxu0 %v3974_v60  ;;  %3999 = vmatpush.bf16.msra.mxu1 %v3977_v61 }
 0xc01   : > { %v4018_v31 = vpop.permute.xlu1 %4017 }
 0xc02   : > { %v4020_v9 = vsel %vm4019_vm15, %v4016_v57, %v4018_v31  ;;  %v4035_v30 = vunpack.c.l.b16 %v4018_v31  ;;  %v4036_v47 = vunpack.c.h.b16 %v4018_v31  ;;  %vm4118_vm15 = vcmp.ne.s32.totalorder %v4114_v49, %v5668_v36  ;;  %v3890_v31 = vld [vmem:[%s7775_s12 + $0x4] sm:$0xf] }
 0xc03   : > { %v4028_v23 = vunpack.c.l.b16 %v4020_v9  ;;  %v4029_v2 = vunpack.c.h.b16 %v4020_v9  ;;  %4219 = vrot.lane.b32.xlu1 %v7001_v15, %s8042_s26  ;;  %4296 = vrot.lane.b32.xlu2 %v6997_v41, %s8025_s24  ;;  %v4042_v41 = vsel %vm4027_vm7, %v7023_v32, 0 }
 0xc04   : > { %vm4039_vm11 = vcmp.ne.s32.totalorder %v4035_v30, %v5665_v35  ;;  %vm4040_vm12 = vcmp.ne.s32.totalorder %v4036_v47, %v5668_v36 }
 0xc05   : > { %vm4032_vm14 = vcmp.ne.s32.totalorder %v4028_v23, %v5665_v35  ;;  %vm4033_vm5 = vcmp.ne.s32.totalorder %v4029_v2, %v5668_v36  ;;  %vm4041_vm3 = vmpackc.low %vm4040_vm12, %vm4039_vm11 }
 0xc06   : > { %vm4034_vm0 = vmpackc.low %vm4033_vm5, %vm4032_vm14  ;;  %v4044_v63 = vsel %vm4041_vm3, %v7008_v48, 0  ;;  %vm8186_vm3 = vcmask 1043456  }
 0xc07   : > { %v4043_v39 = vsel %vm4034_vm0, %v7020_v13, 0  ;;  %vm4119_vm11 = vmpackc.low %vm4118_vm15, %vm4117_vm1  ;;  %vm3932_vm0 = vcmask 990208  }
 0xc08   : > { %4050 = vrot.lane.b32.xlu0 %v4043_v39, %s5518_s20  ;;  %vm4112_vm5 = vmpackc.low %vm4111_vm8, %vm4110_vm13  ;;  %v4122_v5 = vsel %vm4119_vm11, %v7008_v48, 0  ;;  %vm8188_vm8 = vcmask 64512  }
 0xc09   : > { %v4295_v56 = vpop.permute.xlu1 %4294  ;;  %v4121_v24 = vsel %vm4112_vm5, %v7020_v13, 0  ;;  %vm8189_vm11 = vmmov %vm8186_vm3 }
 0xc0a   : > { %v4299_v51 = vunpack.c.l.b16 %v4295_v56  ;;  %v4300_v19 = vunpack.c.h.b16 %v4295_v56 }
 0xc0b   : > { %4048 = vrot.lane.b32.xlu2 %v4042_v41, %s5518_s20  ;;  %4052 = vrot.lane.b32.xlu1 %v4044_v63, %s5518_s20  ;;  %s5522_s20 = smov 25  }
 0xc0c   : > { %vm4303_vm12 = vcmp.ne.s32.totalorder %v4299_v51, %v5665_v35  ;;  %vm4304_vm14 = vcmp.ne.s32.totalorder %v4300_v19, %v5668_v36  ;;  %v728_v51 = vld [vmem:[%s7777_s14 + $0x28] sm:$0xff] }
 0xc0d   : > { %vm4305_vm7 = vmpackc.low %vm4304_vm14, %vm4303_vm12 }
 0xc10   : > { %4410 = vrot.lane.b32.xlu0 %v7001_v15, %s7843_s18  ;;  %v4313_v15 = vsel %vm4305_vm7, %v7020_v13, 0  ;;  %vm8190_vm7 = vmmov %vm8188_vm8 }
 0xc13   : > { %4408 = vrot.lane.b32.xlu2 %v6990_v55, %s7843_s18  ;;  %4171 = vrot.lane.b32.xlu1 %v7023_v32, %s5520_s25  ;;  %v4120_v55 = vsel %vm4105_vm10, %v7023_v32, 0 }
 0xc18   : > { %4175 = vrot.lane.b32.xlu0 %v7008_v48, %s5520_s25 }
 0xc1b   : > { %4173 = vrot.lane.b32.xlu2 %v7020_v13, %s5520_s25  ;;  %4126 = vrot.lane.b32.xlu1 %v4120_v55, %s8185_s0 }
 0xc20   : > { %4130 = vrot.lane.b32.xlu0 %v4122_v5, %s8185_s0 }
 0xc23   : > { %4128 = vrot.lane.b32.xlu2 %v4121_v24, %s8185_s0  ;;  %4317 = vrot.lane.b32.xlu1 %v4313_v15, %s8143_s19 }
 0xc28   : > { %4321 = vrot.lane.b32.xlu0 %v5479_v1, %s8143_s19 }
 0xc55   : > { %v3931_v11 = vpop.permute.xlu0 %3930  ;;  %v3929_v14 = vpop.permute.xlu2 %3928 }
 0xc56   : > { %v3934_v22 = vsel %vm3932_vm0, %v3929_v14, %v3931_v11 }
 0xc57   : > { %v3942_v62 = vsel %vm8186_vm3, %v3934_v22, 0  ;;  %vm8191_vm3 = vcmask 1031168  }
 0xc58   : > { %3964 = vmatpush.bf16.msrb.mxu3 %v3942_v62  ;;  %v741_v62 = vld [vmem:[%s7778_s15 + $0x40] sm:$0xff] }
 0xc5b   : > { %5370 = vmatmul.msk.bf16.vlgmr.msrb.gmra.mxu3 %vm8188_vm8, %v3890_v31  ;;  %vm8193_vm8 = vmmov %vm8189_vm11 }
 0xc5d   : > { %v4218_v18 = vpop.permute.xlu0 %4217  ;;  %v4297_v6 = vpop.permute.xlu2 %4296 }
 0xc5e   : > { %v4222_v37 = vunpack.c.l.b16 %v4218_v18  ;;  %v4223_v44 = vunpack.c.h.b16 %v4218_v18  ;;  %v4298_v7 = vsel %vm8187_vm6, %v4295_v56, %v4297_v6 }
 0xc5f   : > { %v4306_v57 = vunpack.c.l.b16 %v4298_v7  ;;  %v4307_v60 = vunpack.c.h.b16 %v4298_v7 }
 0xc60   : > { %vm4226_vm9 = vcmp.ne.s32.totalorder %v4222_v37, %v5665_v35  ;;  %vm4227_vm2 = vcmp.ne.s32.totalorder %v4223_v44, %v5668_v36 }
 0xc61   : > { %vm4310_vm10 = vcmp.ne.s32.totalorder %v4306_v57, %v5665_v35  ;;  %vm4311_vm1 = vcmp.ne.s32.totalorder %v4307_v60, %v5668_v36  ;;  %vm4228_vm15 = vmpackc.low %vm4227_vm2, %vm4226_vm9 }
 0xc62   : > { %v4243_v61 = vsel %vm4228_vm15, %v7023_v32, 0  ;;  %vm4312_vm13 = vmpackc.low %vm4311_vm1, %vm4310_vm10 }
 0xc63   : > { %4249 = vrot.lane.b32.xlu1 %v4243_v61, %s8013_s30  ;;  %v4314_v25 = vsel %vm4312_vm13, %v7008_v48, 0  ;;  %vm8192_vm13 = vmmov %vm8189_vm11  ;;  %v679_v61 = vld [vmem:[%s7766_s3] sm:$0xff] }
 0xc64   : > { %4319 = vrot.lane.b32.xlu2 %v4314_v25, %s8143_s19  ;;  %v738_v25 = vld [vmem:[%s7778_s15 + $0x28] sm:$0xff] }
 0xc65   : > { %v4049_v33 = vpop.permute.xlu2 %4048 }
 0xc6d   : > { %v4409_v4 = vpop.permute.xlu2 %4408  ;;  %v3927_v9 = vpop.permute.xlu1 %3926 }
 0xc6e   : > { %v4414_v30 = vunpack.c.l.b16 %v4409_v4  ;;  %v4415_v47 = vunpack.c.h.b16 %v4409_v4  ;;  %v3933_v32 = vsel %vm3932_vm0, %v3927_v9, %v3929_v14  ;;  %vm4054_vm0 = vcmask 932864   ;;  %v725_v9 = vld [vmem:[%s7777_s14 + $0x10] sm:$0xff] }
 0xc6f   : > { %v3939_v50 = vsel %vm8189_vm11, %v3933_v32, 0  ;;  %vm7847_vm11 = vcmask 900096   ;;  %v735_v32 = vld [vmem:[%s7778_s15 + $0x10] sm:$0xff] }
 0xc70   : > { %3951 = vmatpush.bf16.msrb.mxu2 %v3939_v50  ;;  %vm4418_vm12 = vcmp.ne.s32.totalorder %v4414_v30, %v5665_v35  ;;  %vm4419_vm14 = vcmp.ne.s32.totalorder %v4415_v47, %v5668_v36  ;;  %v3889_v30 = vld [vmem:[%s7775_s12] sm:$0xf]  ;;  %v3893_v50 = vld [vmem:[%s7775_s12 + $0x10] sm:$0xf] }
 0xc71   : > { %vm4420_vm5 = vmpackc.low %vm4419_vm14, %vm4418_vm12  ;;  %vm4177_vm12 = vcmask 72704   ;;  %v639_v47 = vld [vmem:[%s7765_s2] sm:$0xff] }
 0xc72   : > { %v4428_v23 = vsel %vm4420_vm5, %v7020_v13, 0 }
 0xc73   : > { %4432 = vrot.lane.b32.xlu1 %v4428_v23, %s7845_s23  ;;  %5369 = vmatmul.msk.bf16.vlgmr.msrb.gmra.mxu2 %vm8190_vm7, %v3890_v31  ;;  %vm8194_vm7 = vmmov %vm8193_vm8  ;;  %v3892_v23 = vld [vmem:[%s7775_s12 + $0xc] sm:$0xf] }
 0xc75   : > { %v4220_v2 = vpop.permute.xlu1 %4219  ;;  %v4174_v55 = vpop.permute.xlu2 %4173 }
 0xc76   : > { %v4221_v39 = vsel %vm8191_vm3, %v4218_v18, %v4220_v2  ;;  %v4236_v41 = vunpack.c.l.b16 %v4220_v2  ;;  %v4237_v63 = vunpack.c.h.b16 %v4220_v2 }
 0xc77   : > { %v4229_v12 = vunpack.c.l.b16 %v4221_v39  ;;  %v4230_v8 = vunpack.c.h.b16 %v4221_v39 }
 0xc78   : > { %vm4240_vm6 = vcmp.ne.s32.totalorder %v4236_v41, %v5665_v35  ;;  %vm4241_vm9 = vcmp.ne.s32.totalorder %v4237_v63, %v5668_v36 }
 0xc79   : > { %vm4242_vm2 = vmpackc.low %vm4241_vm9, %vm4240_vm6  ;;  %vm4233_vm10 = vcmp.ne.s32.totalorder %v4229_v12, %v5665_v35  ;;  %vm4234_vm1 = vcmp.ne.s32.totalorder %v4230_v8, %v5668_v36  ;;  %vm8196_vm6 = vcmask 130048  }
 0xc7a   : > { %v4051_v42 = vpop.permute.xlu0 %4050  ;;  %v4245_v38 = vsel %vm4242_vm2, %v7008_v48, 0  ;;  %vm4235_vm15 = vmpackc.low %vm4234_vm1, %vm4233_vm10  ;;  %vm8200_vm1 = vcmask 64512  }
 0xc7b   : > { %v4055_v40 = vsel %vm4054_vm0, %v4049_v33, %v4051_v42  ;;  %4362 = vrot.lane.b32.xlu1 %v7020_v13, %s5522_s20  ;;  %4253 = vrot.lane.b32.xlu0 %v4245_v38, %s8013_s30  ;;  %v4244_v27 = vsel %vm4235_vm15, %v7020_v13, 0  ;;  %vm8198_vm2 = vmmov %vm8196_vm6  ;;  %v3895_v38 = vld [vmem:[%s7775_s12 + $0x18] sm:$0xf] }
 0xc7c   : > { %v4061_v49 = vsel %vm8192_vm13, %v4055_v40, 0  ;;  %4251 = vrot.lane.b32.xlu2 %v4244_v27, %s8013_s30  ;;  %vm8201_vm15 = vmmov %vm8200_vm1 }
 0xc7d   : > { %4073 = vmatpush.bf16.msra.mxu2 %v4061_v49  ;;  %v4053_v56 = vpop.permute.xlu1 %4052  ;;  %v4129_v44 = vpop.permute.xlu2 %4128  ;;  %vm8202_vm13 = vmmov %vm8200_vm1 }
 0xc7e   : > { %v4056_v45 = vsel %vm4054_vm0, %v4051_v42, %v4053_v56  ;;  %vm8195_vm0 = vmmov %vm8194_vm7  ;;  %5371 = vmatmul.msk.bf16.vlgmr.msra.gmra.mxu0 %vm8202_vm13, %v3889_v30 }
 0xc7f   : > { %v4064_v26 = vsel %vm8193_vm8, %v4056_v45, 0  ;;  %vm8197_vm9 = vmmov %vm8195_vm0  ;;  %v3894_v45 = vld [vmem:[%s7775_s12 + $0x14] sm:$0xf] }
 0xc80   : > { %4086 = vmatpush.bf16.msra.mxu3 %v4064_v26  ;;  %vm8199_vm10 = vmmov %vm8195_vm0 }
 0xc81   : > { %vm8203_vm8 = vmmov %vm8200_vm1 }
 0xc82   : > { %v4411_v19 = vpop.permute.xlu0 %4410  ;;  %5372 = vmatmul.msk.bf16.vlgmr.msra.gmra.mxu1 %vm8203_vm8, %v3889_v30  ;;  %vm8214_vm13 = vmmov %vm8195_vm0  ;;  %vm4368_vm8 = vcmask 203776  }
 0xc83   : > { %v4413_v13 = vsel %vm7847_vm11, %v4409_v4, %v4411_v19  ;;  %3034 = vperm.xlu1 %5469, %v728_v51   ;;  %4436 = vrot.lane.b32.xlu0 %v5479_v1, %s7845_s23  ;;  %v731_v4 = vld [vmem:[%s7777_s14 + $0x40] sm:$0xff] }
 0xc84   : > { %v4421_v5 = vunpack.c.l.b16 %v4413_v13  ;;  %v4422_v24 = vunpack.c.h.b16 %v4413_v13  ;;  %v3897_v13 = vld [vmem:[%s7775_s12 + $0x20] sm:$0xf] }
 0xc85   : > { %v4172_v15 = vpop.permute.xlu1 %4171 }
 0xc86   : > { %vm4425_vm14 = vcmp.ne.s32.totalorder %v4421_v5, %v5665_v35  ;;  %vm4426_vm5 = vcmp.ne.s32.totalorder %v4422_v24, %v5668_v36  ;;  %v4178_v11 = vsel %vm4177_vm12, %v4172_v15, %v4174_v55 }
 0xc87   : > { %v4184_v14 = vsel %vm8194_vm7, %v4178_v11, 0  ;;  %vm4427_vm3 = vmpackc.low %vm4426_vm5, %vm4425_vm14 }
 0xc88   : > { %4196 = vmatpush.bf16.msrb.mxu2 %v4184_v14  ;;  %v4429_v22 = vsel %vm4427_vm3, %v7008_v48, 0  ;;  %vm8206_vm14 = vmmov %vm8200_vm1 }
 0xc89   : > { %4434 = vrot.lane.b32.xlu2 %v4429_v22, %s7845_s23  ;;  %vm8207_vm5 = vmmov %vm8200_vm1 }
 0xc8a   : > { %v4176_v18 = vpop.permute.xlu0 %4175  ;;  %vm8208_vm7 = vmmov %vm8200_vm1 }
 0xc8b   : > { %v4179_v6 = vsel %vm4177_vm12, %v4174_v55, %v4176_v18  ;;  %4487 = vperm.xlu1 %5469, %v741_v62   ;;  %4366 = vrot.lane.b32.xlu0 %v5479_v1, %s5522_s20  ;;  %vm8205_vm12 = vmmov %vm8200_vm1  ;;  %v3896_v18 = vld [vmem:[%s7775_s12 + $0x1c] sm:$0xf] }
 0xc8c   : > { %v4187_v37 = vsel %vm8195_vm0, %v4179_v6, 0  ;;  %vm8209_vm3 = vmmov %vm8195_vm0 }
 0xc8d   : > { %4209 = vmatpush.bf16.msrb.mxu3 %v4187_v37  ;;  %v4127_v7 = vpop.permute.xlu1 %4126 }
 0xc8e   : > { %v4132_v57 = vsel %vm8196_vm6, %v4127_v7, %v4129_v44  ;;  %vm8210_vm6 = vmmov %vm8200_vm1 }
 0xc8f   : > { %v4138_v60 = vsel %vm8197_vm9, %v4132_v57, 0  ;;  %vm8211_vm9 = vmmov %vm8200_vm1 }
 0xc90   : > { %4150 = vmatpush.bf16.msrb.mxu0 %v4138_v60 }
 0xc91   : > { %4364 = vrot.lane.b32.xlu2 %v7008_v48, %s5522_s20  ;;  %v3891_v48 = vld [vmem:[%s7775_s12 + $0x8] sm:$0xf] }
 0xc92   : > { %v4131_v1 = vpop.permute.xlu0 %4130  ;;  %5373 = vmatmul.msk.bf16.vlgmr.msra.gmra.mxu2 %vm8200_vm1, %v3891_v48  ;;  %5374 = vmatmul.msk.bf16.vlgmr.msra.gmra.mxu3 %vm8201_vm15, %v3891_v48  ;;  %vm4438_vm15 = vcmask 146432  }
 0xc93   : > { %v4133_v33 = vsel %vm8198_vm2, %v4129_v44, %v4131_v1  ;;  %686 = vperm.xlu1 %5469, %v679_v61   ;;  %3041 = vperm.xlu0 %5468, %v738_v25   ;;  %vm8212_vm2 = vcmask 15360  }
 0xc94   : > { %v4141_v31 = vsel %vm8199_vm10, %v4133_v33, 0  ;;  %5375 = vmatmul.msk.bf16.vlgmr.msrb.gmra.mxu0 %vm8207_vm5, %v3892_v23  ;;  %vm8213_vm10 = vmmov %vm8195_vm0 }
 0xc95   : > { %4163 = vmatpush.bf16.msrb.mxu1 %v4141_v31  ;;  %v4318_v39 = vpop.permute.xlu1 %4317  ;;  %vm8217_vm5 = vmmov %vm8195_vm0 }
 0xc98   : > { %5376 = vmatmul.msk.bf16.vlgmr.msrb.gmra.mxu1 %vm8208_vm7, %v3892_v23  ;;  %vm8218_vm7 = vmmov %vm8195_vm0 }
 0xc99   : > { %4480 = vperm.xlu2 %5470, %v731_v4  }
 0xc9a   : > { %v4322_v2 = vpop.permute.xlu0 %4321 }
 0xc9b   : > { %1770 = vperm.xlu0 %5468, %v725_v9   ;;  %4713 = vrot.lane.b32.xlu1 %v5710_v58, %s8185_s0 }
 0xca1   : > { %646 = vperm.xlu2 %5470, %v639_v47  }
 0xca2   : > { %5377 = vmatmul.msk.bf16.vlgmr.msrb.gmra.mxu2 %vm8205_vm12, %v3893_v50  ;;  %5378 = vmatmul.msk.bf16.vlgmr.msrb.gmra.mxu3 %vm8206_vm14, %v3893_v50  ;;  %vm8215_vm12 = vmmov %vm8200_vm1 }
 0xca3   : > { %4856 = vrot.lane.b32.xlu1 %v5658_v28, %s8204_s17  ;;  %vm8216_vm14 = vmmov %vm8212_vm2 }
 0xca9   : > { %1777 = vperm.xlu2 %5470, %v735_v32  }
 0xcbe   : > { %v4320_v41 = vpop.permute.xlu2 %4319 }
 0xcbf   : > { %v4323_v63 = vsel %vm7849_vm4, %v4318_v39, %v4320_v41  ;;  %v4324_v12 = vsel %vm7849_vm4, %v4320_v41, %v4322_v2 }
 0xcc0   : > { %v4329_v8 = vsel %vm8209_vm3, %v4323_v63, 0  ;;  %v4332_v42 = vsel %vm8195_vm0, %v4324_v12, 0  ;;  %vm8219_vm3 = vmmov %vm8200_vm1 }
 0xcc1   : > { %4341 = vmatpush.bf16.msra.mxu2 %v4329_v8  ;;  %4354 = vmatpush.bf16.msra.mxu3 %v4332_v42  ;;  %vm8220_vm0 = vmmov %vm8200_vm1 }
 0xcc4   : > { %5381 = vmatmul.msk.bf16.vlgmr.msra.gmra.mxu2 %vm8210_vm6, %v3895_v38  ;;  %5382 = vmatmul.msk.bf16.vlgmr.msra.gmra.mxu3 %vm8211_vm9, %v3895_v38  ;;  %vm8221_vm6 = vmmov %vm8217_vm5 }
 0xcc5   : > { %vm8222_vm9 = vmmov %vm8220_vm0 }
 0xcd5   : > { %v4250_v40 = vpop.permute.xlu1 %4249 }
 0xcd6   : > { %v4252_v27 = vpop.permute.xlu2 %4251 }
 0xcd7   : > { %v4255_v49 = vsel %vm8212_vm2, %v4250_v40, %v4252_v27  ;;  %vm8223_vm2 = vmmov %vm8217_vm5 }
 0xcd8   : > { %v4261_v56 = vsel %vm8213_vm10, %v4255_v49, 0  ;;  %vm8224_vm10 = vmmov %vm8220_vm0 }
 0xcd9   : > { %4273 = vmatpush.bf16.msra.mxu0 %v4261_v56 }
 0xcdc   : > { %5379 = vmatmul.msk.bf16.vlgmr.msra.gmra.mxu0 %vm8200_vm1, %v3894_v45  ;;  %vm8225_vm1 = vmmov %vm8223_vm2 }
 0xcde   : > { %v3966_v23 = vpop.f32.mrf.mxu3 }
 0xce3   : > { %v4435_v26 = vpop.permute.xlu2 %4434 }
 0xce5   : > { %v4433_v51 = vpop.permute.xlu1 %4432 }
 0xce6   : > { %v4439_v19 = vsel %vm4438_vm15, %v4433_v51, %v4435_v26  ;;  %v3968_v49 = vpop.f32.mrf.mxu3 }
 0xce7   : > { %v4445_v55 = vsel %vm8214_vm13, %v4439_v19, 0  ;;  %vm8226_vm13 = vmmov %vm8225_vm1 }
 0xce8   : > { %4457 = vmatpush.bf16.msrb.mxu2 %v4445_v55 }
 0xceb   : > { %5385 = vmatmul.msk.bf16.vlgmr.msrb.gmra.mxu2 %vm8215_vm12, %v3897_v13  ;;  %v4365_v5 = vpop.permute.xlu2 %4364  ;;  %vm8227_vm12 = vnez %v7880_v54 }
 0xced   : > { %v4254_v24 = vpop.permute.xlu0 %4253  ;;  %v4363_v15 = vpop.permute.xlu1 %4362 }
 0xcee   : > { %v4256_v11 = vsel %vm8216_vm14, %v4252_v27, %v4254_v24  ;;  %v4369_v14 = vsel %vm4368_vm8, %v4363_v15, %v4365_v5  ;;  %vm8228_vm14 = vmmov %vm8225_vm1 }
 0xcef   : > { %v4264_v22 = vsel %vm8217_vm5, %v4256_v11, 0  ;;  %v4375_v62 = vsel %vm8218_vm7, %v4369_v14, 0  ;;  %vm8229_vm5 = vmmov %vm8225_vm1  ;;  %vm8230_vm7 = vcmask 130048  }
 0xcf0   : > { %4286 = vmatpush.bf16.msra.mxu1 %v4264_v22  ;;  %4387 = vmatpush.bf16.msrb.mxu0 %v4375_v62 }
 0xcf3   : > { %5380 = vmatmul.msk.bf16.vlgmr.msra.gmra.mxu1 %vm8219_vm3, %v3894_v45  ;;  %5383 = vmatmul.msk.bf16.vlgmr.msrb.gmra.mxu0 %vm8220_vm0, %v3896_v18  ;;  %v7218_v61 = vpop.permute.xlu2 %4480  ;;  %vm8231_vm3 = vnez %v7876_v43 }
 0xcf5   : > { %v4437_v6 = vpop.permute.xlu0 %4436  ;;  %v3035_v37 = vpop.permute.xlu1 %3034 }
 0xcf6   : > { %v4440_v44 = vsel %vm4438_vm15, %v4435_v26, %v4437_v6  ;;  %v3037_v7 = vmul.f32 %v3035_v37, %v6892_v29  ;;  %v3038_v57 = vmul.f32 %v3035_v37, %v6894_v34  ;;  %v3953_v50 = vpop.f32.mrf.mxu2 }
 0xcf7   : > { %v4448_v60 = vsel %vm8221_vm6, %v4440_v44, 0 }
 0xcf8   : > { %4470 = vmatpush.bf16.msrb.mxu3 %v4448_v60 }
 0xcfb   : > { %5386 = vmatmul.msk.bf16.vlgmr.msrb.gmra.mxu3 %vm8222_vm9, %v3897_v13  ;;  %v647_v29 = vpop.permute.xlu2 %646 }
 0xcfc   : > { %v669_v30 = vmul.f32 %v647_v29, %v5645_v16  ;;  %v670_v47 = vmul.f32 %v647_v29, %v5647_v17 }
 0xcfd   : > { %v4367_v25 = vpop.permute.xlu0 %4366  ;;  %v7221_v1 = vpop.permute.xlu1 %4487 }
 0xcfe   : > { %v4370_v33 = vsel %vm4368_vm8, %v4365_v5, %v4367_v25  ;;  %v3955_v27 = vpop.f32.mrf.mxu2  ;;  %vm7852_vm8 = vcmask 138240  }
 0xcff   : > { %v4378_v31 = vsel %vm8223_vm2, %v4370_v33, 0  ;;  %v4001_v24 = vpop.f32.mrf.mxu1  ;;  %vm8236_vm2 = vnez %v7878_v52 }
 0xd00   : > { %4400 = vmatpush.bf16.msrb.mxu1 %v4378_v31  ;;  %v4002_v11 = vadd.f32 %v4001_v24, %v3966_v23 }
 0xd03   : > { %5384 = vmatmul.msk.bf16.vlgmr.msrb.gmra.mxu1 %vm8224_vm10, %v3896_v18  ;;  %v1778_v42 = vpop.permute.xlu2 %1777 }
 0xd05   : > { %v3042_v4 = vpop.permute.xlu0 %3041  ;;  %v687_v48 = vpop.permute.xlu1 %686 }
 0xd06   : > { %v3044_v34 = vadd.f32 %v3042_v4, %v3037_v7  ;;  %v3045_v9 = vadd.f32 %v3042_v4, %v3038_v57  ;;  %v709_v2 = vadd.f32 %v687_v48, %v669_v30  ;;  %v710_v39 = vadd.f32 %v687_v48, %v670_v47 }
 0xd07   : > { %v4003_v37 = vpop.f32.mrf.mxu1 }
 0xd08   : > { %v7228_v32 = vpack.c.bf16 %v3045_v9, %v3044_v34  ;;  %v719_v63 = vpack.c.bf16 %v710_v39, %v709_v2 }
 0xd0a   : > { %v4494_v16 = vunpack.c.l.b16 %v719_v63  ;;  %v4495_v56 = vunpack.c.h.b16 %v719_v63 }
 0xd0c   : > { %v4496_v51 = vpack.c.b16 %v4494_v16, %v4494_v16  ;;  %v4497_v19 = vpack.c.b16 %v4495_v56, %v4495_v56 }
 0xd0d   : > { %v1771_v41 = vpop.permute.xlu0 %1770 }
 0xd0e   : > { %v1773_v12 = vmul.f32 %v1771_v41, %v6359_v21  ;;  %v1774_v8 = vmul.f32 %v1771_v41, %v6361_v10  ;;  %v3988_v10 = vpop.f32.mrf.mxu0 }
 0xd0f   : > { %v3989_v15 = vadd.f32 %v3988_v10, %v3953_v50 }
 0xd10   : > { %v1780_v38 = vadd.f32 %v1778_v42, %v1773_v12  ;;  %v1781_v40 = vadd.f32 %v1778_v42, %v1774_v8 }
 0xd12   : > { %v1782_v17 = vpack.c.bf16 %v1781_v40, %v1780_v38 }
 0xd14   : > { %v4499_v45 = vunpack.c.l.b16 %v1782_v17  ;;  %v4500_v26 = vunpack.c.h.b16 %v1782_v17 }
 0xd15   : > { %v4075_v14 = vpop.f32.mrf.mxu2  ;;  %v4088_v62 = vpop.f32.mrf.mxu3 }
 0xd16   : > { %v4502_v55 = vpack.c.b16 %v4500_v26, %v4500_v26  ;;  %v4501_v13 = vpack.c.b16 %v4499_v45, %v4499_v45  ;;  %v4092_v22 = vadd.f32 %v4075_v14, %v3989_v15  ;;  %v4093_v18 = vadd.f32 %v4088_v62, %v4002_v11  ;;  %v3990_v6 = vpop.f32.mrf.mxu0  ;;  %v4165_v60 = vpop.f32.mrf.mxu1 }
 0xd17   : > { %v4504_v11 = vunpack.c.l.b16 %v7228_v32 }
 0xd18   : > { %v4518_v5 = vsel %vm8225_vm1, %v4497_v19, %v4502_v55  ;;  %v4515_v21 = vsel %vm8226_vm13, %v4496_v51, %v4501_v13  ;;  %v4170_v33 = vadd.f32 %v4165_v60, %v4093_v18  ;;  %v4714_v60 = vpop.permute.xlu1 %4713 }
 0xd19   : > { %4531 = vrot.lane.b32.xlu0 %v4518_v5, %s5523_s1  ;;  %4529 = vrot.lane.b32.xlu2 %v4515_v21, %s5523_s1  ;;  %v4506_v37 = vpack.c.b16 %v4504_v11, %v4504_v11 }
 0xd1d   : > { %v4077_v44 = vpop.f32.mrf.mxu2  ;;  %v4090_v7 = vpop.f32.mrf.mxu3 }
 0xd1e   : > { %v4152_v57 = vpop.f32.mrf.mxu0  ;;  %v4167_v34 = vpop.f32.mrf.mxu1 }
 0xd1f   : > { %v4169_v25 = vadd.f32 %v4152_v57, %v4092_v22 }
 0xd21   : > { %4854 = vrot.lane.b32.xlu0 %v5654_v20, %s8204_s17  ;;  %4715 = vrot.lane.b32.xlu2 %v5712_v59, %s8185_s0  ;;  %s5525_s0 = smov 111   ;;  %s8253_s17 = smov 110  }
 0xd25   : > { %v4198_v31 = vpop.f32.mrf.mxu2  ;;  %v4211_v48 = vpop.f32.mrf.mxu3 }
 0xd26   : > { %v4215_v29 = vadd.f32 %v4198_v31, %v4169_v25  ;;  %v4154_v4 = vpop.f32.mrf.mxu0  ;;  %v4216_v30 = vadd.f32 %v4211_v48, %v4170_v33 }
 0xd29   : > { %4945 = vrot.lane.b32.xlu0 %v5712_v59, %s8143_s19  ;;  %4943 = vrot.lane.b32.xlu2 %v5710_v58, %s8143_s19  ;;  %s5524_s19 = smov 34  }
 0xd2d   : > { %v4200_v9 = vpop.f32.mrf.mxu2  ;;  %v4213_v47 = vpop.f32.mrf.mxu3 }
 0xd2e   : > { %v4718_v47 = vunpack.c.l.b16 %v4714_v60 }
 0xd30   : > { %vm7307_vm10 = vcmp.ne.s32.totalorder %v4718_v47, %v5665_v35 }
 0xd47   : > { %v4343_v50 = vpop.f32.mrf.mxu2  ;;  %v4356_v2 = vpop.f32.mrf.mxu3 }
 0xd4f   : > { %v4345_v23 = vpop.f32.mrf.mxu2  ;;  %v4358_v59 = vpop.f32.mrf.mxu3 }
 0xd59   : > { %v4275_v39 = vpop.f32.mrf.mxu0 }
 0xd5a   : > { %v4292_v38 = vadd.f32 %v4275_v39, %v4215_v29 }
 0xd5c   : > { %v4360_v16 = vadd.f32 %v4343_v50, %v4292_v38  ;;  %v4719_v50 = vunpack.c.h.b16 %v4714_v60 }
 0xd5e   : > { %vm7312_vm1 = vcmp.ne.s32.totalorder %v4719_v50, %v5668_v36 }
 0xd61   : > { %v4277_v41 = vpop.f32.mrf.mxu0 }
 0xd62   : > { %v8237_v41 = vmov 0 }
 0xd63   : > { %v8238_v41 = vsel %vm7307_vm10, 4294967295, %v8237_v41 }
 0xd6e   : > { %v4459_v63 = vpop.f32.mrf.mxu2 }
 0xd70   : > { %v4288_v58 = vpop.f32.mrf.mxu1  ;;  %v4389_v12 = vpop.f32.mrf.mxu0 }
 0xd71   : > { %v4293_v56 = vadd.f32 %v4288_v58, %v4216_v30  ;;  %v4406_v17 = vadd.f32 %v4389_v12, %v4360_v16 }
 0xd73   : > { %v4530_v8 = vpop.permute.xlu2 %4529  ;;  %v4361_v26 = vadd.f32 %v4356_v2, %v4293_v56  ;;  %v4476_v51 = vadd.f32 %v4459_v63, %v4406_v17  ;;  %v8239_v63 = vmov 0 }
 0xd74   : > { %v7245_v42 = vsel %vm7852_vm8, 0, %v4530_v8  ;;  %v8240_v63 = vsel %vm7312_vm1, 4294967295, %v8239_v63 }
 0xd75   : > { %4572 = vrot.lane.b32.xlu1 %v7245_v42, %s8039_s29  ;;  %v4483_v13 = vmul.f32 %v7218_v61, %v4476_v51  ;;  %v4650_v9 = vsel %vm8231_vm3, %v7245_v42, 0 }
 0xd76   : > { %v4461_v40 = vpop.f32.mrf.mxu2 }
 0xd77   : > { %v4490_v24 = vadd.f32 %v7221_v1, %v4483_v13 }
 0xd78   : > { %v4290_v27 = vpop.f32.mrf.mxu1  ;;  %v4391_v49 = vpop.f32.mrf.mxu0 }
 0xd7b   : > { %v4716_v25 = vpop.permute.xlu2 %4715 }
 0xd7c   : > { %v4717_v29 = vsel %vm8230_vm7, %v4714_v60, %v4716_v25  ;;  %v4732_v23 = vunpack.c.l.b16 %v4716_v25  ;;  %v4733_v2 = vunpack.c.h.b16 %v4716_v25  ;;  %v8262_v60 = vmov 0 }
 0xd7d   : > { %5084 = vrot.lane.b32.xlu1 %v5654_v20, %s5524_s19  ;;  %v4505_v20 = vunpack.c.h.b16 %v7228_v32  ;;  %v4725_v4 = vunpack.c.l.b16 %v4717_v29  ;;  %v4726_v34 = vunpack.c.h.b16 %v4717_v29  ;;  %v8264_v25 = vmov 0 }
 0xd7e   : > { %v4472_v45 = vpop.f32.mrf.mxu3  ;;  %vm7318_vm13 = vcmp.ne.s32.totalorder %v4732_v23, %v5665_v35 }
 0xd7f   : > { %v4507_v7 = vpack.c.b16 %v4505_v20, %v4505_v20  ;;  %vm7282_vm0 = vcmp.ne.s32.totalorder %v4725_v4, %v5665_v35  ;;  %vm7287_vm6 = vcmp.ne.s32.totalorder %v4726_v34, %v5668_v36  ;;  %v8256_v20 = vmov 0 }
 0xd80   : > { %v4402_v19 = vpop.f32.mrf.mxu1  ;;  %vm7851_vm9 = vmpackc.low %vm7287_vm6, %vm7282_vm0 }
 0xd81   : > { %v4407_v55 = vadd.f32 %v4402_v19, %v4361_v26  ;;  %v8247_v26 = vmov 0 }
 0xd83   : > { %v4477_v5 = vadd.f32 %v4472_v45, %v4407_v55  ;;  %v4944_v17 = vpop.permute.xlu2 %4943  ;;  %v8245_v45 = vmov 0 }
 0xd85   : > { %v4484_v21 = vmul.f32 %v7218_v61, %v4477_v5 }
 0xd86   : > { %v4474_v10 = vpop.f32.mrf.mxu3 }
 0xd87   : > { %v4491_v15 = vadd.f32 %v7221_v1, %v4484_v21 }
 0xd88   : > { %v4404_v14 = vpop.f32.mrf.mxu1 }
 0xd89   : > { %v4492_v22 = vpack.c.bf16 %v4491_v15, %v4490_v24  ;;  %v8254_v14 = vmov 0 }
 0xd8b   : > { %v4532_v62 = vpop.permute.xlu0 %4531  ;;  %v4510_v18 = vunpack.c.h.b16 %v4492_v22  ;;  %v4509_v6 = vunpack.c.l.b16 %v4492_v22  ;;  %v8258_v22 = vmov 0 }
 0xd8c   : > { %v7258_v44 = vsel %vm7852_vm8, %v4530_v8, %v4532_v62  ;;  %v7261_v61 = vsel %vm7852_vm8, %v4532_v62, 0  ;;  %v4857_v8 = vpop.permute.xlu1 %4856  ;;  %v8260_v62 = vmov 0 }
 0xd8d   : > { %4576 = vrot.lane.b32.xlu0 %v7261_v61, %s8039_s29  ;;  %4574 = vrot.lane.b32.xlu2 %v7258_v44, %s8039_s29  ;;  %v4651_v1 = vsel %vm8227_vm12, %v7258_v44, 0  ;;  %v4512_v32 = vpack.c.b16 %v4510_v18, %v4510_v18  ;;  %v4511_v57 = vpack.c.b16 %v4509_v6, %v4509_v6  ;;  %v4652_v39 = vsel %vm8236_vm2, %v7261_v61, 0 }
 0xd8e   : > { %4664 = vrot.lane.b32.xlu1 %v4651_v1, %s8042_s26  ;;  %v4740_v59 = vsel %vm7851_vm9, %v7258_v44, 0  ;;  %v4873_v19 = vunpack.c.l.b16 %v4857_v8  ;;  %v4874_v55 = vunpack.c.h.b16 %v4857_v8  ;;  %v4948_v18 = vunpack.c.l.b16 %v4944_v17 }
 0xd8f   : > { %v4524_v33 = vsel %vm8228_vm14, %v4507_v7, %v4512_v32  ;;  %v4521_v31 = vsel %vm8229_vm5, %v4506_v37, %v4511_v57  ;;  %vm7323_vm14 = vcmp.ne.s32.totalorder %v4733_v2, %v5668_v36  ;;  %vm7848_vm5 = vmpackc.low %vm7312_vm1, %vm7307_vm10  ;;  %v4949_v6 = vunpack.c.h.b16 %v4944_v17 }
 0xd90   : > { %vm7850_vm7 = vmpackc.low %vm7323_vm14, %vm7318_vm13  ;;  %v4739_v49 = vsel %vm7848_vm5, %v7245_v42, 0 }
 0xd91   : > { %v4741_v16 = vsel %vm7850_vm7, %v7261_v61, 0  ;;  %vm7383_vm7 = vcmp.ne.s32.totalorder %v4874_v55, %v5668_v36 }
 0xd95   : > { %4662 = vrot.lane.b32.xlu0 %v4650_v9, %s8042_s26  ;;  %5086 = vrot.lane.b32.xlu2 %v5658_v28, %s5524_s19  ;;  %v4855_v28 = vpop.permute.xlu0 %4854 }
 0xd96   : > { %4535 = vrot.lane.b32.xlu1 %v4524_v33, %s5523_s1  ;;  %v4858_v38 = vsel %vm4438_vm15, %v4855_v28, %v4857_v8  ;;  %v4859_v13 = vunpack.c.l.b16 %v4855_v28  ;;  %v4860_v5 = vunpack.c.h.b16 %v4855_v28  ;;  %v8266_v33 = vmov 0 }
 0xd97   : > { %v4866_v40 = vunpack.c.l.b16 %v4858_v38  ;;  %v4867_v27 = vunpack.c.h.b16 %v4858_v38 }
 0xd98   : > { %vm7389_vm9 = vcmp.ne.s32.totalorder %v4859_v13, %v5665_v35  ;;  %vm7394_vm8 = vcmp.ne.s32.totalorder %v4860_v5, %v5668_v36 }
 0xd99   : > { %vm7353_vm15 = vcmp.ne.s32.totalorder %v4866_v40, %v5665_v35  ;;  %vm7358_vm11 = vcmp.ne.s32.totalorder %v4867_v27, %v5668_v36  ;;  %v8255_v14 = vsel %vm7389_vm9, 4294967295, %v8254_v14  ;;  %v8257_v20 = vsel %vm7394_vm8, 4294967295, %v8256_v20  ;;  %vm7858_vm10 = vmpackc.low %vm7394_vm8, %vm7389_vm9 }
 0xd9a   : > { %v8246_v45 = vsel %vm7353_vm15, 4294967295, %v8245_v45  ;;  %v8248_v26 = vsel %vm7358_vm11, 4294967295, %v8247_v26  ;;  %vm7853_vm5 = vmpackc.low %vm7358_vm11, %vm7353_vm15  ;;  %v4880_v1 = vsel %vm7858_vm10, %v7245_v42, 0  ;;  %vm7441_vm10 = vcmp.ne.s32.totalorder %v4948_v18, %v5665_v35 }
 0xd9b   : > { %v4881_v24 = vsel %vm7853_vm5, %v7258_v44, 0  ;;  %v8263_v60 = vsel %vm7441_vm10, 4294967295, %v8262_v60  ;;  %vm7446_vm9 = vcmp.ne.s32.totalorder %v4949_v6, %v5668_v36  ;;  %vm8270_vm8 = vcmask 1039360  }
 0xd9c   : > { %v8265_v25 = vsel %vm7446_vm9, 4294967295, %v8264_v25 }
 0xd9d   : > { %4533 = vrot.lane.b32.xlu0 %v4521_v31, %s5523_s1  ;;  %4666 = vrot.lane.b32.xlu2 %v4652_v39, %s8042_s26  ;;  %v4946_v56 = vpop.permute.xlu0 %4945 }
 0xd9e   : > { %4753 = vrot.lane.b32.xlu1 %v4740_v59, %s8139_s27  ;;  %v4947_v51 = vsel %vm7849_vm4, %v4944_v17, %v4946_v56  ;;  %vm7378_vm4 = vcmp.ne.s32.totalorder %v4873_v19, %v5665_v35  ;;  %v4962_v37 = vunpack.c.l.b16 %v4946_v56  ;;  %v4963_v7 = vunpack.c.h.b16 %v4946_v56 }
 0xd9f   : > { %v4955_v21 = vunpack.c.l.b16 %v4947_v51  ;;  %v4956_v10 = vunpack.c.h.b16 %v4947_v51  ;;  %vm7860_vm11 = vmpackc.low %vm7383_vm7, %vm7378_vm4 }
 0xda0   : > { %v4882_v32 = vsel %vm7860_vm11, %v7261_v61, 0  ;;  %vm7452_vm11 = vcmp.ne.s32.totalorder %v4962_v37, %v5665_v35 }
 0xda1   : > { %vm7399_vm5 = vcmp.ne.s32.totalorder %v4955_v21, %v5665_v35  ;;  %vm7404_vm15 = vcmp.ne.s32.totalorder %v4956_v10, %v5668_v36  ;;  %v8267_v33 = vsel %vm7452_vm11, 4294967295, %v8266_v33 }
 0xda2   : > { %v8259_v22 = vsel %vm7399_vm5, 4294967295, %v8258_v22  ;;  %v8261_v62 = vsel %vm7404_vm15, 4294967295, %v8260_v62  ;;  %vm7862_vm1 = vmpackc.low %vm7404_vm15, %vm7399_vm5  ;;  %vm7457_vm5 = vcmp.ne.s32.totalorder %v4963_v7, %v5668_v36 }
 0xda3   : > { %v4970_v57 = vsel %vm7862_vm1, %v7258_v44, 0  ;;  %vm7866_vm1 = vmpackc.low %vm7446_vm9, %vm7441_vm10 }
 0xda4   : > { %vm7865_vm15 = vmpackc.low %vm7457_vm5, %vm7452_vm11  ;;  %v4969_v4 = vsel %vm7866_vm1, %v7245_v42, 0  ;;  %vm8272_vm1 = vcmask 1031168  }
 0xda5   : > { %4751 = vrot.lane.b32.xlu0 %v4739_v49, %s8139_s27  ;;  %4755 = vrot.lane.b32.xlu2 %v4741_v16, %s8139_s27  ;;  %v4971_v29 = vsel %vm7865_vm15, %v7261_v61, 0  ;;  %vm8271_vm15 = vmmov %vm8270_vm8 }
 0xda6   : > { %4804 = vrot.lane.b32.xlu1 %v7258_v44, %s5525_s0  ;;  %vm8273_vm10 = vmmov %vm8272_vm1 }
 0xdad   : > { %4802 = vrot.lane.b32.xlu0 %v7245_v42, %s5525_s0  ;;  %4806 = vrot.lane.b32.xlu2 %v7261_v61, %s5525_s0 }
 0xdae   : > { %4894 = vrot.lane.b32.xlu1 %v4881_v24, %s8253_s17  ;;  %v4559_v24 = vld [vmem:[%s7776_s13 + $0x10] sm:$0xf] }
 0xdb5   : > { %4892 = vrot.lane.b32.xlu0 %v4880_v1, %s8253_s17  ;;  %4896 = vrot.lane.b32.xlu2 %v4882_v32, %s8253_s17 }
 0xdb6   : > { %4983 = vrot.lane.b32.xlu1 %v4970_v57, %s8025_s24 }
 0xdbd   : > { %4985 = vrot.lane.b32.xlu2 %v4971_v29, %s8025_s24  ;;  %4981 = vrot.lane.b32.xlu0 %v4969_v4, %s8025_s24 }
 0xde7   : > { %v4573_v34 = vpop.permute.xlu1 %4572  ;;  %v4575_v9 = vpop.permute.xlu2 %4574 }
 0xde8   : > { %v7484_v47 = vsel %vm8270_vm8, %v4573_v34, %v4575_v9  ;;  %vm8274_vm8 = vcmask 138240   ;;  %v4555_v34 = vld [vmem:[%s7776_s13] sm:$0xf] }
 0xde9   : > { %vm8275_vm9 = vmmov %vm8274_vm8 }
 0xdea   : > { %vm8276_vm11 = vmmov %vm8274_vm8 }
 0xdef   : > { %v7486_v50 = vpop.permute.xlu2 %5086  ;;  %v7488_v23 = vpop.permute.xlu1 %5084 }
 0xdf0   : > { %v5090_v11 = vunpack.c.l.b16 %v7488_v23 }
 0xdf7   : > { %v4667_v28 = vpop.permute.xlu2 %4666 }
 0xdff   : > { %v4577_v2 = vpop.permute.xlu0 %4576  ;;  %v7603_v10 = vpop.permute.xlu2 %4755 }
 0xe00   : > { %v4665_v39 = vpop.permute.xlu1 %4664  ;;  %v7491_v59 = vsel %vm8271_vm15, %v4575_v9, %v4577_v2  ;;  %vm8288_vm15 = vnez %v8257_v20  ;;  %v5104_v20 = vunpack.c.l.b16 %v7486_v50 }
 0xe01   : > { %v7494_v8 = vsel %vm8272_vm1, %v4665_v39, %v4667_v28  ;;  %vm8278_vm1 = vnez %v7884_v3 }
 0xe02   : > { %v4565_v13 = vsel %vm8278_vm1, %v7258_v44, 0 }
 0xe07   : > { %v4663_v38 = vpop.permute.xlu0 %4662  ;;  %v7629_v18 = vpop.permute.xlu2 %4806 }
 0xe08   : > { %v4536_v40 = vpop.permute.xlu1 %4535  ;;  %v7497_v27 = vsel %vm8273_vm10, %v4663_v38, %v4665_v39  ;;  %vm8277_vm10 = vnez %v7882_v0 }
 0xe09   : > { %v7500_v49 = vsel %vm8274_vm8, %v4536_v40, 0  ;;  %v4564_v55 = vsel %vm8277_vm10, %v7245_v42, 0  ;;  %vm8289_vm8 = vnez %v8255_v14  ;;  %v5091_v14 = vunpack.c.h.b16 %v7488_v23 }
 0xe0a   : > { %4582 = vrot.lane.b32.xlu1 %v7500_v49, %s8039_s29  ;;  %v4655_v3 = vsel %vm8236_vm2, %v7500_v49, 0 }
 0xe0f   : > { %v4534_v16 = vpop.permute.xlu0 %4533  ;;  %v7641_v57 = vpop.permute.xlu2 %4896 }
 0xe10   : > { %v4539_v56 = vsel %vm8275_vm9, %v4534_v16, %v4536_v40  ;;  %v7506_v17 = vsel %vm8276_vm11, 0, %v4534_v16  ;;  %vm8279_vm11 = vmpackc.low %vm7287_vm6, %vm7282_vm0  ;;  %vm8282_vm9 = vnez %v8238_v41  ;;  %vm8284_vm0 = vnez %v8248_v26  ;;  %v7634_v1 = vpop.permute.xlu1 %4753 }
 0xe11   : > { %4578 = vrot.lane.b32.xlu2 %v7506_v17, %s8039_s29  ;;  %4580 = vrot.lane.b32.xlu0 %v4539_v56, %s8039_s29  ;;  %v4566_v51 = vsel %vm8277_vm10, %v7506_v17, 0  ;;  %v4567_v19 = vsel %vm8278_vm1, %v4539_v56, 0  ;;  %v4653_v5 = vsel %vm8231_vm3, %v7506_v17, 0  ;;  %v4654_v0 = vsel %vm8227_vm12, %v4539_v56, 0  ;;  %vm8280_vm12 = vmpackc.low %vm7323_vm14, %vm7318_vm13  ;;  %s5526_s29 = smov 95  }
 0xe12   : > { %4630 = vmatpush.bf16.msra.mxu2 %v4566_v51  ;;  %4643 = vmatpush.bf16.msra.mxu3 %v4567_v19  ;;  %v4743_v43 = vsel %vm8279_vm11, %v4539_v56, 0  ;;  %v4744_v52 = vsel %vm8280_vm12, %v7500_v49, 0  ;;  %vm8281_vm3 = vnez %v8240_v63  ;;  %vm8285_vm6 = vnez %v8246_v45  ;;  %vm8287_vm14 = vmpackc.low %vm7383_vm7, %vm7378_vm4 }
 0xe13   : > { %4810 = vrot.lane.b32.xlu1 %v4539_v56, %s5525_s0  ;;  %vm8283_vm2 = vmpackc.low %vm8281_vm3, %vm8282_vm9  ;;  %v4885_v30 = vsel %vm8287_vm14, %v7500_v49, 0  ;;  %vm8291_vm1 = vnez %v8261_v62  ;;  %vm8292_vm11 = vnez %v8259_v22  ;;  %vm5088_vm4 = vcmask 277504  }
 0xe14   : > { %v4742_v54 = vsel %vm8283_vm2, %v7506_v17, 0  ;;  %vm8286_vm13 = vmpackc.low %vm8284_vm0, %vm8285_vm6  ;;  %v5089_v58 = vsel %vm5088_vm4, %v7488_v23, %v7486_v50  ;;  %vm8294_vm7 = vnez %v8267_v33  ;;  %vm8296_vm9 = vnez %v8265_v25  ;;  %v742_v33 = vld [vmem:[%s7778_s15 + $0x48] sm:$0xff] }
 0xe15   : > { %v4884_v48 = vsel %vm8286_vm13, %v4539_v56, 0  ;;  %vm8290_vm10 = vmpackc.low %vm8288_vm15, %vm8289_vm8  ;;  %vm8297_vm2 = vnez %v8263_v60  ;;  %v5097_v26 = vunpack.c.l.b16 %v5089_v58  ;;  %v5098_v21 = vunpack.c.h.b16 %v5089_v58 }
 0xe16   : > { %4631 = vmatpush.bf16.msra.mxu2 %v4564_v55  ;;  %4644 = vmatpush.bf16.msra.mxu3 %v4565_v13  ;;  %v4883_v41 = vsel %vm8290_vm10, %v7506_v17, 0  ;;  %vm8293_vm12 = vmpackc.low %vm8291_vm1, %vm8292_vm11  ;;  %v5105_v22 = vunpack.c.h.b16 %v7486_v50  ;;  %vm5094_vm14 = vcmp.ne.s32.totalorder %v5090_v11, %v5665_v35  ;;  %vm5095_vm15 = vcmp.ne.s32.totalorder %v5091_v14, %v5668_v36 }
 0xe17   : > { %v4973_v63 = vsel %vm8293_vm12, %v4539_v56, 0  ;;  %vm8295_vm3 = vmpackc.low %vm7457_vm5, %vm8294_vm7  ;;  %vm7606_vm5 = vcmp.ne.s32.totalorder %v5097_v26, %v5665_v35  ;;  %vm7611_vm6 = vcmp.ne.s32.totalorder %v5098_v21, %v5668_v36  ;;  %vm5108_vm8 = vcmp.ne.s32.totalorder %v5104_v20, %v5665_v35  ;;  %v7643_v60 = vpop.permute.xlu0 %4751  ;;  %v7651_v25 = vpop.permute.xlu2 %4985  ;;  %v4560_v20 = vld [vmem:[%s7776_s13 + $0x14] sm:$0xf] }
 0xe18   : > { %v4974_v12 = vsel %vm8295_vm3, %v7500_v49, 0  ;;  %vm8298_vm0 = vmpackc.low %vm8296_vm9, %vm8297_vm2  ;;  %vm5109_vm10 = vcmp.ne.s32.totalorder %v5105_v22, %v5668_v36  ;;  %v732_v36 = vld [vmem:[%s7777_s14 + $0x48] sm:$0xff]  ;;  %vm8303_vm12 = vcmask 261120   ;;  %vm8305_vm7 = vcmask 1039360  }
 0xe19   : > { %4812 = vrot.lane.b32.xlu2 %v7500_v49, %s5525_s0  ;;  %4808 = vrot.lane.b32.xlu0 %v7506_v17, %s5525_s0  ;;  %v4972_v45 = vsel %vm8298_vm0, %v7506_v17, 0  ;;  %vm5103_vm13 = vmpackc.low %vm7611_vm6, %vm7606_vm5  ;;  %vm8309_vm0 = vcmask 1031168   ;;  %vm4814_vm5 = vcmask 908288   ;;  %s5408_s0 = sshll.u32 %s8338_s22, 4 }
 0xe1a   : > { %v5115_v62 = vsel %vm5103_vm13, %v4539_v56, 0  ;;  %vm5096_vm1 = vmpackc.low %vm5095_vm15, %vm5094_vm14  ;;  %v5112_v7 = vsel %vm5103_vm13, %v7258_v44, 0  ;;  %5390 = vmatmul.msk.bf16.vlgmr.msra.gmra.mxu3 %vm8303_vm12, %v4555_v34  ;;  %vm8311_vm13 = vcmask 916480  }
 0xe1b   : > { %4668 = vrot.lane.b32.xlu1 %v4653_v5, %s8042_s26  ;;  %vm5110_vm11 = vmpackc.low %vm5109_vm10, %vm5108_vm8  ;;  %v5114_v6 = vsel %vm5096_vm1, %v7506_v17, 0  ;;  %v5111_v32 = vsel %vm5096_vm1, %v7245_v42, 0 }
 0xe1c   : > { %v5116_v37 = vsel %vm5110_vm11, %v7500_v49, 0  ;;  %v5113_v35 = vsel %vm5110_vm11, %v7261_v61, 0  ;;  %vm8304_vm4 = vmmov %vm8303_vm12 }
 0xe1d   : > { %5389 = vmatmul.msk.bf16.vlgmr.msra.gmra.mxu2 %vm8304_vm4, %v4555_v34  ;;  %vm8306_vm3 = vmmov %vm8305_vm7 }
 0xe1e   : > { %vm8307_vm9 = vmmov %vm8304_vm4 }
 0xe1f   : > { %v4803_v31 = vpop.permute.xlu0 %4802  ;;  %vm8308_vm2 = vmmov %vm8304_vm4  ;;  %vm8319_vm4 = vcmask 900096  }
 0xe20   : > { %vm8310_vm6 = vmmov %vm8309_vm0 }
 0xe21   : > { %4670 = vrot.lane.b32.xlu2 %v4654_v0, %s8042_s26  ;;  %4672 = vrot.lane.b32.xlu0 %v4655_v3, %s8042_s26  ;;  %vm8312_vm14 = vmmov %vm8311_vm13 }
 0xe22   : > { %vm8313_vm15 = vmmov %vm8311_vm13 }
 0xe23   : > { %4759 = vrot.lane.b32.xlu1 %v4743_v43, %s8139_s27  ;;  %vm8314_vm8 = vmmov %vm8308_vm2 }
 0xe24   : > { %vm8315_vm10 = vmmov %vm8308_vm2 }
 0xe25   : > { %vm8316_vm1 = vmmov %vm8308_vm2 }
 0xe26   : > { %vm8317_vm11 = vmmov %vm8311_vm13 }
 0xe27   : > { %v7663_v9 = vpop.permute.xlu0 %4892  ;;  %vm8318_vm12 = vmmov %vm8316_vm1 }
 0xe29   : > { %4761 = vrot.lane.b32.xlu2 %v4744_v52, %s8139_s27  ;;  %4757 = vrot.lane.b32.xlu0 %v4742_v54, %s8139_s27  ;;  %v4764_v54 = vsel %vm8312_vm14, %v7634_v1, %v7603_v10 }
 0xe2b   : > { %5040 = vrot.lane.b32.xlu1 %v4539_v56, %s5526_s29 }
 0xe2f   : > { %v7667_v2 = vpop.permute.xlu0 %4981 }
 0xe31   : > { %5042 = vrot.lane.b32.xlu2 %v7500_v49, %s5526_s29  ;;  %5038 = vrot.lane.b32.xlu0 %v7506_v17, %s5526_s29  ;;  %v4556_v17 = vld [vmem:[%s7776_s13 + $0x4] sm:$0xf] }
 0xe33   : > { %4900 = vrot.lane.b32.xlu1 %v4884_v48, %s8253_s17 }
 0xe39   : > { %4902 = vrot.lane.b32.xlu2 %v4885_v30, %s8253_s17  ;;  %4898 = vrot.lane.b32.xlu0 %v4883_v41, %s8253_s17  ;;  %v4558_v30 = vld [vmem:[%s7776_s13 + $0xc] sm:$0xf] }
 0xe3b   : > { %4989 = vrot.lane.b32.xlu1 %v4973_v63, %s8025_s24 }
 0xe41   : > { %4991 = vrot.lane.b32.xlu2 %v4974_v12, %s8025_s24  ;;  %4987 = vrot.lane.b32.xlu0 %v4972_v45, %s8025_s24  ;;  %s5527_s24 = smov 94   ;;  %v4763_v12 = vsel %vm8317_vm11, %v7643_v60, %v7634_v1 }
 0xe43   : > { %5034 = vrot.lane.b32.xlu1 %v7258_v44, %s5526_s29  ;;  %v643_v44 = vld [vmem:[%s7765_s2 + $0x20] sm:$0xff] }
 0xe49   : > { %5036 = vrot.lane.b32.xlu2 %v7261_v61, %s5526_s29  ;;  %5032 = vrot.lane.b32.xlu0 %v7245_v42, %s5526_s29  ;;  %v683_v42 = vld [vmem:[%s7766_s3 + $0x20] sm:$0xff]  ;;  %v4805_v61 = vpop.permute.xlu1 %4804 }
 0xe4a   : > { %v4815_v43 = vsel %vm4814_vm5, %v4803_v31, %v4805_v61  ;;  %v4816_v58 = vsel %vm4814_vm5, %v4805_v61, %v7629_v18 }
 0xe4b   : > { %5131 = vrot.lane.b32.xlu1 %v5115_v62, %s5527_s24 }
 0xe51   : > { %5129 = vrot.lane.b32.xlu0 %v5114_v6, %s5527_s24  ;;  %5133 = vrot.lane.b32.xlu2 %v5116_v37, %s5527_s24  ;;  %v7656_v29 = vpop.permute.xlu1 %4894 }
 0xe53   : > { %5125 = vrot.lane.b32.xlu1 %v5112_v7, %s5527_s24 }
 0xe59   : > { %5123 = vrot.lane.b32.xlu0 %v5111_v32, %s5527_s24  ;;  %5127 = vrot.lane.b32.xlu2 %v5113_v35, %s5527_s24  ;;  %v7665_v50 = vpop.permute.xlu1 %4983  ;;  %s521_s24 = scalar_lea.vmem %s7779_s16, %s5408_s0 }
 0xe5b   : > { %5177 = vperm.xlu1 %5469, %v732_v36  }
 0xe61   : > { %666 = vperm.xlu0 %5468, %v643_v44   ;;  %706 = vperm.xlu2 %5470, %v683_v42   ;;  %v4561_v44 = vld [vmem:[%s7776_s13 + $0x18] sm:$0xf] }
 0xe69   : > { %5184 = vperm.xlu0 %5468, %v742_v33  }
 0xe6b   : > { %v4579_v4 = vpop.permute.xlu2 %4578 }
 0xe73   : > { %v4813_v23 = vpop.permute.xlu2 %4812 }
 0xe7b   : > { %v4671_v39 = vpop.permute.xlu2 %4670 }
 0xe7c   : > { %v4583_v28 = vpop.permute.xlu1 %4582 }
 0xe83   : > { %v4581_v38 = vpop.permute.xlu0 %4580  ;;  %v4762_v56 = vpop.permute.xlu2 %4761 }
 0xe84   : > { %v4586_v40 = vsel %vm8305_vm7, %v4579_v4, %v4581_v38  ;;  %v4587_v49 = vsel %vm8306_vm3, %v4581_v38, %v4583_v28  ;;  %vm5044_vm7 = vcmask 777216   ;;  %vm8320_vm3 = vmmov %vm8319_vm4 }
 0xe85   : > { %v4811_v16 = vpop.permute.xlu1 %4810  ;;  %4601 = vmatpush.bf16.msra.mxu0 %v4586_v40  ;;  %4614 = vmatpush.bf16.msra.mxu1 %v4587_v49  ;;  %v4905_v15 = vsel %vm8320_vm3, %v7656_v29, %v7641_v57 }
 0xe86   : > { %v4818_v52 = vsel %vm4814_vm5, %v4811_v16, %v4813_v23 }
 0xe89   : > { %4602 = vmatpush.bf16.msra.mxu0 %v7484_v47  ;;  %4615 = vmatpush.bf16.msra.mxu1 %v7491_v59 }
 0xe8b   : > { %v4809_v51 = vpop.permute.xlu0 %4808  ;;  %v5043_v5 = vpop.permute.xlu2 %5042 }
 0xe8c   : > { %5388 = vmatmul.msk.bf16.vlgmr.msra.gmra.mxu1 %vm8307_vm9, %v4556_v17  ;;  %5387 = vmatmul.msk.bf16.vlgmr.msra.gmra.mxu0 %vm8308_vm2, %v4556_v17  ;;  %v4817_v13 = vsel %vm4814_vm5, %v4809_v51, %v4811_v16  ;;  %vm8321_vm9 = vmmov %vm8320_vm3  ;;  %vm8324_vm5 = vcmask 785408  }
 0xe8d   : > { %v4669_v19 = vpop.permute.xlu1 %4668  ;;  %vm8322_vm2 = vmmov %vm8316_vm1 }
 0xe8e   : > { %v4676_v55 = vsel %vm8309_vm0, %v4669_v19, %v4671_v39  ;;  %vm8323_vm0 = vmmov %vm8316_vm1 }
 0xe8f   : > { %4691 = vmatpush.bf16.msrb.mxu0 %v4676_v55  ;;  %vm8327_vm14 = vmmov %vm8324_vm5 }
 0xe90   : > { %v4994_v1 = vsel %vm8327_vm14, %v7665_v50, %v7651_v25  ;;  %v4562_v25 = vld [vmem:[%s7776_s13 + $0x1c] sm:$0xf]  ;;  %vm8331_vm11 = vmmov %vm8323_vm0 }
 0xe93   : > { %4692 = vmatpush.bf16.msrb.mxu0 %v7497_v27  ;;  %v4673_v47 = vpop.permute.xlu0 %4672  ;;  %v4557_v27 = vld [vmem:[%s7776_s13 + $0x8] sm:$0xf] }
 0xe94   : > { %v4677_v59 = vsel %vm8310_vm6, %v4671_v39, %v4673_v47  ;;  %vm8325_vm6 = vmmov %vm8323_vm0 }
 0xe95   : > { %v4760_v0 = vpop.permute.xlu1 %4759  ;;  %4704 = vmatpush.bf16.msrb.mxu1 %v4677_v59 }
 0xe96   : > { %v4766_v3 = vsel %vm8311_vm13, %v4760_v0, %v4762_v56  ;;  %vm8326_vm13 = vmmov %vm8320_vm3 }
 0xe97   : > { %4832 = vmatpush.bf16.msra.mxu0 %v4817_v13  ;;  %4793 = vmatpush.bf16.msrb.mxu3 %v4766_v3  ;;  %v4904_v6 = vsel %vm8326_vm13, %v7663_v9, %v7656_v29  ;;  %vm8334_vm3 = vmmov %vm8323_vm0 }
 0xe99   : > { %4705 = vmatpush.bf16.msrb.mxu1 %v7494_v8  ;;  %v4903_v8 = vpop.permute.xlu2 %4902 }
 0xe9b   : > { %4833 = vmatpush.bf16.msra.mxu0 %v4815_v43  ;;  %4794 = vmatpush.bf16.msrb.mxu3 %v4764_v54  ;;  %v4758_v48 = vpop.permute.xlu0 %4757 }
 0xe9c   : > { %v4765_v41 = vsel %vm8313_vm15, %v4758_v48, %v4760_v0  ;;  %5392 = vmatmul.msk.bf16.vlgmr.msrb.gmra.mxu1 %vm8314_vm8, %v4557_v27  ;;  %5391 = vmatmul.msk.bf16.vlgmr.msrb.gmra.mxu0 %vm8315_vm10, %v4557_v27  ;;  %vm8328_vm15 = vmmov %vm8324_vm5 }
 0xe9d   : > { %4845 = vmatpush.bf16.msra.mxu1 %v4818_v52  ;;  %v5041_v63 = vpop.permute.xlu1 %5040  ;;  %4780 = vmatpush.bf16.msrb.mxu2 %v4765_v41  ;;  %vm8329_vm8 = vmmov %vm8323_vm0  ;;  %v4646_v38 = vpop.f32.mrf.mxu3 }
 0xe9e   : > { %5394 = vmatmul.msk.bf16.vlgmr.msrb.gmra.mxu3 %vm8316_vm1, %v4558_v30  ;;  %v5048_v11 = vsel %vm5044_vm7, %v5041_v63, %v5043_v5  ;;  %vm8330_vm10 = vmmov %vm8324_vm5  ;;  %vm5135_vm1 = vcmask 769024  }
 0xe9f   : > { %v4993_v60 = vsel %vm8330_vm10, %v7667_v2, %v7665_v50  ;;  %v4563_v2 = vld [vmem:[%s7776_s13 + $0x20] sm:$0xf] }
 0xea0   : > { %v4633_v40 = vpop.f32.mrf.mxu2 }
 0xea1   : > { %4846 = vmatpush.bf16.msra.mxu1 %v4816_v58  ;;  %4781 = vmatpush.bf16.msrb.mxu2 %v4763_v12  ;;  %v4992_v10 = vpop.permute.xlu2 %4991 }
 0xea3   : > { %v5039_v45 = vpop.permute.xlu0 %5038 }
 0xea4   : > { %5393 = vmatmul.msk.bf16.vlgmr.msrb.gmra.mxu2 %vm8318_vm12, %v4558_v30  ;;  %v5047_v37 = vsel %vm5044_vm7, %v5039_v45, %v5041_v63  ;;  %vm8332_vm12 = vmmov %vm8323_vm0 }
 0xea5   : > { %v4901_v26 = vpop.permute.xlu1 %4900  ;;  %v4648_v49 = vpop.f32.mrf.mxu3 }
 0xea6   : > { %v4907_v21 = vsel %vm8319_vm4, %v4901_v26, %v4903_v8  ;;  %vm8333_vm4 = vmmov %vm8323_vm0 }
 0xea7   : > { %4934 = vmatpush.bf16.msra.mxu3 %v4907_v21 }
 0xea8   : > { %v4635_v16 = vpop.f32.mrf.mxu2 }
 0xea9   : > { %v5037_v7 = vpop.permute.xlu2 %5036 }
 0xeab   : > { %4935 = vmatpush.bf16.msra.mxu3 %v4905_v15  ;;  %v4899_v14 = vpop.permute.xlu0 %4898 }
 0xeac   : > { %v4906_v22 = vsel %vm8321_vm9, %v4899_v14, %v4901_v26  ;;  %5396 = vmatmul.msk.bf16.vlgmr.msra.gmra.mxu1 %vm8322_vm2, %v4559_v24  ;;  %5395 = vmatmul.msk.bf16.vlgmr.msra.gmra.mxu0 %vm8323_vm0, %v4559_v24  ;;  %vm8336_vm9 = vmmov %vm8323_vm0 }
 0xead   : > { %v4990_v62 = vpop.permute.xlu1 %4989  ;;  %4921 = vmatpush.bf16.msra.mxu2 %v4906_v22 }
 0xeae   : > { %v4996_v18 = vsel %vm8324_vm5, %v4990_v62, %v4992_v10  ;;  %5398 = vmatmul.msk.bf16.vlgmr.msra.gmra.mxu3 %vm8325_vm6, %v4560_v20 }
 0xeaf   : > { %5075 = vmatpush.bf16.msrb.mxu3 %v5048_v11  ;;  %5023 = vmatpush.bf16.msrb.mxu1 %v4996_v18 }
 0xeb1   : > { %4922 = vmatpush.bf16.msra.mxu2 %v4904_v6  ;;  %v5134_v42 = vpop.permute.xlu2 %5133 }
 0xeb3   : > { %5024 = vmatpush.bf16.msrb.mxu1 %v4994_v1  ;;  %v4988_v32 = vpop.permute.xlu0 %4987 }
 0xeb4   : > { %v4995_v35 = vsel %vm8328_vm15, %v4988_v32, %v4990_v62  ;;  %5397 = vmatmul.msk.bf16.vlgmr.msra.gmra.mxu2 %vm8329_vm8, %v4560_v20 }
 0xeb5   : > { %5062 = vmatpush.bf16.msrb.mxu2 %v5047_v37  ;;  %v5035_v36 = vpop.permute.xlu1 %5034  ;;  %5010 = vmatpush.bf16.msrb.mxu0 %v4995_v35 }
 0xeb6   : > { %v5046_v57 = vsel %vm5044_vm7, %v5035_v36, %v5037_v7 }
 0xeb7   : > { %5076 = vmatpush.bf16.msrb.mxu3 %v5046_v57 }
 0xeb9   : > { %5011 = vmatpush.bf16.msrb.mxu0 %v4993_v60  ;;  %v5128_v9 = vpop.permute.xlu2 %5127 }
 0xebb   : > { %v5033_v61 = vpop.permute.xlu0 %5032 }
 0xebc   : > { %5400 = vmatmul.msk.bf16.vlgmr.msrb.gmra.mxu1 %vm8331_vm11, %v4561_v44  ;;  %v5045_v33 = vsel %vm5044_vm7, %v5033_v61, %v5035_v36  ;;  %5399 = vmatmul.msk.bf16.vlgmr.msrb.gmra.mxu0 %vm8332_vm12, %v4561_v44  ;;  %vm8335_vm7 = vmmov %vm8323_vm0 }
 0xebd   : > { %v5132_v31 = vpop.permute.xlu1 %5131  ;;  %5063 = vmatpush.bf16.msrb.mxu2 %v5045_v33 }
 0xebe   : > { %v5139_v29 = vsel %vm5135_vm1, %v5132_v31, %v5134_v42  ;;  %5402 = vmatmul.msk.bf16.vlgmr.msrb.gmra.mxu3 %vm8333_vm4, %v4562_v25 }
 0xebf   : > { %5166 = vmatpush.bf16.msra.mxu1 %v5139_v29 }
 0xec1   : > { %v707_v61 = vpop.permute.xlu2 %706 }
 0xec3   : > { %v5130_v4 = vpop.permute.xlu0 %5129 }
 0xec4   : > { %v5138_v34 = vsel %vm5135_vm1, %v5130_v4, %v5132_v31  ;;  %5401 = vmatmul.msk.bf16.vlgmr.msrb.gmra.mxu2 %vm8334_vm3, %v4562_v25 }
 0xec5   : > { %v5126_v50 = vpop.permute.xlu1 %5125  ;;  %5153 = vmatpush.bf16.msra.mxu0 %v5138_v34 }
 0xec6   : > { %v5137_v23 = vsel %vm5135_vm1, %v5126_v50, %v5128_v9 }
 0xec7   : > { %5167 = vmatpush.bf16.msra.mxu1 %v5137_v23 }
 0xecb   : > { %v5124_v28 = vpop.permute.xlu0 %5123 }
 0xecc   : > { %5404 = vmatmul.msk.bf16.vlgmr.msra.gmra.mxu1 %vm8335_vm7, %v4563_v2  ;;  %v5136_v39 = vsel %vm5135_vm1, %v5124_v28, %v5126_v50 }
 0xecd   : > { %5154 = vmatpush.bf16.msra.mxu0 %v5136_v39  ;;  %v5178_v42 = vpop.permute.xlu1 %5177 }
 0xed0   : > { %5403 = vmatmul.msk.bf16.vlgmr.msra.gmra.mxu0 %vm8336_vm9, %v4563_v2 }
 0xed3   : > { %v667_v62 = vpop.permute.xlu0 %666 }
 0xed4   : > { %v678_v36 = vmul.f32 %v667_v62, %v5834_v53  ;;  %v677_v4 = vmul.f32 %v667_v62, %v5825_v46 }
 0xed6   : > { %v718_v34 = vadd.f32 %v707_v61, %v678_v36  ;;  %v717_v39 = vadd.f32 %v707_v61, %v677_v4 }
 0xedb   : > { %v5185_v31 = vpop.permute.xlu0 %5184 }
 0xf09   : > { %v4617_v56 = vpop.f32.mrf.mxu1  ;;  %v4604_v17 = vpop.f32.mrf.mxu0 }
 0xf0a   : > { %v4647_v12 = vadd.f32 %v4646_v38, %v4617_v56  ;;  %v4634_v45 = vadd.f32 %v4633_v40, %v4604_v17 }
 0xf11   : > { %v4619_v51 = vpop.f32.mrf.mxu1  ;;  %v4606_v19 = vpop.f32.mrf.mxu0 }
 0xf19   : > { %v4707_v55 = vpop.f32.mrf.mxu1  ;;  %v4694_v13 = vpop.f32.mrf.mxu0 }
 0xf1a   : > { %v4712_v26 = vadd.f32 %v4707_v55, %v4647_v12  ;;  %v4711_v21 = vadd.f32 %v4694_v13, %v4634_v45 }
 0xf21   : > { %v4709_v5 = vpop.f32.mrf.mxu1  ;;  %v4696_v47 = vpop.f32.mrf.mxu0 }
 0xf22   : > { %v4796_v59 = vpop.f32.mrf.mxu3 }
 0xf23   : > { %v4801_v24 = vadd.f32 %v4796_v59, %v4712_v26 }
 0xf27   : > { %v4783_v0 = vpop.f32.mrf.mxu2 }
 0xf28   : > { %v4800_v15 = vadd.f32 %v4783_v0, %v4711_v21 }
 0xf29   : > { %v4848_v3 = vpop.f32.mrf.mxu1  ;;  %v4835_v43 = vpop.f32.mrf.mxu0 }
 0xf2a   : > { %v4798_v52 = vpop.f32.mrf.mxu3  ;;  %v4853_v14 = vadd.f32 %v4848_v3, %v4801_v24  ;;  %v4852_v18 = vadd.f32 %v4835_v43, %v4800_v15 }
 0xf2f   : > { %v4785_v27 = vpop.f32.mrf.mxu2 }
 0xf31   : > { %v4850_v54 = vpop.f32.mrf.mxu1  ;;  %v4837_v48 = vpop.f32.mrf.mxu0 }
 0xf32   : > { %v4937_v30 = vpop.f32.mrf.mxu3 }
 0xf33   : > { %v4942_v6 = vadd.f32 %v4937_v30, %v4853_v14 }
 0xf37   : > { %v4924_v41 = vpop.f32.mrf.mxu2 }
 0xf38   : > { %v4941_v37 = vadd.f32 %v4924_v41, %v4852_v18 }
 0xf39   : > { %v5026_v8 = vpop.f32.mrf.mxu1  ;;  %v5013_v63 = vpop.f32.mrf.mxu0 }
 0xf3a   : > { %v4939_v58 = vpop.f32.mrf.mxu3  ;;  %v5031_v7 = vadd.f32 %v5026_v8, %v4942_v6  ;;  %v5030_v57 = vadd.f32 %v5013_v63, %v4941_v37 }
 0xf3f   : > { %v4926_v10 = vpop.f32.mrf.mxu2 }
 0xf41   : > { %v5028_v11 = vpop.f32.mrf.mxu1  ;;  %v5015_v20 = vpop.f32.mrf.mxu0 }
 0xf42   : > { %v5078_v22 = vpop.f32.mrf.mxu3 }
 0xf43   : > { %v5083_v32 = vadd.f32 %v5078_v22, %v5031_v7 }
 0xf47   : > { %v5065_v1 = vpop.f32.mrf.mxu2 }
 0xf48   : > { %v5082_v25 = vadd.f32 %v5065_v1, %v5030_v57 }
 0xf49   : > { %v5169_v35 = vpop.f32.mrf.mxu1 }
 0xf4a   : > { %v5174_v60 = vadd.f32 %v5169_v35, %v5083_v32  ;;  %v5080_v44 = vpop.f32.mrf.mxu3 }
 0xf4c   : > { %v5181_v33 = vmul.f32 %v5178_v42, %v5174_v60 }
 0xf4d   : > { %v5156_v29 = vpop.f32.mrf.mxu0 }
 0xf4e   : > { %v5188_v9 = vadd.f32 %v5185_v31, %v5181_v33  ;;  %v5173_v50 = vadd.f32 %v5156_v29, %v5082_v25 }
 0xf4f   : > { %v5067_v23 = vpop.f32.mrf.mxu2 }
 0xf50   : > { %v5190_v2 = vadd.f32 %v5188_v9, %v718_v34  ;;  %v5180_v28 = vmul.f32 %v5178_v42, %v5173_v50 }
 0xf51   : > { %v5171_v53 = vpop.f32.mrf.mxu1 }
 0xf52   : > { %v5192_v38 = vmax.f32 %v5190_v2, 0.0  ;;  %v5187_v40 = vadd.f32 %v5185_v31, %v5180_v28 }
 0xf54   : > { %5194 = vst [vmem:[%s521_s24 + $0x8] sm:$0xff] %v5192_v38  ;;  %v5189_v49 = vadd.f32 %v5187_v40, %v717_v39 }
 0xf55   : > { %v5158_v16 = vpop.f32.mrf.mxu0 }
 0xf56   : > { %v5191_v56 = vmax.f32 %v5189_v49, 0.0 }
 0xf58   : > { %5193 = vst [vmem:[%s521_s24] sm:$0xff] %v5191_v56 }
 0xf59 PF: > { %s26_s21 = sadd.s32 1, %s5477_s21  }
 0xf5a   : > { %p23_p4 = scmp.ge.s32.totalorder %s26_s21, 4  }
 0xf5c   :  { %25 = sbr.rel (!%p23_p4) target bundleno = 4 (0x4), region = 114 }

</bundles_post_ra>
